<compile_context>
chip_gen: v7x
topology: tpu7x:2x2x1
jax: 0.10.0
libtpu: 0.0.40
codegen_flags: <defaults>
</compile_context>

<pallas_src>
import functools
import jax
import jax.numpy as jnp
from jax import lax
from jax.experimental import pallas as pl
from jax.experimental.pallas import tpu as pltpu  # noqa: F401  (kept for larger-shape tuning)


# ----- vec_pack row indices (each row is d_model wide) -----
(E_SA_BQ, E_SA_BK, E_SA_BV, E_SA_OB,
 E_LN1_G, E_LN1_B, E_L2_B, E_LN2_G, E_LN2_B,
 D_SA_BQ, D_SA_BK, D_SA_BV, D_SA_OB,
 D_LN1_G, D_LN1_B,
 D_CA_BQ, D_CA_BK, D_CA_BV, D_CA_OB,
 D_LN2_G, D_LN2_B, D_L2_B, D_LN3_G, D_LN3_B) = range(24)
N_VEC = 24


# ---------------- fused Pallas kernel (whole batch in one invocation) ----------------

def _transam_kernel(x_ref, peb_ref, vec_ref, ffb_ref, outb_ref,
                    emb_w, e_sa_w, e_sa_ow, e_l1_w, e_l2_w,
                    d_sa_w, d_sa_ow, d_ca_w, d_ca_ow, d_l1_w, d_l2_w,
                    outw_ref, out_ref, *, nhead, batch, seq):
    D = peb_ref.shape[1]
    H, S, B = nhead, seq, batch
    HD = D // H
    scale = 1.0 / float(HD) ** 0.5
    f32 = jnp.float32

    def vrow(i):                       # (1, D) bias / LN-param row from the packed table
        return vec_ref[i:i + 1, :]

    def layer_norm(x, ig, ib):         # PyTorch LayerNorm, eps=1e-5, affine
        mu = jnp.mean(x, axis=-1, keepdims=True)
        xc = x - mu
        var = jnp.mean(xc * xc, axis=-1, keepdims=True)
        return xc * lax.rsqrt(var + 1e-5) * vrow(ig) + vrow(ib)

    # causal mask built in-kernel (no HBM table), pre-tiled over heads on the sublane axis
    rows = lax.broadcasted_iota(jnp.int32, (S, S), 0)
    cols = lax.broadcasted_iota(jnp.int32, (S, S), 1)
    causal = jnp.where(rows >= cols, 0.0, -1e9).astype(f32)      # (S, S)
    causal_hs = jnp.concatenate([causal] * H, axis=0)            # (H*S, S)

    def mha(tgt, mem, w_ref, bq, bk, bv, ow_ref, ob, masked, fused):
        w = w_ref[...]                                           # (D, 3D)
        if fused:                      # self-attention: one (B*S, D) @ (D, 3D) matmul
            qkv = jnp.dot(tgt, w, preferred_element_type=f32)
            q = qkv[:, :D] + vrow(bq)
            k = qkv[:, D:2 * D] + vrow(bk)
            v = qkv[:, 2 * D:] + vrow(bv)
        else:                          # cross-attention: q from tgt, k/v from memory
            q = jnp.dot(tgt, w[:, :D], preferred_element_type=f32) + vrow(bq)
            kv = jnp.dot(mem, w[:, D:], preferred_element_type=f32)
            k = kv[:, :D] + vrow(bk)
            v = kv[:, D:] + vrow(bv)

        outs = []
        for b in range(B):             # static unroll; rows of one batch are sublane-aligned
            rs = slice(b * S, (b + 1) * S)
            qb, kb, vb = q[rs], k[rs], v[rs]
            # all-head scores stacked on the sublane axis -> single softmax pass
            sc = jnp.concatenate(
                [jnp.einsum('qd,kd->qk',
                            qb[:, h * HD:(h + 1) * HD] * scale,
                            kb[:, h * HD:(h + 1) * HD],
                            preferred_element_type=f32) for h in range(H)], axis=0)
            if masked:
                sc = sc + causal_hs
            sc = sc - jnp.max(sc, axis=-1, keepdims=True)
            p = jnp.exp(sc)
            p = p * pl.reciprocal(jnp.sum(p, axis=-1, keepdims=True), approx=True)
            # per-head output projection folded into a full-width register accumulator
            ctx = None
            for h in range(H):
                pv = jnp.dot(p[h * S:(h + 1) * S, :], vb[:, h * HD:(h + 1) * HD],
                             preferred_element_type=f32)                       # (S, HD)
                c = jnp.dot(pv, ow_ref[h * HD:(h + 1) * HD, :],
                            preferred_element_type=f32)                        # (S, D)
                ctx = c if ctx is None else ctx + c
            outs.append(ctx)
        return jnp.concatenate(outs, axis=0) + vrow(ob)                        # (B*S, D)

    def ffn(x, w1_ref, b1_row, w2_ref, b2_row):
        h1 = jnp.dot(x, w1_ref[...], preferred_element_type=f32) \
            + ffb_ref[b1_row:b1_row + 1, :]
        h1 = jnp.maximum(h1, 0.0)      # relu (nn.Transformer default activation)
        return jnp.dot(h1, w2_ref[...], preferred_element_type=f32) + vrow(b2_row)

    # ----- input embedding + positional encoding (emb bias folded into PE table) -----
    x = x_ref[...]                     # (B*S, select_dim)
    ew = emb_w[...]                    # (select_dim, D)
    if ew.shape[0] == 1:               # degenerate contraction dim -> broadcast multiply
        emb = x * ew
    else:
        emb = jnp.dot(x, ew, preferred_element_type=f32)
    emb = emb + peb_ref[...]           # (B*S, D)

    # ----- encoder layer (post-norm, causal self-attention) -----
    sa = mha(emb, emb, e_sa_w, E_SA_BQ, E_SA_BK, E_SA_BV, e_sa_ow, E_SA_OB, True, True)
    xenc = layer_norm(emb + sa, E_LN1_G, E_LN1_B)
    xenc = layer_norm(xenc + ffn(xenc, e_l1_w, 0, e_l2_w, E_L2_B), E_LN2_G, E_LN2_B)

    # ----- decoder layer: tgt = encoder output, memory = pos-encoded embedding -----
    # (matches torch forward: transformer_decoder(encoder_output, src); no tgt/memory mask)
    y = xenc
    sa = mha(y, y, d_sa_w, D_SA_BQ, D_SA_BK, D_SA_BV, d_sa_ow, D_SA_OB, False, True)
    y = layer_norm(y + sa, D_LN1_G, D_LN1_B)
    ca = mha(y, emb, d_ca_w, D_CA_BQ, D_CA_BK, D_CA_BV, d_ca_ow, D_CA_OB, False, False)
    y = layer_norm(y + ca, D_LN2_G, D_LN2_B)
    y = layer_norm(y + ffn(y, d_l1_w, 1, d_l2_w, D_L2_B), D_LN3_G, D_LN3_B)

    # ----- output embedding, lane-dense (select_dim, B*S) layout (trans_b matmul) -----
    outT = jnp.einsum('cd,bd->cb', outw_ref[...], y, preferred_element_type=f32)
    out_ref[...] = (outT + outb_ref[...]).astype(out_ref.dtype)


# ---------------- parameter prep (one-time, host side) ----------------

def _positional_encoding_table(max_len, d_model):
    pos = jnp.arange(max_len, dtype=jnp.float32)[:, None]
    i = jnp.arange(d_model, dtype=jnp.float32)
    div_term = 1.0 / (10000.0 ** (2.0 * i / d_model))
    pe = jnp.zeros((max_len, d_model), jnp.float32)
    pe = pe.at[:, 0::2].set(jnp.sin(pos * div_term[0::2]))
    pe = pe.at[:, 1::2].set(jnp.cos(pos * div_term[1::2]))
    return pe  # (max_len, d_model)


def prepare_params(params):
    """One-time prep: transpose weights to (Din, Dout), pack all small bias / LayerNorm
    vectors into one (24, D) array, pack the d_ff biases into a (2, d_ff) array and fold
    the input-embedding bias into the PE table."""
    d = params["d_model"]
    enc, dec = params["enc"], params["dec"]

    def row(v):
        return jnp.asarray(v, jnp.float32).reshape(1, -1)

    def in_b_rows(b):                           # (3D,) -> (3, D) = q/k/v bias rows
        return jnp.asarray(b, jnp.float32).reshape(3, d)

    vec_pack = jnp.concatenate([
        in_b_rows(enc["sa"]["in_b"]), row(enc["sa"]["out_b"]),
        row(enc["ln1_g"]), row(enc["ln1_b"]),
        row(enc["l2_b"]), row(enc["ln2_g"]), row(enc["ln2_b"]),
        in_b_rows(dec["sa"]["in_b"]), row(dec["sa"]["out_b"]),
        row(dec["ln1_g"]), row(dec["ln1_b"]),
        in_b_rows(dec["ca"]["in_b"]), row(dec["ca"]["out_b"]),
        row(dec["ln2_g"]), row(dec["ln2_b"]),
        row(dec["l2_b"]), row(dec["ln3_g"]), row(dec["ln3_b"]),
    ], axis=0)
    assert vec_pack.shape == (N_VEC, d)

    ffb_pack = jnp.stack([jnp.asarray(enc["l1_b"], jnp.float32),
                          jnp.asarray(dec["l1_b"], jnp.float32)], axis=0)   # (2, d_ff)

    def wt(w):                                  # torch (Dout, Din) -> (Din, Dout)
        return jnp.asarray(w, jnp.float32).T

    weights = [
        wt(params["in_emb_w"]),                                  # (select_dim, D)
        wt(enc["sa"]["in_w"]), wt(enc["sa"]["out_w"]),
        wt(enc["l1_w"]), wt(enc["l2_w"]),
        wt(dec["sa"]["in_w"]), wt(dec["sa"]["out_w"]),
        wt(dec["ca"]["in_w"]), wt(dec["ca"]["out_w"]),
        wt(dec["l1_w"]), wt(dec["l2_w"]),
        jnp.asarray(params["out_emb_w"], jnp.float32),           # keep (select_dim, D): trans_b
    ]

    pe_b = params["pe"] + row(params["in_emb_b"])                # PE + embedding bias
    out_b = jnp.asarray(params["out_emb_b"], jnp.float32).reshape(-1, 1)   # (select_dim, 1)

    return dict(d_model=d, nhead=params["nhead"],
                pe_b=pe_b, vec_pack=vec_pack, ffb_pack=ffb_pack,
                out_b=out_b, weights=weights)


# ---------------- forward (single pallas_call, no grid) ----------------

def transam_forward(prep, src):
    """src: (S, B, select_dim) seq-first (PyTorch batch_first=False). Returns (S, B, select_dim)."""
    s, b, cd = src.shape

    # tiny (cd-wide) layout fixups stay in the wrapper; the D-wide activation never leaves VMEM
    x2d = jnp.transpose(src, (1, 0, 2)).reshape(b * s, cd)       # b-major flattened input
    peb = jnp.tile(prep["pe_b"][:s], (b, 1))                     # (B*S, D) PE + emb bias

    inputs = [x2d, peb, prep["vec_pack"], prep["ffb_pack"], prep["out_b"]] + prep["weights"]

    kernel = functools.partial(_transam_kernel, nhead=prep["nhead"], batch=b, seq=s)
    outT = pl.pallas_call(
        kernel,
        out_shape=jax.ShapeDtypeStruct((cd, b * s), jnp.float32),  # lane-dense output
    )(*inputs)

    return jnp.transpose(outT.reshape(cd, b, s), (2, 1, 0))      # back to (S, B, select_dim)


# ---------------- deterministic parameter init (torch layout) ----------------

def init_params(key, d_model=32, nhead=4, d_ff=64, select_dim=1, max_len=64):
    keys = iter(jax.random.split(key, 64))

    def w(shape, scale=0.05):
        return jax.random.normal(next(keys), shape, jnp.float32) * scale

    def mha_params():
        return dict(
            in_w=w((3 * d_model, d_model)), in_b=w((3 * d_model,)),
            out_w=w((d_model, d_model)), out_b=w((d_model,)),
        )

    def ffn_ln(n_norms):
        p = dict(
            l1_w=w((d_ff, d_model)), l1_b=w((d_ff,)),
            l2_w=w((d_model, d_ff)), l2_b=w((d_model,)),
        )
        for i in range(1, n_norms + 1):
            p[f"ln{i}_g"] = jnp.ones((d_model,), jnp.float32)
            p[f"ln{i}_b"] = jnp.zeros((d_model,), jnp.float32)
        return p

    enc = dict(sa=mha_params(), **ffn_ln(2))
    dec = dict(sa=mha_params(), ca=mha_params(), **ffn_ln(3))

    return dict(
        d_model=d_model, nhead=nhead,
        in_emb_w=w((d_model, select_dim)), in_emb_b=w((d_model,)),
        # init_weights(): output bias zero, weight uniform(-0.1, 0.1)
        out_emb_w=jax.random.uniform(next(keys), (select_dim, d_model), jnp.float32, -0.1, 0.1),
        out_emb_b=jnp.zeros((select_dim,), jnp.float32),
        pe=_positional_encoding_table(max_len, d_model),
        enc=enc, dec=dec,
    )


if __name__ == "__main__":
    key = jax.random.PRNGKey(0)
    pkey, xkey = jax.random.split(key)

    S, B, SELECT_DIM = 8, 2, 1          # small shapes: seq=8, batch=2, select_dim=1
    D_MODEL, NHEAD, D_FF = 32, 4, 64    # scaled-down analog of feature_size=250, nhead=10

    params = init_params(pkey, d_model=D_MODEL, nhead=NHEAD, d_ff=D_FF,
                         select_dim=SELECT_DIM, max_len=64)
    prep = prepare_params(params)       # one-time: packed/transposed weights, PE(+bias) table
    src = jax.random.normal(xkey, (S, B, SELECT_DIM), jnp.float32)

    out = transam_forward(prep, src)
    out = jax.block_until_ready(out)
    assert out.shape == (S, B, SELECT_DIM) and out.dtype == jnp.float32
    assert bool(jnp.all(jnp.isfinite(out)))
    print("KERNEL_OK")
</pallas_src>

<mosaic_0001>
module attributes {stable_mosaic.version = 11 : i64} {
  func.func @_transam_kernel(%arg0: memref<16x1xf32, #tpu.memory_space<vmem>>, %arg1: memref<16x32xf32, #tpu.memory_space<vmem>>, %arg2: memref<24x32xf32, #tpu.memory_space<vmem>>, %arg3: memref<2x64xf32, #tpu.memory_space<vmem>>, %arg4: memref<1x1xf32, #tpu.memory_space<vmem>>, %arg5: memref<1x32xf32, #tpu.memory_space<vmem>>, %arg6: memref<32x96xf32, #tpu.memory_space<vmem>>, %arg7: memref<32x32xf32, #tpu.memory_space<vmem>>, %arg8: memref<32x64xf32, #tpu.memory_space<vmem>>, %arg9: memref<64x32xf32, #tpu.memory_space<vmem>>, %arg10: memref<32x96xf32, #tpu.memory_space<vmem>>, %arg11: memref<32x32xf32, #tpu.memory_space<vmem>>, %arg12: memref<32x96xf32, #tpu.memory_space<vmem>>, %arg13: memref<32x32xf32, #tpu.memory_space<vmem>>, %arg14: memref<32x64xf32, #tpu.memory_space<vmem>>, %arg15: memref<64x32xf32, #tpu.memory_space<vmem>>, %arg16: memref<1x32xf32, #tpu.memory_space<vmem>>, %arg17: memref<1x16xf32, #tpu.memory_space<vmem>>) attributes {dimension_semantics = [], scalar_prefetch = 0 : i64, scratch_operands = 0 : i64, tpu.core_type = #tpu.core_type<tc>} {
    %0 = tpu.iota {dimensions = array<i32: 0>} : vector<8x8xi32>
    %1 = tpu.iota {dimensions = array<i32: 1>} : vector<8x8xi32>
    %2 = arith.cmpi sge, %0, %1 : vector<8x8xi32>
    %cst = arith.constant 0.000000e+00 : f32
    %cst_0 = arith.constant -1.000000e+09 : f32
    %3 = vector.broadcast %cst : f32 to vector<8x8xf32>
    %4 = vector.broadcast %cst_0 : f32 to vector<8x8xf32>
    %5 = arith.select %2, %3, %4 : vector<8x8xi1>, vector<8x8xf32>
    %6 = tpu.concatenate %5, %5, %5, %5 in 0 : vector<8x8xf32>, vector<8x8xf32>, vector<8x8xf32>, vector<8x8xf32> -> vector<32x8xf32>
    %c0 = arith.constant 0 : index
    %c0_1 = arith.constant 0 : index
    %7 = vector.load %arg0[%c0, %c0_1] : memref<16x1xf32, #tpu.memory_space<vmem>>, vector<16x1xf32>
    %c0_2 = arith.constant 0 : index
    %c0_3 = arith.constant 0 : index
    %8 = vector.load %arg5[%c0_2, %c0_3] : memref<1x32xf32, #tpu.memory_space<vmem>>, vector<1x32xf32>
    %9 = vector.broadcast %7 : vector<16x1xf32> to vector<16x32xf32>
    %10 = vector.broadcast %8 : vector<1x32xf32> to vector<16x32xf32>
    %11 = arith.mulf %9, %10 : vector<16x32xf32>
    %c0_4 = arith.constant 0 : index
    %c0_5 = arith.constant 0 : index
    %12 = vector.load %arg1[%c0_4, %c0_5] : memref<16x32xf32, #tpu.memory_space<vmem>>, vector<16x32xf32>
    %13 = arith.addf %11, %12 : vector<16x32xf32>
    %c0_6 = arith.constant 0 : index
    %c0_7 = arith.constant 0 : index
    %14 = vector.load %arg6[%c0_6, %c0_7] : memref<32x96xf32, #tpu.memory_space<vmem>>, vector<32x96xf32>
    %cst_8 = arith.constant dense<0.000000e+00> : vector<16x96xf32>
    %15 = tpu.matmul %13, %14, %cst_8 {dimension_numbers = #tpu.dot_dimension_numbers<[1], [0], [0], [1], [0, 0, 1, 1], [], []>} : vector<16x32xf32>, vector<32x96xf32>, vector<16x96xf32> -> vector<16x96xf32>
    %16 = vector.extract_strided_slice %15 {offsets = [0, 0], sizes = [16, 32], strides = [1, 1]} : vector<16x96xf32> to vector<16x32xf32>
    %c0_9 = arith.constant 0 : index
    %c0_10 = arith.constant 0 : index
    %17 = vector.load %arg2[%c0_9, %c0_10] : memref<24x32xf32, #tpu.memory_space<vmem>>, vector<1x32xf32>
    %18 = vector.broadcast %17 : vector<1x32xf32> to vector<16x32xf32>
    %19 = arith.addf %16, %18 : vector<16x32xf32>
    %20 = vector.extract_strided_slice %15 {offsets = [0, 32], sizes = [16, 32], strides = [1, 1]} : vector<16x96xf32> to vector<16x32xf32>
    %c1 = arith.constant 1 : index
    %c0_11 = arith.constant 0 : index
    %21 = vector.load %arg2[%c1, %c0_11] : memref<24x32xf32, #tpu.memory_space<vmem>>, vector<1x32xf32>
    %22 = vector.broadcast %21 : vector<1x32xf32> to vector<16x32xf32>
    %23 = arith.addf %20, %22 : vector<16x32xf32>
    %24 = vector.extract_strided_slice %15 {offsets = [0, 64], sizes = [16, 32], strides = [1, 1]} : vector<16x96xf32> to vector<16x32xf32>
    %c2 = arith.constant 2 : index
    %c0_12 = arith.constant 0 : index
    %25 = vector.load %arg2[%c2, %c0_12] : memref<24x32xf32, #tpu.memory_space<vmem>>, vector<1x32xf32>
    %26 = vector.broadcast %25 : vector<1x32xf32> to vector<16x32xf32>
    %27 = arith.addf %24, %26 : vector<16x32xf32>
    %28 = vector.extract_strided_slice %19 {offsets = [0, 0], sizes = [8, 32], strides = [1, 1]} : vector<16x32xf32> to vector<8x32xf32>
    %29 = vector.extract_strided_slice %23 {offsets = [0, 0], sizes = [8, 32], strides = [1, 1]} : vector<16x32xf32> to vector<8x32xf32>
    %30 = vector.extract_strided_slice %27 {offsets = [0, 0], sizes = [8, 32], strides = [1, 1]} : vector<16x32xf32> to vector<8x32xf32>
    %31 = vector.extract_strided_slice %28 {offsets = [0, 0], sizes = [8, 8], strides = [1, 1]} : vector<8x32xf32> to vector<8x8xf32>
    %cst_13 = arith.constant 0.353553385 : f32
    %32 = vector.broadcast %cst_13 : f32 to vector<8x8xf32>
    %33 = arith.mulf %31, %32 : vector<8x8xf32>
    %34 = vector.extract_strided_slice %29 {offsets = [0, 0], sizes = [8, 8], strides = [1, 1]} : vector<8x32xf32> to vector<8x8xf32>
    "tpu.trace_start"() <{level = 10 : i32, message = "qd,kd->qk"}> : () -> ()
    %cst_14 = arith.constant dense<0.000000e+00> : vector<8x8xf32>
    %35 = tpu.matmul %33, %34, %cst_14 {dimension_numbers = #tpu.dot_dimension_numbers<[1], [1], [0], [0], [0, 0, 1, 0], [], []>} : vector<8x8xf32>, vector<8x8xf32>, vector<8x8xf32> -> vector<8x8xf32>
    "tpu.trace_stop"() : () -> ()
    %36 = vector.extract_strided_slice %28 {offsets = [0, 8], sizes = [8, 8], strides = [1, 1]} : vector<8x32xf32> to vector<8x8xf32>
    %cst_15 = arith.constant 0.353553385 : f32
    %37 = vector.broadcast %cst_15 : f32 to vector<8x8xf32>
    %38 = arith.mulf %36, %37 : vector<8x8xf32>
    %39 = vector.extract_strided_slice %29 {offsets = [0, 8], sizes = [8, 8], strides = [1, 1]} : vector<8x32xf32> to vector<8x8xf32>
    "tpu.trace_start"() <{level = 10 : i32, message = "qd,kd->qk"}> : () -> ()
    %cst_16 = arith.constant dense<0.000000e+00> : vector<8x8xf32>
    %40 = tpu.matmul %38, %39, %cst_16 {dimension_numbers = #tpu.dot_dimension_numbers<[1], [1], [0], [0], [0, 0, 1, 0], [], []>} : vector<8x8xf32>, vector<8x8xf32>, vector<8x8xf32> -> vector<8x8xf32>
    "tpu.trace_stop"() : () -> ()
    %41 = vector.extract_strided_slice %28 {offsets = [0, 16], sizes = [8, 8], strides = [1, 1]} : vector<8x32xf32> to vector<8x8xf32>
    %cst_17 = arith.constant 0.353553385 : f32
    %42 = vector.broadcast %cst_17 : f32 to vector<8x8xf32>
    %43 = arith.mulf %41, %42 : vector<8x8xf32>
    %44 = vector.extract_strided_slice %29 {offsets = [0, 16], sizes = [8, 8], strides = [1, 1]} : vector<8x32xf32> to vector<8x8xf32>
    "tpu.trace_start"() <{level = 10 : i32, message = "qd,kd->qk"}> : () -> ()
    %cst_18 = arith.constant dense<0.000000e+00> : vector<8x8xf32>
    %45 = tpu.matmul %43, %44, %cst_18 {dimension_numbers = #tpu.dot_dimension_numbers<[1], [1], [0], [0], [0, 0, 1, 0], [], []>} : vector<8x8xf32>, vector<8x8xf32>, vector<8x8xf32> -> vector<8x8xf32>
    "tpu.trace_stop"() : () -> ()
    %46 = vector.extract_strided_slice %28 {offsets = [0, 24], sizes = [8, 8], strides = [1, 1]} : vector<8x32xf32> to vector<8x8xf32>
    %cst_19 = arith.constant 0.353553385 : f32
    %47 = vector.broadcast %cst_19 : f32 to vector<8x8xf32>
    %48 = arith.mulf %46, %47 : vector<8x8xf32>
    %49 = vector.extract_strided_slice %29 {offsets = [0, 24], sizes = [8, 8], strides = [1, 1]} : vector<8x32xf32> to vector<8x8xf32>
    "tpu.trace_start"() <{level = 10 : i32, message = "qd,kd->qk"}> : () -> ()
    %cst_20 = arith.constant dense<0.000000e+00> : vector<8x8xf32>
    %50 = tpu.matmul %48, %49, %cst_20 {dimension_numbers = #tpu.dot_dimension_numbers<[1], [1], [0], [0], [0, 0, 1, 0], [], []>} : vector<8x8xf32>, vector<8x8xf32>, vector<8x8xf32> -> vector<8x8xf32>
    "tpu.trace_stop"() : () -> ()
    %51 = tpu.concatenate %35, %40, %45, %50 in 0 : vector<8x8xf32>, vector<8x8xf32>, vector<8x8xf32>, vector<8x8xf32> -> vector<32x8xf32>
    %52 = arith.addf %51, %6 : vector<32x8xf32>
    %cst_21 = arith.constant dense<0xFF800000> : vector<32xf32>
    %53 = vector.multi_reduction <maximumf>, %52, %cst_21 [1] : vector<32x8xf32> to vector<32xf32>
    %54 = vector.shape_cast %53 : vector<32xf32> to vector<32x1xf32>
    %55 = vector.broadcast %54 : vector<32x1xf32> to vector<32x8xf32>
    %56 = arith.subf %52, %55 : vector<32x8xf32>
    %57 = math.exp %56 : vector<32x8xf32>
    %cst_22 = arith.constant dense<0.000000e+00> : vector<32xf32>
    %58 = vector.multi_reduction <add>, %57, %cst_22 [1] : vector<32x8xf32> to vector<32xf32>
    %59 = vector.shape_cast %58 : vector<32xf32> to vector<32x1xf32>
    %60 = tpu.reciprocal %59 {approx = true} : vector<32x1xf32> -> vector<32x1xf32>
    %61 = vector.broadcast %60 : vector<32x1xf32> to vector<32x8xf32>
    %62 = arith.mulf %57, %61 : vector<32x8xf32>
    %63 = vector.extract_strided_slice %62 {offsets = [0, 0], sizes = [8, 8], strides = [1, 1]} : vector<32x8xf32> to vector<8x8xf32>
    %64 = vector.extract_strided_slice %30 {offsets = [0, 0], sizes = [8, 8], strides = [1, 1]} : vector<8x32xf32> to vector<8x8xf32>
    %cst_23 = arith.constant dense<0.000000e+00> : vector<8x8xf32>
    %65 = tpu.matmul %63, %64, %cst_23 {dimension_numbers = #tpu.dot_dimension_numbers<[1], [0], [0], [1], [0, 0, 1, 1], [], []>} : vector<8x8xf32>, vector<8x8xf32>, vector<8x8xf32> -> vector<8x8xf32>
    %c0_24 = arith.constant 0 : index
    %c0_25 = arith.constant 0 : index
    %66 = vector.load %arg7[%c0_24, %c0_25] : memref<32x32xf32, #tpu.memory_space<vmem>>, vector<8x32xf32>
    %cst_26 = arith.constant dense<0.000000e+00> : vector<8x32xf32>
    %67 = tpu.matmul %65, %66, %cst_26 {dimension_numbers = #tpu.dot_dimension_numbers<[1], [0], [0], [1], [0, 0, 1, 1], [], []>} : vector<8x8xf32>, vector<8x32xf32>, vector<8x32xf32> -> vector<8x32xf32>
    %68 = vector.extract_strided_slice %62 {offsets = [8, 0], sizes = [8, 8], strides = [1, 1]} : vector<32x8xf32> to vector<8x8xf32>
    %69 = vector.extract_strided_slice %30 {offsets = [0, 8], sizes = [8, 8], strides = [1, 1]} : vector<8x32xf32> to vector<8x8xf32>
    %cst_27 = arith.constant dense<0.000000e+00> : vector<8x8xf32>
    %70 = tpu.matmul %68, %69, %cst_27 {dimension_numbers = #tpu.dot_dimension_numbers<[1], [0], [0], [1], [0, 0, 1, 1], [], []>} : vector<8x8xf32>, vector<8x8xf32>, vector<8x8xf32> -> vector<8x8xf32>
    %c8 = arith.constant 8 : index
    %c0_28 = arith.constant 0 : index
    %71 = vector.load %arg7[%c8, %c0_28] : memref<32x32xf32, #tpu.memory_space<vmem>>, vector<8x32xf32>
    %cst_29 = arith.constant dense<0.000000e+00> : vector<8x32xf32>
    %72 = tpu.matmul %70, %71, %cst_29 {dimension_numbers = #tpu.dot_dimension_numbers<[1], [0], [0], [1], [0, 0, 1, 1], [], []>} : vector<8x8xf32>, vector<8x32xf32>, vector<8x32xf32> -> vector<8x32xf32>
    %73 = arith.addf %67, %72 : vector<8x32xf32>
    %74 = vector.extract_strided_slice %62 {offsets = [16, 0], sizes = [8, 8], strides = [1, 1]} : vector<32x8xf32> to vector<8x8xf32>
    %75 = vector.extract_strided_slice %30 {offsets = [0, 16], sizes = [8, 8], strides = [1, 1]} : vector<8x32xf32> to vector<8x8xf32>
    %cst_30 = arith.constant dense<0.000000e+00> : vector<8x8xf32>
    %76 = tpu.matmul %74, %75, %cst_30 {dimension_numbers = #tpu.dot_dimension_numbers<[1], [0], [0], [1], [0, 0, 1, 1], [], []>} : vector<8x8xf32>, vector<8x8xf32>, vector<8x8xf32> -> vector<8x8xf32>
    %c16 = arith.constant 16 : index
    %c0_31 = arith.constant 0 : index
    %77 = vector.load %arg7[%c16, %c0_31] : memref<32x32xf32, #tpu.memory_space<vmem>>, vector<8x32xf32>
    %cst_32 = arith.constant dense<0.000000e+00> : vector<8x32xf32>
    %78 = tpu.matmul %76, %77, %cst_32 {dimension_numbers = #tpu.dot_dimension_numbers<[1], [0], [0], [1], [0, 0, 1, 1], [], []>} : vector<8x8xf32>, vector<8x32xf32>, vector<8x32xf32> -> vector<8x32xf32>
    %79 = arith.addf %73, %78 : vector<8x32xf32>
    %80 = vector.extract_strided_slice %62 {offsets = [24, 0], sizes = [8, 8], strides = [1, 1]} : vector<32x8xf32> to vector<8x8xf32>
    %81 = vector.extract_strided_slice %30 {offsets = [0, 24], sizes = [8, 8], strides = [1, 1]} : vector<8x32xf32> to vector<8x8xf32>
    %cst_33 = arith.constant dense<0.000000e+00> : vector<8x8xf32>
    %82 = tpu.matmul %80, %81, %cst_33 {dimension_numbers = #tpu.dot_dimension_numbers<[1], [0], [0], [1], [0, 0, 1, 1], [], []>} : vector<8x8xf32>, vector<8x8xf32>, vector<8x8xf32> -> vector<8x8xf32>
    %c24 = arith.constant 24 : index
    %c0_34 = arith.constant 0 : index
    %83 = vector.load %arg7[%c24, %c0_34] : memref<32x32xf32, #tpu.memory_space<vmem>>, vector<8x32xf32>
    %cst_35 = arith.constant dense<0.000000e+00> : vector<8x32xf32>
    %84 = tpu.matmul %82, %83, %cst_35 {dimension_numbers = #tpu.dot_dimension_numbers<[1], [0], [0], [1], [0, 0, 1, 1], [], []>} : vector<8x8xf32>, vector<8x32xf32>, vector<8x32xf32> -> vector<8x32xf32>
    %85 = arith.addf %79, %84 : vector<8x32xf32>
    %86 = vector.extract_strided_slice %19 {offsets = [8, 0], sizes = [8, 32], strides = [1, 1]} : vector<16x32xf32> to vector<8x32xf32>
    %87 = vector.extract_strided_slice %23 {offsets = [8, 0], sizes = [8, 32], strides = [1, 1]} : vector<16x32xf32> to vector<8x32xf32>
    %88 = vector.extract_strided_slice %27 {offsets = [8, 0], sizes = [8, 32], strides = [1, 1]} : vector<16x32xf32> to vector<8x32xf32>
    %89 = vector.extract_strided_slice %86 {offsets = [0, 0], sizes = [8, 8], strides = [1, 1]} : vector<8x32xf32> to vector<8x8xf32>
    %cst_36 = arith.constant 0.353553385 : f32
    %90 = vector.broadcast %cst_36 : f32 to vector<8x8xf32>
    %91 = arith.mulf %89, %90 : vector<8x8xf32>
    %92 = vector.extract_strided_slice %87 {offsets = [0, 0], sizes = [8, 8], strides = [1, 1]} : vector<8x32xf32> to vector<8x8xf32>
    "tpu.trace_start"() <{level = 10 : i32, message = "qd,kd->qk"}> : () -> ()
    %cst_37 = arith.constant dense<0.000000e+00> : vector<8x8xf32>
    %93 = tpu.matmul %91, %92, %cst_37 {dimension_numbers = #tpu.dot_dimension_numbers<[1], [1], [0], [0], [0, 0, 1, 0], [], []>} : vector<8x8xf32>, vector<8x8xf32>, vector<8x8xf32> -> vector<8x8xf32>
    "tpu.trace_stop"() : () -> ()
    %94 = vector.extract_strided_slice %86 {offsets = [0, 8], sizes = [8, 8], strides = [1, 1]} : vector<8x32xf32> to vector<8x8xf32>
    %cst_38 = arith.constant 0.353553385 : f32
    %95 = vector.broadcast %cst_38 : f32 to vector<8x8xf32>
    %96 = arith.mulf %94, %95 : vector<8x8xf32>
    %97 = vector.extract_strided_slice %87 {offsets = [0, 8], sizes = [8, 8], strides = [1, 1]} : vector<8x32xf32> to vector<8x8xf32>
    "tpu.trace_start"() <{level = 10 : i32, message = "qd,kd->qk"}> : () -> ()
    %cst_39 = arith.constant dense<0.000000e+00> : vector<8x8xf32>
    %98 = tpu.matmul %96, %97, %cst_39 {dimension_numbers = #tpu.dot_dimension_numbers<[1], [1], [0], [0], [0, 0, 1, 0], [], []>} : vector<8x8xf32>, vector<8x8xf32>, vector<8x8xf32> -> vector<8x8xf32>
    "tpu.trace_stop"() : () -> ()
    %99 = vector.extract_strided_slice %86 {offsets = [0, 16], sizes = [8, 8], strides = [1, 1]} : vector<8x32xf32> to vector<8x8xf32>
    %cst_40 = arith.constant 0.353553385 : f32
    %100 = vector.broadcast %cst_40 : f32 to vector<8x8xf32>
    %101 = arith.mulf %99, %100 : vector<8x8xf32>
    %102 = vector.extract_strided_slice %87 {offsets = [0, 16], sizes = [8, 8], strides = [1, 1]} : vector<8x32xf32> to vector<8x8xf32>
    "tpu.trace_start"() <{level = 10 : i32, message = "qd,kd->qk"}> : () -> ()
    %cst_41 = arith.constant dense<0.000000e+00> : vector<8x8xf32>
    %103 = tpu.matmul %101, %102, %cst_41 {dimension_numbers = #tpu.dot_dimension_numbers<[1], [1], [0], [0], [0, 0, 1, 0], [], []>} : vector<8x8xf32>, vector<8x8xf32>, vector<8x8xf32> -> vector<8x8xf32>
    "tpu.trace_stop"() : () -> ()
    %104 = vector.extract_strided_slice %86 {offsets = [0, 24], sizes = [8, 8], strides = [1, 1]} : vector<8x32xf32> to vector<8x8xf32>
    %cst_42 = arith.constant 0.353553385 : f32
    %105 = vector.broadcast %cst_42 : f32 to vector<8x8xf32>
    %106 = arith.mulf %104, %105 : vector<8x8xf32>
    %107 = vector.extract_strided_slice %87 {offsets = [0, 24], sizes = [8, 8], strides = [1, 1]} : vector<8x32xf32> to vector<8x8xf32>
    "tpu.trace_start"() <{level = 10 : i32, message = "qd,kd->qk"}> : () -> ()
    %cst_43 = arith.constant dense<0.000000e+00> : vector<8x8xf32>
    %108 = tpu.matmul %106, %107, %cst_43 {dimension_numbers = #tpu.dot_dimension_numbers<[1], [1], [0], [0], [0, 0, 1, 0], [], []>} : vector<8x8xf32>, vector<8x8xf32>, vector<8x8xf32> -> vector<8x8xf32>
    "tpu.trace_stop"() : () -> ()
    %109 = tpu.concatenate %93, %98, %103, %108 in 0 : vector<8x8xf32>, vector<8x8xf32>, vector<8x8xf32>, vector<8x8xf32> -> vector<32x8xf32>
    %110 = arith.addf %109, %6 : vector<32x8xf32>
    %cst_44 = arith.constant dense<0xFF800000> : vector<32xf32>
    %111 = vector.multi_reduction <maximumf>, %110, %cst_44 [1] : vector<32x8xf32> to vector<32xf32>
    %112 = vector.shape_cast %111 : vector<32xf32> to vector<32x1xf32>
    %113 = vector.broadcast %112 : vector<32x1xf32> to vector<32x8xf32>
    %114 = arith.subf %110, %113 : vector<32x8xf32>
    %115 = math.exp %114 : vector<32x8xf32>
    %cst_45 = arith.constant dense<0.000000e+00> : vector<32xf32>
    %116 = vector.multi_reduction <add>, %115, %cst_45 [1] : vector<32x8xf32> to vector<32xf32>
    %117 = vector.shape_cast %116 : vector<32xf32> to vector<32x1xf32>
    %118 = tpu.reciprocal %117 {approx = true} : vector<32x1xf32> -> vector<32x1xf32>
    %119 = vector.broadcast %118 : vector<32x1xf32> to vector<32x8xf32>
    %120 = arith.mulf %115, %119 : vector<32x8xf32>
    %121 = vector.extract_strided_slice %120 {offsets = [0, 0], sizes = [8, 8], strides = [1, 1]} : vector<32x8xf32> to vector<8x8xf32>
    %122 = vector.extract_strided_slice %88 {offsets = [0, 0], sizes = [8, 8], strides = [1, 1]} : vector<8x32xf32> to vector<8x8xf32>
    %cst_46 = arith.constant dense<0.000000e+00> : vector<8x8xf32>
    %123 = tpu.matmul %121, %122, %cst_46 {dimension_numbers = #tpu.dot_dimension_numbers<[1], [0], [0], [1], [0, 0, 1, 1], [], []>} : vector<8x8xf32>, vector<8x8xf32>, vector<8x8xf32> -> vector<8x8xf32>
    %c0_47 = arith.constant 0 : index
    %c0_48 = arith.constant 0 : index
    %124 = vector.load %arg7[%c0_47, %c0_48] : memref<32x32xf32, #tpu.memory_space<vmem>>, vector<8x32xf32>
    %cst_49 = arith.constant dense<0.000000e+00> : vector<8x32xf32>
    %125 = tpu.matmul %123, %124, %cst_49 {dimension_numbers = #tpu.dot_dimension_numbers<[1], [0], [0], [1], [0, 0, 1, 1], [], []>} : vector<8x8xf32>, vector<8x32xf32>, vector<8x32xf32> -> vector<8x32xf32>
    %126 = vector.extract_strided_slice %120 {offsets = [8, 0], sizes = [8, 8], strides = [1, 1]} : vector<32x8xf32> to vector<8x8xf32>
    %127 = vector.extract_strided_slice %88 {offsets = [0, 8], sizes = [8, 8], strides = [1, 1]} : vector<8x32xf32> to vector<8x8xf32>
    %cst_50 = arith.constant dense<0.000000e+00> : vector<8x8xf32>
    %128 = tpu.matmul %126, %127, %cst_50 {dimension_numbers = #tpu.dot_dimension_numbers<[1], [0], [0], [1], [0, 0, 1, 1], [], []>} : vector<8x8xf32>, vector<8x8xf32>, vector<8x8xf32> -> vector<8x8xf32>
    %c8_51 = arith.constant 8 : index
    %c0_52 = arith.constant 0 : index
    %129 = vector.load %arg7[%c8_51, %c0_52] : memref<32x32xf32, #tpu.memory_space<vmem>>, vector<8x32xf32>
    %cst_53 = arith.constant dense<0.000000e+00> : vector<8x32xf32>
    %130 = tpu.matmul %128, %129, %cst_53 {dimension_numbers = #tpu.dot_dimension_numbers<[1], [0], [0], [1], [0, 0, 1, 1], [], []>} : vector<8x8xf32>, vector<8x32xf32>, vector<8x32xf32> -> vector<8x32xf32>
    %131 = arith.addf %125, %130 : vector<8x32xf32>
    %132 = vector.extract_strided_slice %120 {offsets = [16, 0], sizes = [8, 8], strides = [1, 1]} : vector<32x8xf32> to vector<8x8xf32>
    %133 = vector.extract_strided_slice %88 {offsets = [0, 16], sizes = [8, 8], strides = [1, 1]} : vector<8x32xf32> to vector<8x8xf32>
    %cst_54 = arith.constant dense<0.000000e+00> : vector<8x8xf32>
    %134 = tpu.matmul %132, %133, %cst_54 {dimension_numbers = #tpu.dot_dimension_numbers<[1], [0], [0], [1], [0, 0, 1, 1], [], []>} : vector<8x8xf32>, vector<8x8xf32>, vector<8x8xf32> -> vector<8x8xf32>
    %c16_55 = arith.constant 16 : index
    %c0_56 = arith.constant 0 : index
    %135 = vector.load %arg7[%c16_55, %c0_56] : memref<32x32xf32, #tpu.memory_space<vmem>>, vector<8x32xf32>
    %cst_57 = arith.constant dense<0.000000e+00> : vector<8x32xf32>
    %136 = tpu.matmul %134, %135, %cst_57 {dimension_numbers = #tpu.dot_dimension_numbers<[1], [0], [0], [1], [0, 0, 1, 1], [], []>} : vector<8x8xf32>, vector<8x32xf32>, vector<8x32xf32> -> vector<8x32xf32>
    %137 = arith.addf %131, %136 : vector<8x32xf32>
    %138 = vector.extract_strided_slice %120 {offsets = [24, 0], sizes = [8, 8], strides = [1, 1]} : vector<32x8xf32> to vector<8x8xf32>
    %139 = vector.extract_strided_slice %88 {offsets = [0, 24], sizes = [8, 8], strides = [1, 1]} : vector<8x32xf32> to vector<8x8xf32>
    %cst_58 = arith.constant dense<0.000000e+00> : vector<8x8xf32>
    %140 = tpu.matmul %138, %139, %cst_58 {dimension_numbers = #tpu.dot_dimension_numbers<[1], [0], [0], [1], [0, 0, 1, 1], [], []>} : vector<8x8xf32>, vector<8x8xf32>, vector<8x8xf32> -> vector<8x8xf32>
    %c24_59 = arith.constant 24 : index
    %c0_60 = arith.constant 0 : index
    %141 = vector.load %arg7[%c24_59, %c0_60] : memref<32x32xf32, #tpu.memory_space<vmem>>, vector<8x32xf32>
    %cst_61 = arith.constant dense<0.000000e+00> : vector<8x32xf32>
    %142 = tpu.matmul %140, %141, %cst_61 {dimension_numbers = #tpu.dot_dimension_numbers<[1], [0], [0], [1], [0, 0, 1, 1], [], []>} : vector<8x8xf32>, vector<8x32xf32>, vector<8x32xf32> -> vector<8x32xf32>
    %143 = arith.addf %137, %142 : vector<8x32xf32>
    %144 = tpu.concatenate %85, %143 in 0 : vector<8x32xf32>, vector<8x32xf32> -> vector<16x32xf32>
    %c3 = arith.constant 3 : index
    %c0_62 = arith.constant 0 : index
    %145 = vector.load %arg2[%c3, %c0_62] : memref<24x32xf32, #tpu.memory_space<vmem>>, vector<1x32xf32>
    %146 = vector.broadcast %145 : vector<1x32xf32> to vector<16x32xf32>
    %147 = arith.addf %144, %146 : vector<16x32xf32>
    %148 = arith.addf %13, %147 : vector<16x32xf32>
    %cst_63 = arith.constant dense<0.000000e+00> : vector<16xf32>
    %149 = vector.multi_reduction <add>, %148, %cst_63 [1] : vector<16x32xf32> to vector<16xf32>
    %150 = vector.shape_cast %149 : vector<16xf32> to vector<16x1xf32>
    %cst_64 = arith.constant 3.200000e+01 : f32
    %151 = vector.broadcast %cst_64 : f32 to vector<16x1xf32>
    %152 = arith.divf %150, %151 : vector<16x1xf32>
    %153 = vector.broadcast %152 : vector<16x1xf32> to vector<16x32xf32>
    %154 = arith.subf %148, %153 : vector<16x32xf32>
    %155 = arith.mulf %154, %154 : vector<16x32xf32>
    %cst_65 = arith.constant dense<0.000000e+00> : vector<16xf32>
    %156 = vector.multi_reduction <add>, %155, %cst_65 [1] : vector<16x32xf32> to vector<16xf32>
    %157 = vector.shape_cast %156 : vector<16xf32> to vector<16x1xf32>
    %cst_66 = arith.constant 3.200000e+01 : f32
    %158 = vector.broadcast %cst_66 : f32 to vector<16x1xf32>
    %159 = arith.divf %157, %158 : vector<16x1xf32>
    %cst_67 = arith.constant 9.99999974E-6 : f32
    %160 = vector.broadcast %cst_67 : f32 to vector<16x1xf32>
    %161 = arith.addf %159, %160 : vector<16x1xf32>
    %162 = math.rsqrt %161 : vector<16x1xf32>
    %163 = vector.broadcast %162 : vector<16x1xf32> to vector<16x32xf32>
    %164 = arith.mulf %154, %163 : vector<16x32xf32>
    %c4 = arith.constant 4 : index
    %c0_68 = arith.constant 0 : index
    %165 = vector.load %arg2[%c4, %c0_68] : memref<24x32xf32, #tpu.memory_space<vmem>>, vector<1x32xf32>
    %166 = vector.broadcast %165 : vector<1x32xf32> to vector<16x32xf32>
    %167 = arith.mulf %164, %166 : vector<16x32xf32>
    %c5 = arith.constant 5 : index
    %c0_69 = arith.constant 0 : index
    %168 = vector.load %arg2[%c5, %c0_69] : memref<24x32xf32, #tpu.memory_space<vmem>>, vector<1x32xf32>
    %169 = vector.broadcast %168 : vector<1x32xf32> to vector<16x32xf32>
    %170 = arith.addf %167, %169 : vector<16x32xf32>
    %c0_70 = arith.constant 0 : index
    %c0_71 = arith.constant 0 : index
    %171 = vector.load %arg8[%c0_70, %c0_71] : memref<32x64xf32, #tpu.memory_space<vmem>>, vector<32x64xf32>
    %cst_72 = arith.constant dense<0.000000e+00> : vector<16x64xf32>
    %172 = tpu.matmul %170, %171, %cst_72 {dimension_numbers = #tpu.dot_dimension_numbers<[1], [0], [0], [1], [0, 0, 1, 1], [], []>} : vector<16x32xf32>, vector<32x64xf32>, vector<16x64xf32> -> vector<16x64xf32>
    %c0_73 = arith.constant 0 : index
    %c0_74 = arith.constant 0 : index
    %173 = vector.load %arg3[%c0_73, %c0_74] : memref<2x64xf32, #tpu.memory_space<vmem>>, vector<1x64xf32>
    %174 = vector.broadcast %173 : vector<1x64xf32> to vector<16x64xf32>
    %175 = arith.addf %172, %174 : vector<16x64xf32>
    %cst_75 = arith.constant 0.000000e+00 : f32
    %176 = vector.broadcast %cst_75 : f32 to vector<16x64xf32>
    %177 = arith.maximumf %175, %176 : vector<16x64xf32>
    %c0_76 = arith.constant 0 : index
    %c0_77 = arith.constant 0 : index
    %178 = vector.load %arg9[%c0_76, %c0_77] : memref<64x32xf32, #tpu.memory_space<vmem>>, vector<64x32xf32>
    %cst_78 = arith.constant dense<0.000000e+00> : vector<16x32xf32>
    %179 = tpu.matmul %177, %178, %cst_78 {dimension_numbers = #tpu.dot_dimension_numbers<[1], [0], [0], [1], [0, 0, 1, 1], [], []>} : vector<16x64xf32>, vector<64x32xf32>, vector<16x32xf32> -> vector<16x32xf32>
    %c6 = arith.constant 6 : index
    %c0_79 = arith.constant 0 : index
    %180 = vector.load %arg2[%c6, %c0_79] : memref<24x32xf32, #tpu.memory_space<vmem>>, vector<1x32xf32>
    %181 = vector.broadcast %180 : vector<1x32xf32> to vector<16x32xf32>
    %182 = arith.addf %179, %181 : vector<16x32xf32>
    %183 = arith.addf %170, %182 : vector<16x32xf32>
    %cst_80 = arith.constant dense<0.000000e+00> : vector<16xf32>
    %184 = vector.multi_reduction <add>, %183, %cst_80 [1] : vector<16x32xf32> to vector<16xf32>
    %185 = vector.shape_cast %184 : vector<16xf32> to vector<16x1xf32>
    %cst_81 = arith.constant 3.200000e+01 : f32
    %186 = vector.broadcast %cst_81 : f32 to vector<16x1xf32>
    %187 = arith.divf %185, %186 : vector<16x1xf32>
    %188 = vector.broadcast %187 : vector<16x1xf32> to vector<16x32xf32>
    %189 = arith.subf %183, %188 : vector<16x32xf32>
    %190 = arith.mulf %189, %189 : vector<16x32xf32>
    %cst_82 = arith.constant dense<0.000000e+00> : vector<16xf32>
    %191 = vector.multi_reduction <add>, %190, %cst_82 [1] : vector<16x32xf32> to vector<16xf32>
    %192 = vector.shape_cast %191 : vector<16xf32> to vector<16x1xf32>
    %cst_83 = arith.constant 3.200000e+01 : f32
    %193 = vector.broadcast %cst_83 : f32 to vector<16x1xf32>
    %194 = arith.divf %192, %193 : vector<16x1xf32>
    %cst_84 = arith.constant 9.99999974E-6 : f32
    %195 = vector.broadcast %cst_84 : f32 to vector<16x1xf32>
    %196 = arith.addf %194, %195 : vector<16x1xf32>
    %197 = math.rsqrt %196 : vector<16x1xf32>
    %198 = vector.broadcast %197 : vector<16x1xf32> to vector<16x32xf32>
    %199 = arith.mulf %189, %198 : vector<16x32xf32>
    %c7 = arith.constant 7 : index
    %c0_85 = arith.constant 0 : index
    %200 = vector.load %arg2[%c7, %c0_85] : memref<24x32xf32, #tpu.memory_space<vmem>>, vector<1x32xf32>
    %201 = vector.broadcast %200 : vector<1x32xf32> to vector<16x32xf32>
    %202 = arith.mulf %199, %201 : vector<16x32xf32>
    %c8_86 = arith.constant 8 : index
    %c0_87 = arith.constant 0 : index
    %203 = vector.load %arg2[%c8_86, %c0_87] : memref<24x32xf32, #tpu.memory_space<vmem>>, vector<1x32xf32>
    %204 = vector.broadcast %203 : vector<1x32xf32> to vector<16x32xf32>
    %205 = arith.addf %202, %204 : vector<16x32xf32>
    %c0_88 = arith.constant 0 : index
    %c0_89 = arith.constant 0 : index
    %206 = vector.load %arg10[%c0_88, %c0_89] : memref<32x96xf32, #tpu.memory_space<vmem>>, vector<32x96xf32>
    %cst_90 = arith.constant dense<0.000000e+00> : vector<16x96xf32>
    %207 = tpu.matmul %205, %206, %cst_90 {dimension_numbers = #tpu.dot_dimension_numbers<[1], [0], [0], [1], [0, 0, 1, 1], [], []>} : vector<16x32xf32>, vector<32x96xf32>, vector<16x96xf32> -> vector<16x96xf32>
    %208 = vector.extract_strided_slice %207 {offsets = [0, 0], sizes = [16, 32], strides = [1, 1]} : vector<16x96xf32> to vector<16x32xf32>
    %c9 = arith.constant 9 : index
    %c0_91 = arith.constant 0 : index
    %209 = vector.load %arg2[%c9, %c0_91] : memref<24x32xf32, #tpu.memory_space<vmem>>, vector<1x32xf32>
    %210 = vector.broadcast %209 : vector<1x32xf32> to vector<16x32xf32>
    %211 = arith.addf %208, %210 : vector<16x32xf32>
    %212 = vector.extract_strided_slice %207 {offsets = [0, 32], sizes = [16, 32], strides = [1, 1]} : vector<16x96xf32> to vector<16x32xf32>
    %c10 = arith.constant 10 : index
    %c0_92 = arith.constant 0 : index
    %213 = vector.load %arg2[%c10, %c0_92] : memref<24x32xf32, #tpu.memory_space<vmem>>, vector<1x32xf32>
    %214 = vector.broadcast %213 : vector<1x32xf32> to vector<16x32xf32>
    %215 = arith.addf %212, %214 : vector<16x32xf32>
    %216 = vector.extract_strided_slice %207 {offsets = [0, 64], sizes = [16, 32], strides = [1, 1]} : vector<16x96xf32> to vector<16x32xf32>
    %c11 = arith.constant 11 : index
    %c0_93 = arith.constant 0 : index
    %217 = vector.load %arg2[%c11, %c0_93] : memref<24x32xf32, #tpu.memory_space<vmem>>, vector<1x32xf32>
    %218 = vector.broadcast %217 : vector<1x32xf32> to vector<16x32xf32>
    %219 = arith.addf %216, %218 : vector<16x32xf32>
    %220 = vector.extract_strided_slice %211 {offsets = [0, 0], sizes = [8, 32], strides = [1, 1]} : vector<16x32xf32> to vector<8x32xf32>
    %221 = vector.extract_strided_slice %215 {offsets = [0, 0], sizes = [8, 32], strides = [1, 1]} : vector<16x32xf32> to vector<8x32xf32>
    %222 = vector.extract_strided_slice %219 {offsets = [0, 0], sizes = [8, 32], strides = [1, 1]} : vector<16x32xf32> to vector<8x32xf32>
    %223 = vector.extract_strided_slice %220 {offsets = [0, 0], sizes = [8, 8], strides = [1, 1]} : vector<8x32xf32> to vector<8x8xf32>
    %cst_94 = arith.constant 0.353553385 : f32
    %224 = vector.broadcast %cst_94 : f32 to vector<8x8xf32>
    %225 = arith.mulf %223, %224 : vector<8x8xf32>
    %226 = vector.extract_strided_slice %221 {offsets = [0, 0], sizes = [8, 8], strides = [1, 1]} : vector<8x32xf32> to vector<8x8xf32>
    "tpu.trace_start"() <{level = 10 : i32, message = "qd,kd->qk"}> : () -> ()
    %cst_95 = arith.constant dense<0.000000e+00> : vector<8x8xf32>
    %227 = tpu.matmul %225, %226, %cst_95 {dimension_numbers = #tpu.dot_dimension_numbers<[1], [1], [0], [0], [0, 0, 1, 0], [], []>} : vector<8x8xf32>, vector<8x8xf32>, vector<8x8xf32> -> vector<8x8xf32>
    "tpu.trace_stop"() : () -> ()
    %228 = vector.extract_strided_slice %220 {offsets = [0, 8], sizes = [8, 8], strides = [1, 1]} : vector<8x32xf32> to vector<8x8xf32>
    %cst_96 = arith.constant 0.353553385 : f32
    %229 = vector.broadcast %cst_96 : f32 to vector<8x8xf32>
    %230 = arith.mulf %228, %229 : vector<8x8xf32>
    %231 = vector.extract_strided_slice %221 {offsets = [0, 8], sizes = [8, 8], strides = [1, 1]} : vector<8x32xf32> to vector<8x8xf32>
    "tpu.trace_start"() <{level = 10 : i32, message = "qd,kd->qk"}> : () -> ()
    %cst_97 = arith.constant dense<0.000000e+00> : vector<8x8xf32>
    %232 = tpu.matmul %230, %231, %cst_97 {dimension_numbers = #tpu.dot_dimension_numbers<[1], [1], [0], [0], [0, 0, 1, 0], [], []>} : vector<8x8xf32>, vector<8x8xf32>, vector<8x8xf32> -> vector<8x8xf32>
    "tpu.trace_stop"() : () -> ()
    %233 = vector.extract_strided_slice %220 {offsets = [0, 16], sizes = [8, 8], strides = [1, 1]} : vector<8x32xf32> to vector<8x8xf32>
    %cst_98 = arith.constant 0.353553385 : f32
    %234 = vector.broadcast %cst_98 : f32 to vector<8x8xf32>
    %235 = arith.mulf %233, %234 : vector<8x8xf32>
    %236 = vector.extract_strided_slice %221 {offsets = [0, 16], sizes = [8, 8], strides = [1, 1]} : vector<8x32xf32> to vector<8x8xf32>
    "tpu.trace_start"() <{level = 10 : i32, message = "qd,kd->qk"}> : () -> ()
    %cst_99 = arith.constant dense<0.000000e+00> : vector<8x8xf32>
    %237 = tpu.matmul %235, %236, %cst_99 {dimension_numbers = #tpu.dot_dimension_numbers<[1], [1], [0], [0], [0, 0, 1, 0], [], []>} : vector<8x8xf32>, vector<8x8xf32>, vector<8x8xf32> -> vector<8x8xf32>
    "tpu.trace_stop"() : () -> ()
    %238 = vector.extract_strided_slice %220 {offsets = [0, 24], sizes = [8, 8], strides = [1, 1]} : vector<8x32xf32> to vector<8x8xf32>
    %cst_100 = arith.constant 0.353553385 : f32
    %239 = vector.broadcast %cst_100 : f32 to vector<8x8xf32>
    %240 = arith.mulf %238, %239 : vector<8x8xf32>
    %241 = vector.extract_strided_slice %221 {offsets = [0, 24], sizes = [8, 8], strides = [1, 1]} : vector<8x32xf32> to vector<8x8xf32>
    "tpu.trace_start"() <{level = 10 : i32, message = "qd,kd->qk"}> : () -> ()
    %cst_101 = arith.constant dense<0.000000e+00> : vector<8x8xf32>
    %242 = tpu.matmul %240, %241, %cst_101 {dimension_numbers = #tpu.dot_dimension_numbers<[1], [1], [0], [0], [0, 0, 1, 0], [], []>} : vector<8x8xf32>, vector<8x8xf32>, vector<8x8xf32> -> vector<8x8xf32>
    "tpu.trace_stop"() : () -> ()
    %243 = tpu.concatenate %227, %232, %237, %242 in 0 : vector<8x8xf32>, vector<8x8xf32>, vector<8x8xf32>, vector<8x8xf32> -> vector<32x8xf32>
    %cst_102 = arith.constant dense<0xFF800000> : vector<32xf32>
    %244 = vector.multi_reduction <maximumf>, %243, %cst_102 [1] : vector<32x8xf32> to vector<32xf32>
    %245 = vector.shape_cast %244 : vector<32xf32> to vector<32x1xf32>
    %246 = vector.broadcast %245 : vector<32x1xf32> to vector<32x8xf32>
    %247 = arith.subf %243, %246 : vector<32x8xf32>
    %248 = math.exp %247 : vector<32x8xf32>
    %cst_103 = arith.constant dense<0.000000e+00> : vector<32xf32>
    %249 = vector.multi_reduction <add>, %248, %cst_103 [1] : vector<32x8xf32> to vector<32xf32>
    %250 = vector.shape_cast %249 : vector<32xf32> to vector<32x1xf32>
    %251 = tpu.reciprocal %250 {approx = true} : vector<32x1xf32> -> vector<32x1xf32>
    %252 = vector.broadcast %251 : vector<32x1xf32> to vector<32x8xf32>
    %253 = arith.mulf %248, %252 : vector<32x8xf32>
    %254 = vector.extract_strided_slice %253 {offsets = [0, 0], sizes = [8, 8], strides = [1, 1]} : vector<32x8xf32> to vector<8x8xf32>
    %255 = vector.extract_strided_slice %222 {offsets = [0, 0], sizes = [8, 8], strides = [1, 1]} : vector<8x32xf32> to vector<8x8xf32>
    %cst_104 = arith.constant dense<0.000000e+00> : vector<8x8xf32>
    %256 = tpu.matmul %254, %255, %cst_104 {dimension_numbers = #tpu.dot_dimension_numbers<[1], [0], [0], [1], [0, 0, 1, 1], [], []>} : vector<8x8xf32>, vector<8x8xf32>, vector<8x8xf32> -> vector<8x8xf32>
    %c0_105 = arith.constant 0 : index
    %c0_106 = arith.constant 0 : index
    %257 = vector.load %arg11[%c0_105, %c0_106] : memref<32x32xf32, #tpu.memory_space<vmem>>, vector<8x32xf32>
    %cst_107 = arith.constant dense<0.000000e+00> : vector<8x32xf32>
    %258 = tpu.matmul %256, %257, %cst_107 {dimension_numbers = #tpu.dot_dimension_numbers<[1], [0], [0], [1], [0, 0, 1, 1], [], []>} : vector<8x8xf32>, vector<8x32xf32>, vector<8x32xf32> -> vector<8x32xf32>
    %259 = vector.extract_strided_slice %253 {offsets = [8, 0], sizes = [8, 8], strides = [1, 1]} : vector<32x8xf32> to vector<8x8xf32>
    %260 = vector.extract_strided_slice %222 {offsets = [0, 8], sizes = [8, 8], strides = [1, 1]} : vector<8x32xf32> to vector<8x8xf32>
    %cst_108 = arith.constant dense<0.000000e+00> : vector<8x8xf32>
    %261 = tpu.matmul %259, %260, %cst_108 {dimension_numbers = #tpu.dot_dimension_numbers<[1], [0], [0], [1], [0, 0, 1, 1], [], []>} : vector<8x8xf32>, vector<8x8xf32>, vector<8x8xf32> -> vector<8x8xf32>
    %c8_109 = arith.constant 8 : index
    %c0_110 = arith.constant 0 : index
    %262 = vector.load %arg11[%c8_109, %c0_110] : memref<32x32xf32, #tpu.memory_space<vmem>>, vector<8x32xf32>
    %cst_111 = arith.constant dense<0.000000e+00> : vector<8x32xf32>
    %263 = tpu.matmul %261, %262, %cst_111 {dimension_numbers = #tpu.dot_dimension_numbers<[1], [0], [0], [1], [0, 0, 1, 1], [], []>} : vector<8x8xf32>, vector<8x32xf32>, vector<8x32xf32> -> vector<8x32xf32>
    %264 = arith.addf %258, %263 : vector<8x32xf32>
    %265 = vector.extract_strided_slice %253 {offsets = [16, 0], sizes = [8, 8], strides = [1, 1]} : vector<32x8xf32> to vector<8x8xf32>
    %266 = vector.extract_strided_slice %222 {offsets = [0, 16], sizes = [8, 8], strides = [1, 1]} : vector<8x32xf32> to vector<8x8xf32>
    %cst_112 = arith.constant dense<0.000000e+00> : vector<8x8xf32>
    %267 = tpu.matmul %265, %266, %cst_112 {dimension_numbers = #tpu.dot_dimension_numbers<[1], [0], [0], [1], [0, 0, 1, 1], [], []>} : vector<8x8xf32>, vector<8x8xf32>, vector<8x8xf32> -> vector<8x8xf32>
    %c16_113 = arith.constant 16 : index
    %c0_114 = arith.constant 0 : index
    %268 = vector.load %arg11[%c16_113, %c0_114] : memref<32x32xf32, #tpu.memory_space<vmem>>, vector<8x32xf32>
    %cst_115 = arith.constant dense<0.000000e+00> : vector<8x32xf32>
    %269 = tpu.matmul %267, %268, %cst_115 {dimension_numbers = #tpu.dot_dimension_numbers<[1], [0], [0], [1], [0, 0, 1, 1], [], []>} : vector<8x8xf32>, vector<8x32xf32>, vector<8x32xf32> -> vector<8x32xf32>
    %270 = arith.addf %264, %269 : vector<8x32xf32>
    %271 = vector.extract_strided_slice %253 {offsets = [24, 0], sizes = [8, 8], strides = [1, 1]} : vector<32x8xf32> to vector<8x8xf32>
    %272 = vector.extract_strided_slice %222 {offsets = [0, 24], sizes = [8, 8], strides = [1, 1]} : vector<8x32xf32> to vector<8x8xf32>
    %cst_116 = arith.constant dense<0.000000e+00> : vector<8x8xf32>
    %273 = tpu.matmul %271, %272, %cst_116 {dimension_numbers = #tpu.dot_dimension_numbers<[1], [0], [0], [1], [0, 0, 1, 1], [], []>} : vector<8x8xf32>, vector<8x8xf32>, vector<8x8xf32> -> vector<8x8xf32>
    %c24_117 = arith.constant 24 : index
    %c0_118 = arith.constant 0 : index
    %274 = vector.load %arg11[%c24_117, %c0_118] : memref<32x32xf32, #tpu.memory_space<vmem>>, vector<8x32xf32>
    %cst_119 = arith.constant dense<0.000000e+00> : vector<8x32xf32>
    %275 = tpu.matmul %273, %274, %cst_119 {dimension_numbers = #tpu.dot_dimension_numbers<[1], [0], [0], [1], [0, 0, 1, 1], [], []>} : vector<8x8xf32>, vector<8x32xf32>, vector<8x32xf32> -> vector<8x32xf32>
    %276 = arith.addf %270, %275 : vector<8x32xf32>
    %277 = vector.extract_strided_slice %211 {offsets = [8, 0], sizes = [8, 32], strides = [1, 1]} : vector<16x32xf32> to vector<8x32xf32>
    %278 = vector.extract_strided_slice %215 {offsets = [8, 0], sizes = [8, 32], strides = [1, 1]} : vector<16x32xf32> to vector<8x32xf32>
    %279 = vector.extract_strided_slice %219 {offsets = [8, 0], sizes = [8, 32], strides = [1, 1]} : vector<16x32xf32> to vector<8x32xf32>
    %280 = vector.extract_strided_slice %277 {offsets = [0, 0], sizes = [8, 8], strides = [1, 1]} : vector<8x32xf32> to vector<8x8xf32>
    %cst_120 = arith.constant 0.353553385 : f32
    %281 = vector.broadcast %cst_120 : f32 to vector<8x8xf32>
    %282 = arith.mulf %280, %281 : vector<8x8xf32>
    %283 = vector.extract_strided_slice %278 {offsets = [0, 0], sizes = [8, 8], strides = [1, 1]} : vector<8x32xf32> to vector<8x8xf32>
    "tpu.trace_start"() <{level = 10 : i32, message = "qd,kd->qk"}> : () -> ()
    %cst_121 = arith.constant dense<0.000000e+00> : vector<8x8xf32>
    %284 = tpu.matmul %282, %283, %cst_121 {dimension_numbers = #tpu.dot_dimension_numbers<[1], [1], [0], [0], [0, 0, 1, 0], [], []>} : vector<8x8xf32>, vector<8x8xf32>, vector<8x8xf32> -> vector<8x8xf32>
    "tpu.trace_stop"() : () -> ()
    %285 = vector.extract_strided_slice %277 {offsets = [0, 8], sizes = [8, 8], strides = [1, 1]} : vector<8x32xf32> to vector<8x8xf32>
    %cst_122 = arith.constant 0.353553385 : f32
    %286 = vector.broadcast %cst_122 : f32 to vector<8x8xf32>
    %287 = arith.mulf %285, %286 : vector<8x8xf32>
    %288 = vector.extract_strided_slice %278 {offsets = [0, 8], sizes = [8, 8], strides = [1, 1]} : vector<8x32xf32> to vector<8x8xf32>
    "tpu.trace_start"() <{level = 10 : i32, message = "qd,kd->qk"}> : () -> ()
    %cst_123 = arith.constant dense<0.000000e+00> : vector<8x8xf32>
    %289 = tpu.matmul %287, %288, %cst_123 {dimension_numbers = #tpu.dot_dimension_numbers<[1], [1], [0], [0], [0, 0, 1, 0], [], []>} : vector<8x8xf32>, vector<8x8xf32>, vector<8x8xf32> -> vector<8x8xf32>
    "tpu.trace_stop"() : () -> ()
    %290 = vector.extract_strided_slice %277 {offsets = [0, 16], sizes = [8, 8], strides = [1, 1]} : vector<8x32xf32> to vector<8x8xf32>
    %cst_124 = arith.constant 0.353553385 : f32
    %291 = vector.broadcast %cst_124 : f32 to vector<8x8xf32>
    %292 = arith.mulf %290, %291 : vector<8x8xf32>
    %293 = vector.extract_strided_slice %278 {offsets = [0, 16], sizes = [8, 8], strides = [1, 1]} : vector<8x32xf32> to vector<8x8xf32>
    "tpu.trace_start"() <{level = 10 : i32, message = "qd,kd->qk"}> : () -> ()
    %cst_125 = arith.constant dense<0.000000e+00> : vector<8x8xf32>
    %294 = tpu.matmul %292, %293, %cst_125 {dimension_numbers = #tpu.dot_dimension_numbers<[1], [1], [0], [0], [0, 0, 1, 0], [], []>} : vector<8x8xf32>, vector<8x8xf32>, vector<8x8xf32> -> vector<8x8xf32>
    "tpu.trace_stop"() : () -> ()
    %295 = vector.extract_strided_slice %277 {offsets = [0, 24], sizes = [8, 8], strides = [1, 1]} : vector<8x32xf32> to vector<8x8xf32>
    %cst_126 = arith.constant 0.353553385 : f32
    %296 = vector.broadcast %cst_126 : f32 to vector<8x8xf32>
    %297 = arith.mulf %295, %296 : vector<8x8xf32>
    %298 = vector.extract_strided_slice %278 {offsets = [0, 24], sizes = [8, 8], strides = [1, 1]} : vector<8x32xf32> to vector<8x8xf32>
    "tpu.trace_start"() <{level = 10 : i32, message = "qd,kd->qk"}> : () -> ()
    %cst_127 = arith.constant dense<0.000000e+00> : vector<8x8xf32>
    %299 = tpu.matmul %297, %298, %cst_127 {dimension_numbers = #tpu.dot_dimension_numbers<[1], [1], [0], [0], [0, 0, 1, 0], [], []>} : vector<8x8xf32>, vector<8x8xf32>, vector<8x8xf32> -> vector<8x8xf32>
    "tpu.trace_stop"() : () -> ()
    %300 = tpu.concatenate %284, %289, %294, %299 in 0 : vector<8x8xf32>, vector<8x8xf32>, vector<8x8xf32>, vector<8x8xf32> -> vector<32x8xf32>
    %cst_128 = arith.constant dense<0xFF800000> : vector<32xf32>
    %301 = vector.multi_reduction <maximumf>, %300, %cst_128 [1] : vector<32x8xf32> to vector<32xf32>
    %302 = vector.shape_cast %301 : vector<32xf32> to vector<32x1xf32>
    %303 = vector.broadcast %302 : vector<32x1xf32> to vector<32x8xf32>
    %304 = arith.subf %300, %303 : vector<32x8xf32>
    %305 = math.exp %304 : vector<32x8xf32>
    %cst_129 = arith.constant dense<0.000000e+00> : vector<32xf32>
    %306 = vector.multi_reduction <add>, %305, %cst_129 [1] : vector<32x8xf32> to vector<32xf32>
    %307 = vector.shape_cast %306 : vector<32xf32> to vector<32x1xf32>
    %308 = tpu.reciprocal %307 {approx = true} : vector<32x1xf32> -> vector<32x1xf32>
    %309 = vector.broadcast %308 : vector<32x1xf32> to vector<32x8xf32>
    %310 = arith.mulf %305, %309 : vector<32x8xf32>
    %311 = vector.extract_strided_slice %310 {offsets = [0, 0], sizes = [8, 8], strides = [1, 1]} : vector<32x8xf32> to vector<8x8xf32>
    %312 = vector.extract_strided_slice %279 {offsets = [0, 0], sizes = [8, 8], strides = [1, 1]} : vector<8x32xf32> to vector<8x8xf32>
    %cst_130 = arith.constant dense<0.000000e+00> : vector<8x8xf32>
    %313 = tpu.matmul %311, %312, %cst_130 {dimension_numbers = #tpu.dot_dimension_numbers<[1], [0], [0], [1], [0, 0, 1, 1], [], []>} : vector<8x8xf32>, vector<8x8xf32>, vector<8x8xf32> -> vector<8x8xf32>
    %c0_131 = arith.constant 0 : index
    %c0_132 = arith.constant 0 : index
    %314 = vector.load %arg11[%c0_131, %c0_132] : memref<32x32xf32, #tpu.memory_space<vmem>>, vector<8x32xf32>
    %cst_133 = arith.constant dense<0.000000e+00> : vector<8x32xf32>
    %315 = tpu.matmul %313, %314, %cst_133 {dimension_numbers = #tpu.dot_dimension_numbers<[1], [0], [0], [1], [0, 0, 1, 1], [], []>} : vector<8x8xf32>, vector<8x32xf32>, vector<8x32xf32> -> vector<8x32xf32>
    %316 = vector.extract_strided_slice %310 {offsets = [8, 0], sizes = [8, 8], strides = [1, 1]} : vector<32x8xf32> to vector<8x8xf32>
    %317 = vector.extract_strided_slice %279 {offsets = [0, 8], sizes = [8, 8], strides = [1, 1]} : vector<8x32xf32> to vector<8x8xf32>
    %cst_134 = arith.constant dense<0.000000e+00> : vector<8x8xf32>
    %318 = tpu.matmul %316, %317, %cst_134 {dimension_numbers = #tpu.dot_dimension_numbers<[1], [0], [0], [1], [0, 0, 1, 1], [], []>} : vector<8x8xf32>, vector<8x8xf32>, vector<8x8xf32> -> vector<8x8xf32>
    %c8_135 = arith.constant 8 : index
    %c0_136 = arith.constant 0 : index
    %319 = vector.load %arg11[%c8_135, %c0_136] : memref<32x32xf32, #tpu.memory_space<vmem>>, vector<8x32xf32>
    %cst_137 = arith.constant dense<0.000000e+00> : vector<8x32xf32>
    %320 = tpu.matmul %318, %319, %cst_137 {dimension_numbers = #tpu.dot_dimension_numbers<[1], [0], [0], [1], [0, 0, 1, 1], [], []>} : vector<8x8xf32>, vector<8x32xf32>, vector<8x32xf32> -> vector<8x32xf32>
    %321 = arith.addf %315, %320 : vector<8x32xf32>
    %322 = vector.extract_strided_slice %310 {offsets = [16, 0], sizes = [8, 8], strides = [1, 1]} : vector<32x8xf32> to vector<8x8xf32>
    %323 = vector.extract_strided_slice %279 {offsets = [0, 16], sizes = [8, 8], strides = [1, 1]} : vector<8x32xf32> to vector<8x8xf32>
    %cst_138 = arith.constant dense<0.000000e+00> : vector<8x8xf32>
    %324 = tpu.matmul %322, %323, %cst_138 {dimension_numbers = #tpu.dot_dimension_numbers<[1], [0], [0], [1], [0, 0, 1, 1], [], []>} : vector<8x8xf32>, vector<8x8xf32>, vector<8x8xf32> -> vector<8x8xf32>
    %c16_139 = arith.constant 16 : index
    %c0_140 = arith.constant 0 : index
    %325 = vector.load %arg11[%c16_139, %c0_140] : memref<32x32xf32, #tpu.memory_space<vmem>>, vector<8x32xf32>
    %cst_141 = arith.constant dense<0.000000e+00> : vector<8x32xf32>
    %326 = tpu.matmul %324, %325, %cst_141 {dimension_numbers = #tpu.dot_dimension_numbers<[1], [0], [0], [1], [0, 0, 1, 1], [], []>} : vector<8x8xf32>, vector<8x32xf32>, vector<8x32xf32> -> vector<8x32xf32>
    %327 = arith.addf %321, %326 : vector<8x32xf32>
    %328 = vector.extract_strided_slice %310 {offsets = [24, 0], sizes = [8, 8], strides = [1, 1]} : vector<32x8xf32> to vector<8x8xf32>
    %329 = vector.extract_strided_slice %279 {offsets = [0, 24], sizes = [8, 8], strides = [1, 1]} : vector<8x32xf32> to vector<8x8xf32>
    %cst_142 = arith.constant dense<0.000000e+00> : vector<8x8xf32>
    %330 = tpu.matmul %328, %329, %cst_142 {dimension_numbers = #tpu.dot_dimension_numbers<[1], [0], [0], [1], [0, 0, 1, 1], [], []>} : vector<8x8xf32>, vector<8x8xf32>, vector<8x8xf32> -> vector<8x8xf32>
    %c24_143 = arith.constant 24 : index
    %c0_144 = arith.constant 0 : index
    %331 = vector.load %arg11[%c24_143, %c0_144] : memref<32x32xf32, #tpu.memory_space<vmem>>, vector<8x32xf32>
    %cst_145 = arith.constant dense<0.000000e+00> : vector<8x32xf32>
    %332 = tpu.matmul %330, %331, %cst_145 {dimension_numbers = #tpu.dot_dimension_numbers<[1], [0], [0], [1], [0, 0, 1, 1], [], []>} : vector<8x8xf32>, vector<8x32xf32>, vector<8x32xf32> -> vector<8x32xf32>
    %333 = arith.addf %327, %332 : vector<8x32xf32>
    %334 = tpu.concatenate %276, %333 in 0 : vector<8x32xf32>, vector<8x32xf32> -> vector<16x32xf32>
    %c12 = arith.constant 12 : index
    %c0_146 = arith.constant 0 : index
    %335 = vector.load %arg2[%c12, %c0_146] : memref<24x32xf32, #tpu.memory_space<vmem>>, vector<1x32xf32>
    %336 = vector.broadcast %335 : vector<1x32xf32> to vector<16x32xf32>
    %337 = arith.addf %334, %336 : vector<16x32xf32>
    %338 = arith.addf %205, %337 : vector<16x32xf32>
    %cst_147 = arith.constant dense<0.000000e+00> : vector<16xf32>
    %339 = vector.multi_reduction <add>, %338, %cst_147 [1] : vector<16x32xf32> to vector<16xf32>
    %340 = vector.shape_cast %339 : vector<16xf32> to vector<16x1xf32>
    %cst_148 = arith.constant 3.200000e+01 : f32
    %341 = vector.broadcast %cst_148 : f32 to vector<16x1xf32>
    %342 = arith.divf %340, %341 : vector<16x1xf32>
    %343 = vector.broadcast %342 : vector<16x1xf32> to vector<16x32xf32>
    %344 = arith.subf %338, %343 : vector<16x32xf32>
    %345 = arith.mulf %344, %344 : vector<16x32xf32>
    %cst_149 = arith.constant dense<0.000000e+00> : vector<16xf32>
    %346 = vector.multi_reduction <add>, %345, %cst_149 [1] : vector<16x32xf32> to vector<16xf32>
    %347 = vector.shape_cast %346 : vector<16xf32> to vector<16x1xf32>
    %cst_150 = arith.constant 3.200000e+01 : f32
    %348 = vector.broadcast %cst_150 : f32 to vector<16x1xf32>
    %349 = arith.divf %347, %348 : vector<16x1xf32>
    %cst_151 = arith.constant 9.99999974E-6 : f32
    %350 = vector.broadcast %cst_151 : f32 to vector<16x1xf32>
    %351 = arith.addf %349, %350 : vector<16x1xf32>
    %352 = math.rsqrt %351 : vector<16x1xf32>
    %353 = vector.broadcast %352 : vector<16x1xf32> to vector<16x32xf32>
    %354 = arith.mulf %344, %353 : vector<16x32xf32>
    %c13 = arith.constant 13 : index
    %c0_152 = arith.constant 0 : index
    %355 = vector.load %arg2[%c13, %c0_152] : memref<24x32xf32, #tpu.memory_space<vmem>>, vector<1x32xf32>
    %356 = vector.broadcast %355 : vector<1x32xf32> to vector<16x32xf32>
    %357 = arith.mulf %354, %356 : vector<16x32xf32>
    %c14 = arith.constant 14 : index
    %c0_153 = arith.constant 0 : index
    %358 = vector.load %arg2[%c14, %c0_153] : memref<24x32xf32, #tpu.memory_space<vmem>>, vector<1x32xf32>
    %359 = vector.broadcast %358 : vector<1x32xf32> to vector<16x32xf32>
    %360 = arith.addf %357, %359 : vector<16x32xf32>
    %c0_154 = arith.constant 0 : index
    %c0_155 = arith.constant 0 : index
    %361 = vector.load %arg12[%c0_154, %c0_155] : memref<32x96xf32, #tpu.memory_space<vmem>>, vector<32x96xf32>
    %362 = vector.extract_strided_slice %361 {offsets = [0, 0], sizes = [32, 32], strides = [1, 1]} : vector<32x96xf32> to vector<32x32xf32>
    %cst_156 = arith.constant dense<0.000000e+00> : vector<16x32xf32>
    %363 = tpu.matmul %360, %362, %cst_156 {dimension_numbers = #tpu.dot_dimension_numbers<[1], [0], [0], [1], [0, 0, 1, 1], [], []>} : vector<16x32xf32>, vector<32x32xf32>, vector<16x32xf32> -> vector<16x32xf32>
    %c15 = arith.constant 15 : index
    %c0_157 = arith.constant 0 : index
    %364 = vector.load %arg2[%c15, %c0_157] : memref<24x32xf32, #tpu.memory_space<vmem>>, vector<1x32xf32>
    %365 = vector.broadcast %364 : vector<1x32xf32> to vector<16x32xf32>
    %366 = arith.addf %363, %365 : vector<16x32xf32>
    %367 = vector.extract_strided_slice %361 {offsets = [0, 32], sizes = [32, 64], strides = [1, 1]} : vector<32x96xf32> to vector<32x64xf32>
    %cst_158 = arith.constant dense<0.000000e+00> : vector<16x64xf32>
    %368 = tpu.matmul %13, %367, %cst_158 {dimension_numbers = #tpu.dot_dimension_numbers<[1], [0], [0], [1], [0, 0, 1, 1], [], []>} : vector<16x32xf32>, vector<32x64xf32>, vector<16x64xf32> -> vector<16x64xf32>
    %369 = vector.extract_strided_slice %368 {offsets = [0, 0], sizes = [16, 32], strides = [1, 1]} : vector<16x64xf32> to vector<16x32xf32>
    %c16_159 = arith.constant 16 : index
    %c0_160 = arith.constant 0 : index
    %370 = vector.load %arg2[%c16_159, %c0_160] : memref<24x32xf32, #tpu.memory_space<vmem>>, vector<1x32xf32>
    %371 = vector.broadcast %370 : vector<1x32xf32> to vector<16x32xf32>
    %372 = arith.addf %369, %371 : vector<16x32xf32>
    %373 = vector.extract_strided_slice %368 {offsets = [0, 32], sizes = [16, 32], strides = [1, 1]} : vector<16x64xf32> to vector<16x32xf32>
    %c17 = arith.constant 17 : index
    %c0_161 = arith.constant 0 : index
    %374 = vector.load %arg2[%c17, %c0_161] : memref<24x32xf32, #tpu.memory_space<vmem>>, vector<1x32xf32>
    %375 = vector.broadcast %374 : vector<1x32xf32> to vector<16x32xf32>
    %376 = arith.addf %373, %375 : vector<16x32xf32>
    %377 = vector.extract_strided_slice %366 {offsets = [0, 0], sizes = [8, 32], strides = [1, 1]} : vector<16x32xf32> to vector<8x32xf32>
    %378 = vector.extract_strided_slice %372 {offsets = [0, 0], sizes = [8, 32], strides = [1, 1]} : vector<16x32xf32> to vector<8x32xf32>
    %379 = vector.extract_strided_slice %376 {offsets = [0, 0], sizes = [8, 32], strides = [1, 1]} : vector<16x32xf32> to vector<8x32xf32>
    %380 = vector.extract_strided_slice %377 {offsets = [0, 0], sizes = [8, 8], strides = [1, 1]} : vector<8x32xf32> to vector<8x8xf32>
    %cst_162 = arith.constant 0.353553385 : f32
    %381 = vector.broadcast %cst_162 : f32 to vector<8x8xf32>
    %382 = arith.mulf %380, %381 : vector<8x8xf32>
    %383 = vector.extract_strided_slice %378 {offsets = [0, 0], sizes = [8, 8], strides = [1, 1]} : vector<8x32xf32> to vector<8x8xf32>
    "tpu.trace_start"() <{level = 10 : i32, message = "qd,kd->qk"}> : () -> ()
    %cst_163 = arith.constant dense<0.000000e+00> : vector<8x8xf32>
    %384 = tpu.matmul %382, %383, %cst_163 {dimension_numbers = #tpu.dot_dimension_numbers<[1], [1], [0], [0], [0, 0, 1, 0], [], []>} : vector<8x8xf32>, vector<8x8xf32>, vector<8x8xf32> -> vector<8x8xf32>
    "tpu.trace_stop"() : () -> ()
    %385 = vector.extract_strided_slice %377 {offsets = [0, 8], sizes = [8, 8], strides = [1, 1]} : vector<8x32xf32> to vector<8x8xf32>
    %cst_164 = arith.constant 0.353553385 : f32
    %386 = vector.broadcast %cst_164 : f32 to vector<8x8xf32>
    %387 = arith.mulf %385, %386 : vector<8x8xf32>
    %388 = vector.extract_strided_slice %378 {offsets = [0, 8], sizes = [8, 8], strides = [1, 1]} : vector<8x32xf32> to vector<8x8xf32>
    "tpu.trace_start"() <{level = 10 : i32, message = "qd,kd->qk"}> : () -> ()
    %cst_165 = arith.constant dense<0.000000e+00> : vector<8x8xf32>
    %389 = tpu.matmul %387, %388, %cst_165 {dimension_numbers = #tpu.dot_dimension_numbers<[1], [1], [0], [0], [0, 0, 1, 0], [], []>} : vector<8x8xf32>, vector<8x8xf32>, vector<8x8xf32> -> vector<8x8xf32>
    "tpu.trace_stop"() : () -> ()
    %390 = vector.extract_strided_slice %377 {offsets = [0, 16], sizes = [8, 8], strides = [1, 1]} : vector<8x32xf32> to vector<8x8xf32>
    %cst_166 = arith.constant 0.353553385 : f32
    %391 = vector.broadcast %cst_166 : f32 to vector<8x8xf32>
    %392 = arith.mulf %390, %391 : vector<8x8xf32>
    %393 = vector.extract_strided_slice %378 {offsets = [0, 16], sizes = [8, 8], strides = [1, 1]} : vector<8x32xf32> to vector<8x8xf32>
    "tpu.trace_start"() <{level = 10 : i32, message = "qd,kd->qk"}> : () -> ()
    %cst_167 = arith.constant dense<0.000000e+00> : vector<8x8xf32>
    %394 = tpu.matmul %392, %393, %cst_167 {dimension_numbers = #tpu.dot_dimension_numbers<[1], [1], [0], [0], [0, 0, 1, 0], [], []>} : vector<8x8xf32>, vector<8x8xf32>, vector<8x8xf32> -> vector<8x8xf32>
    "tpu.trace_stop"() : () -> ()
    %395 = vector.extract_strided_slice %377 {offsets = [0, 24], sizes = [8, 8], strides = [1, 1]} : vector<8x32xf32> to vector<8x8xf32>
    %cst_168 = arith.constant 0.353553385 : f32
    %396 = vector.broadcast %cst_168 : f32 to vector<8x8xf32>
    %397 = arith.mulf %395, %396 : vector<8x8xf32>
    %398 = vector.extract_strided_slice %378 {offsets = [0, 24], sizes = [8, 8], strides = [1, 1]} : vector<8x32xf32> to vector<8x8xf32>
    "tpu.trace_start"() <{level = 10 : i32, message = "qd,kd->qk"}> : () -> ()
    %cst_169 = arith.constant dense<0.000000e+00> : vector<8x8xf32>
    %399 = tpu.matmul %397, %398, %cst_169 {dimension_numbers = #tpu.dot_dimension_numbers<[1], [1], [0], [0], [0, 0, 1, 0], [], []>} : vector<8x8xf32>, vector<8x8xf32>, vector<8x8xf32> -> vector<8x8xf32>
    "tpu.trace_stop"() : () -> ()
    %400 = tpu.concatenate %384, %389, %394, %399 in 0 : vector<8x8xf32>, vector<8x8xf32>, vector<8x8xf32>, vector<8x8xf32> -> vector<32x8xf32>
    %cst_170 = arith.constant dense<0xFF800000> : vector<32xf32>
    %401 = vector.multi_reduction <maximumf>, %400, %cst_170 [1] : vector<32x8xf32> to vector<32xf32>
    %402 = vector.shape_cast %401 : vector<32xf32> to vector<32x1xf32>
    %403 = vector.broadcast %402 : vector<32x1xf32> to vector<32x8xf32>
    %404 = arith.subf %400, %403 : vector<32x8xf32>
    %405 = math.exp %404 : vector<32x8xf32>
    %cst_171 = arith.constant dense<0.000000e+00> : vector<32xf32>
    %406 = vector.multi_reduction <add>, %405, %cst_171 [1] : vector<32x8xf32> to vector<32xf32>
    %407 = vector.shape_cast %406 : vector<32xf32> to vector<32x1xf32>
    %408 = tpu.reciprocal %407 {approx = true} : vector<32x1xf32> -> vector<32x1xf32>
    %409 = vector.broadcast %408 : vector<32x1xf32> to vector<32x8xf32>
    %410 = arith.mulf %405, %409 : vector<32x8xf32>
    %411 = vector.extract_strided_slice %410 {offsets = [0, 0], sizes = [8, 8], strides = [1, 1]} : vector<32x8xf32> to vector<8x8xf32>
    %412 = vector.extract_strided_slice %379 {offsets = [0, 0], sizes = [8, 8], strides = [1, 1]} : vector<8x32xf32> to vector<8x8xf32>
    %cst_172 = arith.constant dense<0.000000e+00> : vector<8x8xf32>
    %413 = tpu.matmul %411, %412, %cst_172 {dimension_numbers = #tpu.dot_dimension_numbers<[1], [0], [0], [1], [0, 0, 1, 1], [], []>} : vector<8x8xf32>, vector<8x8xf32>, vector<8x8xf32> -> vector<8x8xf32>
    %c0_173 = arith.constant 0 : index
    %c0_174 = arith.constant 0 : index
    %414 = vector.load %arg13[%c0_173, %c0_174] : memref<32x32xf32, #tpu.memory_space<vmem>>, vector<8x32xf32>
    %cst_175 = arith.constant dense<0.000000e+00> : vector<8x32xf32>
    %415 = tpu.matmul %413, %414, %cst_175 {dimension_numbers = #tpu.dot_dimension_numbers<[1], [0], [0], [1], [0, 0, 1, 1], [], []>} : vector<8x8xf32>, vector<8x32xf32>, vector<8x32xf32> -> vector<8x32xf32>
    %416 = vector.extract_strided_slice %410 {offsets = [8, 0], sizes = [8, 8], strides = [1, 1]} : vector<32x8xf32> to vector<8x8xf32>
    %417 = vector.extract_strided_slice %379 {offsets = [0, 8], sizes = [8, 8], strides = [1, 1]} : vector<8x32xf32> to vector<8x8xf32>
    %cst_176 = arith.constant dense<0.000000e+00> : vector<8x8xf32>
    %418 = tpu.matmul %416, %417, %cst_176 {dimension_numbers = #tpu.dot_dimension_numbers<[1], [0], [0], [1], [0, 0, 1, 1], [], []>} : vector<8x8xf32>, vector<8x8xf32>, vector<8x8xf32> -> vector<8x8xf32>
    %c8_177 = arith.constant 8 : index
    %c0_178 = arith.constant 0 : index
    %419 = vector.load %arg13[%c8_177, %c0_178] : memref<32x32xf32, #tpu.memory_space<vmem>>, vector<8x32xf32>
    %cst_179 = arith.constant dense<0.000000e+00> : vector<8x32xf32>
    %420 = tpu.matmul %418, %419, %cst_179 {dimension_numbers = #tpu.dot_dimension_numbers<[1], [0], [0], [1], [0, 0, 1, 1], [], []>} : vector<8x8xf32>, vector<8x32xf32>, vector<8x32xf32> -> vector<8x32xf32>
    %421 = arith.addf %415, %420 : vector<8x32xf32>
    %422 = vector.extract_strided_slice %410 {offsets = [16, 0], sizes = [8, 8], strides = [1, 1]} : vector<32x8xf32> to vector<8x8xf32>
    %423 = vector.extract_strided_slice %379 {offsets = [0, 16], sizes = [8, 8], strides = [1, 1]} : vector<8x32xf32> to vector<8x8xf32>
    %cst_180 = arith.constant dense<0.000000e+00> : vector<8x8xf32>
    %424 = tpu.matmul %422, %423, %cst_180 {dimension_numbers = #tpu.dot_dimension_numbers<[1], [0], [0], [1], [0, 0, 1, 1], [], []>} : vector<8x8xf32>, vector<8x8xf32>, vector<8x8xf32> -> vector<8x8xf32>
    %c16_181 = arith.constant 16 : index
    %c0_182 = arith.constant 0 : index
    %425 = vector.load %arg13[%c16_181, %c0_182] : memref<32x32xf32, #tpu.memory_space<vmem>>, vector<8x32xf32>
    %cst_183 = arith.constant dense<0.000000e+00> : vector<8x32xf32>
    %426 = tpu.matmul %424, %425, %cst_183 {dimension_numbers = #tpu.dot_dimension_numbers<[1], [0], [0], [1], [0, 0, 1, 1], [], []>} : vector<8x8xf32>, vector<8x32xf32>, vector<8x32xf32> -> vector<8x32xf32>
    %427 = arith.addf %421, %426 : vector<8x32xf32>
    %428 = vector.extract_strided_slice %410 {offsets = [24, 0], sizes = [8, 8], strides = [1, 1]} : vector<32x8xf32> to vector<8x8xf32>
    %429 = vector.extract_strided_slice %379 {offsets = [0, 24], sizes = [8, 8], strides = [1, 1]} : vector<8x32xf32> to vector<8x8xf32>
    %cst_184 = arith.constant dense<0.000000e+00> : vector<8x8xf32>
    %430 = tpu.matmul %428, %429, %cst_184 {dimension_numbers = #tpu.dot_dimension_numbers<[1], [0], [0], [1], [0, 0, 1, 1], [], []>} : vector<8x8xf32>, vector<8x8xf32>, vector<8x8xf32> -> vector<8x8xf32>
    %c24_185 = arith.constant 24 : index
    %c0_186 = arith.constant 0 : index
    %431 = vector.load %arg13[%c24_185, %c0_186] : memref<32x32xf32, #tpu.memory_space<vmem>>, vector<8x32xf32>
    %cst_187 = arith.constant dense<0.000000e+00> : vector<8x32xf32>
    %432 = tpu.matmul %430, %431, %cst_187 {dimension_numbers = #tpu.dot_dimension_numbers<[1], [0], [0], [1], [0, 0, 1, 1], [], []>} : vector<8x8xf32>, vector<8x32xf32>, vector<8x32xf32> -> vector<8x32xf32>
    %433 = arith.addf %427, %432 : vector<8x32xf32>
    %434 = vector.extract_strided_slice %366 {offsets = [8, 0], sizes = [8, 32], strides = [1, 1]} : vector<16x32xf32> to vector<8x32xf32>
    %435 = vector.extract_strided_slice %372 {offsets = [8, 0], sizes = [8, 32], strides = [1, 1]} : vector<16x32xf32> to vector<8x32xf32>
    %436 = vector.extract_strided_slice %376 {offsets = [8, 0], sizes = [8, 32], strides = [1, 1]} : vector<16x32xf32> to vector<8x32xf32>
    %437 = vector.extract_strided_slice %434 {offsets = [0, 0], sizes = [8, 8], strides = [1, 1]} : vector<8x32xf32> to vector<8x8xf32>
    %cst_188 = arith.constant 0.353553385 : f32
    %438 = vector.broadcast %cst_188 : f32 to vector<8x8xf32>
    %439 = arith.mulf %437, %438 : vector<8x8xf32>
    %440 = vector.extract_strided_slice %435 {offsets = [0, 0], sizes = [8, 8], strides = [1, 1]} : vector<8x32xf32> to vector<8x8xf32>
    "tpu.trace_start"() <{level = 10 : i32, message = "qd,kd->qk"}> : () -> ()
    %cst_189 = arith.constant dense<0.000000e+00> : vector<8x8xf32>
    %441 = tpu.matmul %439, %440, %cst_189 {dimension_numbers = #tpu.dot_dimension_numbers<[1], [1], [0], [0], [0, 0, 1, 0], [], []>} : vector<8x8xf32>, vector<8x8xf32>, vector<8x8xf32> -> vector<8x8xf32>
    "tpu.trace_stop"() : () -> ()
    %442 = vector.extract_strided_slice %434 {offsets = [0, 8], sizes = [8, 8], strides = [1, 1]} : vector<8x32xf32> to vector<8x8xf32>
    %cst_190 = arith.constant 0.353553385 : f32
    %443 = vector.broadcast %cst_190 : f32 to vector<8x8xf32>
    %444 = arith.mulf %442, %443 : vector<8x8xf32>
    %445 = vector.extract_strided_slice %435 {offsets = [0, 8], sizes = [8, 8], strides = [1, 1]} : vector<8x32xf32> to vector<8x8xf32>
    "tpu.trace_start"() <{level = 10 : i32, message = "qd,kd->qk"}> : () -> ()
    %cst_191 = arith.constant dense<0.000000e+00> : vector<8x8xf32>
    %446 = tpu.matmul %444, %445, %cst_191 {dimension_numbers = #tpu.dot_dimension_numbers<[1], [1], [0], [0], [0, 0, 1, 0], [], []>} : vector<8x8xf32>, vector<8x8xf32>, vector<8x8xf32> -> vector<8x8xf32>
    "tpu.trace_stop"() : () -> ()
    %447 = vector.extract_strided_slice %434 {offsets = [0, 16], sizes = [8, 8], strides = [1, 1]} : vector<8x32xf32> to vector<8x8xf32>
    %cst_192 = arith.constant 0.353553385 : f32
    %448 = vector.broadcast %cst_192 : f32 to vector<8x8xf32>
    %449 = arith.mulf %447, %448 : vector<8x8xf32>
    %450 = vector.extract_strided_slice %435 {offsets = [0, 16], sizes = [8, 8], strides = [1, 1]} : vector<8x32xf32> to vector<8x8xf32>
    "tpu.trace_start"() <{level = 10 : i32, message = "qd,kd->qk"}> : () -> ()
    %cst_193 = arith.constant dense<0.000000e+00> : vector<8x8xf32>
    %451 = tpu.matmul %449, %450, %cst_193 {dimension_numbers = #tpu.dot_dimension_numbers<[1], [1], [0], [0], [0, 0, 1, 0], [], []>} : vector<8x8xf32>, vector<8x8xf32>, vector<8x8xf32> -> vector<8x8xf32>
    "tpu.trace_stop"() : () -> ()
    %452 = vector.extract_strided_slice %434 {offsets = [0, 24], sizes = [8, 8], strides = [1, 1]} : vector<8x32xf32> to vector<8x8xf32>
    %cst_194 = arith.constant 0.353553385 : f32
    %453 = vector.broadcast %cst_194 : f32 to vector<8x8xf32>
    %454 = arith.mulf %452, %453 : vector<8x8xf32>
    %455 = vector.extract_strided_slice %435 {offsets = [0, 24], sizes = [8, 8], strides = [1, 1]} : vector<8x32xf32> to vector<8x8xf32>
    "tpu.trace_start"() <{level = 10 : i32, message = "qd,kd->qk"}> : () -> ()
    %cst_195 = arith.constant dense<0.000000e+00> : vector<8x8xf32>
    %456 = tpu.matmul %454, %455, %cst_195 {dimension_numbers = #tpu.dot_dimension_numbers<[1], [1], [0], [0], [0, 0, 1, 0], [], []>} : vector<8x8xf32>, vector<8x8xf32>, vector<8x8xf32> -> vector<8x8xf32>
    "tpu.trace_stop"() : () -> ()
    %457 = tpu.concatenate %441, %446, %451, %456 in 0 : vector<8x8xf32>, vector<8x8xf32>, vector<8x8xf32>, vector<8x8xf32> -> vector<32x8xf32>
    %cst_196 = arith.constant dense<0xFF800000> : vector<32xf32>
    %458 = vector.multi_reduction <maximumf>, %457, %cst_196 [1] : vector<32x8xf32> to vector<32xf32>
    %459 = vector.shape_cast %458 : vector<32xf32> to vector<32x1xf32>
    %460 = vector.broadcast %459 : vector<32x1xf32> to vector<32x8xf32>
    %461 = arith.subf %457, %460 : vector<32x8xf32>
    %462 = math.exp %461 : vector<32x8xf32>
    %cst_197 = arith.constant dense<0.000000e+00> : vector<32xf32>
    %463 = vector.multi_reduction <add>, %462, %cst_197 [1] : vector<32x8xf32> to vector<32xf32>
    %464 = vector.shape_cast %463 : vector<32xf32> to vector<32x1xf32>
    %465 = tpu.reciprocal %464 {approx = true} : vector<32x1xf32> -> vector<32x1xf32>
    %466 = vector.broadcast %465 : vector<32x1xf32> to vector<32x8xf32>
    %467 = arith.mulf %462, %466 : vector<32x8xf32>
    %468 = vector.extract_strided_slice %467 {offsets = [0, 0], sizes = [8, 8], strides = [1, 1]} : vector<32x8xf32> to vector<8x8xf32>
    %469 = vector.extract_strided_slice %436 {offsets = [0, 0], sizes = [8, 8], strides = [1, 1]} : vector<8x32xf32> to vector<8x8xf32>
    %cst_198 = arith.constant dense<0.000000e+00> : vector<8x8xf32>
    %470 = tpu.matmul %468, %469, %cst_198 {dimension_numbers = #tpu.dot_dimension_numbers<[1], [0], [0], [1], [0, 0, 1, 1], [], []>} : vector<8x8xf32>, vector<8x8xf32>, vector<8x8xf32> -> vector<8x8xf32>
    %c0_199 = arith.constant 0 : index
    %c0_200 = arith.constant 0 : index
    %471 = vector.load %arg13[%c0_199, %c0_200] : memref<32x32xf32, #tpu.memory_space<vmem>>, vector<8x32xf32>
    %cst_201 = arith.constant dense<0.000000e+00> : vector<8x32xf32>
    %472 = tpu.matmul %470, %471, %cst_201 {dimension_numbers = #tpu.dot_dimension_numbers<[1], [0], [0], [1], [0, 0, 1, 1], [], []>} : vector<8x8xf32>, vector<8x32xf32>, vector<8x32xf32> -> vector<8x32xf32>
    %473 = vector.extract_strided_slice %467 {offsets = [8, 0], sizes = [8, 8], strides = [1, 1]} : vector<32x8xf32> to vector<8x8xf32>
    %474 = vector.extract_strided_slice %436 {offsets = [0, 8], sizes = [8, 8], strides = [1, 1]} : vector<8x32xf32> to vector<8x8xf32>
    %cst_202 = arith.constant dense<0.000000e+00> : vector<8x8xf32>
    %475 = tpu.matmul %473, %474, %cst_202 {dimension_numbers = #tpu.dot_dimension_numbers<[1], [0], [0], [1], [0, 0, 1, 1], [], []>} : vector<8x8xf32>, vector<8x8xf32>, vector<8x8xf32> -> vector<8x8xf32>
    %c8_203 = arith.constant 8 : index
    %c0_204 = arith.constant 0 : index
    %476 = vector.load %arg13[%c8_203, %c0_204] : memref<32x32xf32, #tpu.memory_space<vmem>>, vector<8x32xf32>
    %cst_205 = arith.constant dense<0.000000e+00> : vector<8x32xf32>
    %477 = tpu.matmul %475, %476, %cst_205 {dimension_numbers = #tpu.dot_dimension_numbers<[1], [0], [0], [1], [0, 0, 1, 1], [], []>} : vector<8x8xf32>, vector<8x32xf32>, vector<8x32xf32> -> vector<8x32xf32>
    %478 = arith.addf %472, %477 : vector<8x32xf32>
    %479 = vector.extract_strided_slice %467 {offsets = [16, 0], sizes = [8, 8], strides = [1, 1]} : vector<32x8xf32> to vector<8x8xf32>
    %480 = vector.extract_strided_slice %436 {offsets = [0, 16], sizes = [8, 8], strides = [1, 1]} : vector<8x32xf32> to vector<8x8xf32>
    %cst_206 = arith.constant dense<0.000000e+00> : vector<8x8xf32>
    %481 = tpu.matmul %479, %480, %cst_206 {dimension_numbers = #tpu.dot_dimension_numbers<[1], [0], [0], [1], [0, 0, 1, 1], [], []>} : vector<8x8xf32>, vector<8x8xf32>, vector<8x8xf32> -> vector<8x8xf32>
    %c16_207 = arith.constant 16 : index
    %c0_208 = arith.constant 0 : index
    %482 = vector.load %arg13[%c16_207, %c0_208] : memref<32x32xf32, #tpu.memory_space<vmem>>, vector<8x32xf32>
    %cst_209 = arith.constant dense<0.000000e+00> : vector<8x32xf32>
    %483 = tpu.matmul %481, %482, %cst_209 {dimension_numbers = #tpu.dot_dimension_numbers<[1], [0], [0], [1], [0, 0, 1, 1], [], []>} : vector<8x8xf32>, vector<8x32xf32>, vector<8x32xf32> -> vector<8x32xf32>
    %484 = arith.addf %478, %483 : vector<8x32xf32>
    %485 = vector.extract_strided_slice %467 {offsets = [24, 0], sizes = [8, 8], strides = [1, 1]} : vector<32x8xf32> to vector<8x8xf32>
    %486 = vector.extract_strided_slice %436 {offsets = [0, 24], sizes = [8, 8], strides = [1, 1]} : vector<8x32xf32> to vector<8x8xf32>
    %cst_210 = arith.constant dense<0.000000e+00> : vector<8x8xf32>
    %487 = tpu.matmul %485, %486, %cst_210 {dimension_numbers = #tpu.dot_dimension_numbers<[1], [0], [0], [1], [0, 0, 1, 1], [], []>} : vector<8x8xf32>, vector<8x8xf32>, vector<8x8xf32> -> vector<8x8xf32>
    %c24_211 = arith.constant 24 : index
    %c0_212 = arith.constant 0 : index
    %488 = vector.load %arg13[%c24_211, %c0_212] : memref<32x32xf32, #tpu.memory_space<vmem>>, vector<8x32xf32>
    %cst_213 = arith.constant dense<0.000000e+00> : vector<8x32xf32>
    %489 = tpu.matmul %487, %488, %cst_213 {dimension_numbers = #tpu.dot_dimension_numbers<[1], [0], [0], [1], [0, 0, 1, 1], [], []>} : vector<8x8xf32>, vector<8x32xf32>, vector<8x32xf32> -> vector<8x32xf32>
    %490 = arith.addf %484, %489 : vector<8x32xf32>
    %491 = tpu.concatenate %433, %490 in 0 : vector<8x32xf32>, vector<8x32xf32> -> vector<16x32xf32>
    %c18 = arith.constant 18 : index
    %c0_214 = arith.constant 0 : index
    %492 = vector.load %arg2[%c18, %c0_214] : memref<24x32xf32, #tpu.memory_space<vmem>>, vector<1x32xf32>
    %493 = vector.broadcast %492 : vector<1x32xf32> to vector<16x32xf32>
    %494 = arith.addf %491, %493 : vector<16x32xf32>
    %495 = arith.addf %360, %494 : vector<16x32xf32>
    %cst_215 = arith.constant dense<0.000000e+00> : vector<16xf32>
    %496 = vector.multi_reduction <add>, %495, %cst_215 [1] : vector<16x32xf32> to vector<16xf32>
    %497 = vector.shape_cast %496 : vector<16xf32> to vector<16x1xf32>
    %cst_216 = arith.constant 3.200000e+01 : f32
    %498 = vector.broadcast %cst_216 : f32 to vector<16x1xf32>
    %499 = arith.divf %497, %498 : vector<16x1xf32>
    %500 = vector.broadcast %499 : vector<16x1xf32> to vector<16x32xf32>
    %501 = arith.subf %495, %500 : vector<16x32xf32>
    %502 = arith.mulf %501, %501 : vector<16x32xf32>
    %cst_217 = arith.constant dense<0.000000e+00> : vector<16xf32>
    %503 = vector.multi_reduction <add>, %502, %cst_217 [1] : vector<16x32xf32> to vector<16xf32>
    %504 = vector.shape_cast %503 : vector<16xf32> to vector<16x1xf32>
    %cst_218 = arith.constant 3.200000e+01 : f32
    %505 = vector.broadcast %cst_218 : f32 to vector<16x1xf32>
    %506 = arith.divf %504, %505 : vector<16x1xf32>
    %cst_219 = arith.constant 9.99999974E-6 : f32
    %507 = vector.broadcast %cst_219 : f32 to vector<16x1xf32>
    %508 = arith.addf %506, %507 : vector<16x1xf32>
    %509 = math.rsqrt %508 : vector<16x1xf32>
    %510 = vector.broadcast %509 : vector<16x1xf32> to vector<16x32xf32>
    %511 = arith.mulf %501, %510 : vector<16x32xf32>
    %c19 = arith.constant 19 : index
    %c0_220 = arith.constant 0 : index
    %512 = vector.load %arg2[%c19, %c0_220] : memref<24x32xf32, #tpu.memory_space<vmem>>, vector<1x32xf32>
    %513 = vector.broadcast %512 : vector<1x32xf32> to vector<16x32xf32>
    %514 = arith.mulf %511, %513 : vector<16x32xf32>
    %c20 = arith.constant 20 : index
    %c0_221 = arith.constant 0 : index
    %515 = vector.load %arg2[%c20, %c0_221] : memref<24x32xf32, #tpu.memory_space<vmem>>, vector<1x32xf32>
    %516 = vector.broadcast %515 : vector<1x32xf32> to vector<16x32xf32>
    %517 = arith.addf %514, %516 : vector<16x32xf32>
    %c0_222 = arith.constant 0 : index
    %c0_223 = arith.constant 0 : index
    %518 = vector.load %arg14[%c0_222, %c0_223] : memref<32x64xf32, #tpu.memory_space<vmem>>, vector<32x64xf32>
    %cst_224 = arith.constant dense<0.000000e+00> : vector<16x64xf32>
    %519 = tpu.matmul %517, %518, %cst_224 {dimension_numbers = #tpu.dot_dimension_numbers<[1], [0], [0], [1], [0, 0, 1, 1], [], []>} : vector<16x32xf32>, vector<32x64xf32>, vector<16x64xf32> -> vector<16x64xf32>
    %c1_225 = arith.constant 1 : index
    %c0_226 = arith.constant 0 : index
    %520 = vector.load %arg3[%c1_225, %c0_226] : memref<2x64xf32, #tpu.memory_space<vmem>>, vector<1x64xf32>
    %521 = vector.broadcast %520 : vector<1x64xf32> to vector<16x64xf32>
    %522 = arith.addf %519, %521 : vector<16x64xf32>
    %cst_227 = arith.constant 0.000000e+00 : f32
    %523 = vector.broadcast %cst_227 : f32 to vector<16x64xf32>
    %524 = arith.maximumf %522, %523 : vector<16x64xf32>
    %c0_228 = arith.constant 0 : index
    %c0_229 = arith.constant 0 : index
    %525 = vector.load %arg15[%c0_228, %c0_229] : memref<64x32xf32, #tpu.memory_space<vmem>>, vector<64x32xf32>
    %cst_230 = arith.constant dense<0.000000e+00> : vector<16x32xf32>
    %526 = tpu.matmul %524, %525, %cst_230 {dimension_numbers = #tpu.dot_dimension_numbers<[1], [0], [0], [1], [0, 0, 1, 1], [], []>} : vector<16x64xf32>, vector<64x32xf32>, vector<16x32xf32> -> vector<16x32xf32>
    %c21 = arith.constant 21 : index
    %c0_231 = arith.constant 0 : index
    %527 = vector.load %arg2[%c21, %c0_231] : memref<24x32xf32, #tpu.memory_space<vmem>>, vector<1x32xf32>
    %528 = vector.broadcast %527 : vector<1x32xf32> to vector<16x32xf32>
    %529 = arith.addf %526, %528 : vector<16x32xf32>
    %530 = arith.addf %517, %529 : vector<16x32xf32>
    %cst_232 = arith.constant dense<0.000000e+00> : vector<16xf32>
    %531 = vector.multi_reduction <add>, %530, %cst_232 [1] : vector<16x32xf32> to vector<16xf32>
    %532 = vector.shape_cast %531 : vector<16xf32> to vector<16x1xf32>
    %cst_233 = arith.constant 3.200000e+01 : f32
    %533 = vector.broadcast %cst_233 : f32 to vector<16x1xf32>
    %534 = arith.divf %532, %533 : vector<16x1xf32>
    %535 = vector.broadcast %534 : vector<16x1xf32> to vector<16x32xf32>
    %536 = arith.subf %530, %535 : vector<16x32xf32>
    %537 = arith.mulf %536, %536 : vector<16x32xf32>
    %cst_234 = arith.constant dense<0.000000e+00> : vector<16xf32>
    %538 = vector.multi_reduction <add>, %537, %cst_234 [1] : vector<16x32xf32> to vector<16xf32>
    %539 = vector.shape_cast %538 : vector<16xf32> to vector<16x1xf32>
    %cst_235 = arith.constant 3.200000e+01 : f32
    %540 = vector.broadcast %cst_235 : f32 to vector<16x1xf32>
    %541 = arith.divf %539, %540 : vector<16x1xf32>
    %cst_236 = arith.constant 9.99999974E-6 : f32
    %542 = vector.broadcast %cst_236 : f32 to vector<16x1xf32>
    %543 = arith.addf %541, %542 : vector<16x1xf32>
    %544 = math.rsqrt %543 : vector<16x1xf32>
    %545 = vector.broadcast %544 : vector<16x1xf32> to vector<16x32xf32>
    %546 = arith.mulf %536, %545 : vector<16x32xf32>
    %c22 = arith.constant 22 : index
    %c0_237 = arith.constant 0 : index
    %547 = vector.load %arg2[%c22, %c0_237] : memref<24x32xf32, #tpu.memory_space<vmem>>, vector<1x32xf32>
    %548 = vector.broadcast %547 : vector<1x32xf32> to vector<16x32xf32>
    %549 = arith.mulf %546, %548 : vector<16x32xf32>
    %c23 = arith.constant 23 : index
    %c0_238 = arith.constant 0 : index
    %550 = vector.load %arg2[%c23, %c0_238] : memref<24x32xf32, #tpu.memory_space<vmem>>, vector<1x32xf32>
    %551 = vector.broadcast %550 : vector<1x32xf32> to vector<16x32xf32>
    %552 = arith.addf %549, %551 : vector<16x32xf32>
    %c0_239 = arith.constant 0 : index
    %c0_240 = arith.constant 0 : index
    %553 = vector.load %arg16[%c0_239, %c0_240] : memref<1x32xf32, #tpu.memory_space<vmem>>, vector<1x32xf32>
    "tpu.trace_start"() <{level = 10 : i32, message = "cd,bd->cb"}> : () -> ()
    %cst_241 = arith.constant dense<0.000000e+00> : vector<1x16xf32>
    %554 = tpu.matmul %553, %552, %cst_241 {dimension_numbers = #tpu.dot_dimension_numbers<[1], [1], [0], [0], [0, 0, 1, 0], [], []>} : vector<1x32xf32>, vector<16x32xf32>, vector<1x16xf32> -> vector<1x16xf32>
    "tpu.trace_stop"() : () -> ()
    %c0_242 = arith.constant 0 : index
    %c0_243 = arith.constant 0 : index
    %555 = vector.load %arg4[%c0_242, %c0_243] : memref<1x1xf32, #tpu.memory_space<vmem>>, vector<1x1xf32>
    %556 = vector.broadcast %555 : vector<1x1xf32> to vector<1x16xf32>
    %557 = arith.addf %554, %556 : vector<1x16xf32>
    %c0_244 = arith.constant 0 : index
    %c0_245 = arith.constant 0 : index
    %558 = vector.load %arg17[%c0_244, %c0_245] : memref<1x16xf32, #tpu.memory_space<vmem>>, vector<1x16xf32>
    tpu.vector_store %arg17[%c0_244, %c0_245], %557 {strides = array<i32>} : memref<1x16xf32, #tpu.memory_space<vmem>>, vector<1x16xf32>,
    return
  }
}

</mosaic_0001>

<bundles_post_ra>
// kernel: tpu_custom_call.1
= control target key start
LH: loop header
LB: loop body
LE: loop exit
PB: predicated region body
PF: predicated region fallthrough
CT: control target
= control target key end

     0   :  { %s9245_s0 = inlined_call_operand.vmem [shape: f32[16,1], index: 0, kind: input, shape index: {}]   ;;  %s9246_s1 = inlined_call_operand.hbm [shape: f32[16,32], index: 1, kind: input, shape index: {}]   ;;  %s9247_s2 = inlined_call_operand.hbm [shape: f32[24,32], index: 2, kind: input, shape index: {}]   ;;  %s9248_s3 = inlined_call_operand.vmem [shape: f32[2,64], index: 3, kind: input, shape index: {}]   ;;  %s9249_s4 = inlined_call_operand.<no memory space> [shape: f32[1,1], index: 4, kind: input, shape index: {}]   ;;  %s9250_s5 = inlined_call_operand.hbm [shape: f32[1,32], index: 5, kind: input, shape index: {}]   ;;  %s9251_s6 = inlined_call_operand.vmem [shape: f32[32,96], index: 6, kind: input, shape index: {}]   ;;  %s9252_s7 = inlined_call_operand.vmem [shape: f32[32,32], index: 7, kind: input, shape index: {}]   ;;  %s9253_s8 = inlined_call_operand.vmem [shape: f32[32,64], index: 8, kind: input, shape index: {}]   ;;  %s9254_s9 = inlined_call_operand.vmem [shape: f32[64,32], index: 9, kind: input, shape index: {}]   ;;  %s9255_s10 = inlined_call_operand.vmem [shape: f32[32,96], index: 10, kind: input, shape index: {}]   ;;  %s9256_s11 = inlined_call_operand.vmem [shape: f32[32,32], index: 11, kind: input, shape index: {}]   ;;  %s9257_s12 = inlined_call_operand.hbm [shape: f32[32,96], index: 12, kind: input, shape index: {}]   ;;  %s9258_s13 = inlined_call_operand.vmem [shape: f32[32,32], index: 13, kind: input, shape index: {}]   ;;  %s9259_s14 = inlined_call_operand.hbm [shape: f32[32,64], index: 14, kind: input, shape index: {}]   ;;  %s9260_s15 = inlined_call_operand.vmem [shape: f32[64,32], index: 15, kind: input, shape index: {}]   ;;  %s9261_s16 = inlined_call_operand.vmem [shape: f32[1,32], index: 16, kind: input, shape index: {}]   ;;  %s9262_s17 = inlined_call_operand.hbm [shape: f32[1,16], index: 17, kind: output, shape index: {}]  }
   0x1   :  { %9265 = sst [smem:[#allocation17_spill]] %s9245_s0  ;;  %v22_v0 = vstv %s9249_s4 }
   0x2   :  { %9266 = sst [smem:[#allocation18_spill]] %s9246_s1  ;;  %23 = vst [vmem:[#allocation2] sm:$0x1] %v22_v0 }
   0x3   :  { %24 = vsyncpa [#allocation4], 0 }
   0x4   :  { %25 = vsyncpa [#allocation7], 0 }
   0x5   :  { %26 = vsyncpa [#allocation10], 0 }
   0x6   :  { %27 = vsyncpa [#allocation5], 0  ;;  %s8255_s26 = smov [#allocation6]   ;;  %s8256_s28 = smov [#allocation9]  }
   0x7   :  { %s47_s27 = sshll.u32 %s8255_s26, 4  ;;  %s85_s29 = sshll.u32 %s8256_s28, 4  ;;  %s48_s27 = int_to_ptr.vmem [resolvable:$true] %s47_s27  ;;  %s8373_s29 = int_to_ptr.vmem [resolvable:$true] %s85_s29 }
   0x8   :  { %s8115_s18 = scalar_lea.hbm %s9247_s2, 384 }
   0x9   :  { %p8116_p0 = scmp.ne.s32.totalorder %s9247_s2, %s8115_s18  ;;  %p8119_p1 = scmp.lt.u32.totalorder %s8115_s18, %s9247_s2 }
   0xb   :  { %p8121_p2 = pnand %p8119_p1, %p8116_p0 }
   0xd   :  { %8124 = shalt.err (!%p8121_p2)
}
   0xe   :  { %s8125_s21 = scalar_lea.vmem %s48_s27, 384  ;;  %p8130_p4 = scmp.lt.s32.totalorder %s48_s27, %s48_s27 }
   0xf   :  { %p8126_p3 = scmp.ne.s32.totalorder %s48_s27, %s8125_s21  ;;  %p8131_p5 = scmp.lt.s32.totalorder %s8125_s21, %s8125_s21 }
  0x11   :  { %p8132_p6 = por %p8131_p5, %p8130_p4 }
  0x13   :  { %p8133_p7 = pnand %p8132_p6, %p8126_p3 }
  0x15   :  { %8136 = shalt.err (!%p8133_p7)
}
  0x16   :  { %s8257_s22 = smov 128   ;;  %s8258_s23 = smov 8  }
  0x17   :  { %53 = dma.hbm_to_vmem [thread:$0]  %s9247_s2, 384, %s48_s27, [#allocation7], %s8257_s22, %s8257_s22, %s8258_s23  }
  0x18   :  { %s8137_s0 = scalar_lea.hbm %s9257_s12, 512 }
  0x19   :  { %p8138_p8 = scmp.ne.s32.totalorder %s9257_s12, %s8137_s0  ;;  %p8141_p9 = scmp.lt.u32.totalorder %s8137_s0, %s9257_s12 }
  0x1b   :  { %p8143_p10 = pnand %p8141_p9, %p8138_p8 }
  0x1d   :  { %8146 = shalt.err (!%p8143_p10)
}
  0x1e   :  { %s8147_s4 = scalar_lea.vmem %s8373_s29, 512  ;;  %p8152_p12 = scmp.lt.s32.totalorder %s8373_s29, %s8373_s29 }
  0x1f   :  { %p8148_p11 = scmp.ne.s32.totalorder %s8373_s29, %s8147_s4  ;;  %p8153_p13 = scmp.lt.s32.totalorder %s8147_s4, %s8147_s4 }
  0x21   :  { %p8154_p0 = por %p8153_p13, %p8152_p12 }
  0x23   :  { %p8155_p1 = pnand %p8154_p0, %p8148_p11 }
  0x25   :  { %8158 = shalt.err (!%p8155_p1)
}
  0x26   :  { %91 = dma.hbm_to_vmem [thread:$0]  %s9257_s12, 512, %s8373_s29, [#allocation10], %s8257_s22, %s8257_s22, %s8258_s23  }
  0x27   :  { %s8259_s20 = smov [#allocation3]   ;;  %s8260_s24 = smov [#allocation8]  }
  0x28   :  { %s35_s21 = sshll.u32 %s8259_s20, 4  ;;  %s64_s25 = sshll.u32 %s8260_s24, 4  ;;  %s36_s21 = int_to_ptr.vmem [resolvable:$true] %s35_s21  ;;  %s65_s25 = int_to_ptr.vmem [resolvable:$true] %s64_s25 }
  0x29   :  { %s9267_s0 = sld [smem:[#allocation18_spill]] }
  0x2f   :  { %s8159_s30 = scalar_lea.hbm %s9267_s0, 256 }
  0x30   :  { %p8160_p2 = scmp.ne.s32.totalorder %s9267_s0, %s8159_s30  ;;  %p8163_p3 = scmp.lt.u32.totalorder %s8159_s30, %s9267_s0 }
  0x32   :  { %p8165_p4 = pnand %p8163_p3, %p8160_p2 }
  0x34   :  { %8168 = shalt.err (!%p8165_p4)
}
  0x35   :  { %s8169_s12 = scalar_lea.vmem %s36_s21, 256  ;;  %p8174_p6 = scmp.lt.s32.totalorder %s36_s21, %s36_s21 }
  0x36   :  { %p8170_p5 = scmp.ne.s32.totalorder %s36_s21, %s8169_s12  ;;  %p8175_p7 = scmp.lt.s32.totalorder %s8169_s12, %s8169_s12 }
  0x38   :  { %p8176_p8 = por %p8175_p7, %p8174_p6 }
  0x3a   :  { %p8177_p9 = pnand %p8176_p8, %p8170_p5 }
  0x3c   :  { %8180 = shalt.err (!%p8177_p9)
}
  0x3d   :  { %41 = dma.hbm_to_vmem [thread:$0]  %s9267_s0, 256, %s36_s21, [#allocation4], %s8257_s22, %s8257_s22, %s8258_s23  }
  0x3e   :  { %s8181_s24 = scalar_lea.hbm %s9250_s5, 16 }
  0x3f   :  { %p8182_p10 = scmp.ne.s32.totalorder %s9250_s5, %s8181_s24  ;;  %p8185_p11 = scmp.lt.u32.totalorder %s8181_s24, %s9250_s5 }
  0x41   :  { %p8187_p12 = pnand %p8185_p11, %p8182_p10 }
  0x43   :  { %8190 = shalt.err (!%p8187_p12)
}
  0x44   :  { %s8191_s19 = scalar_lea.vmem %s65_s25, 16  ;;  %s8195_s1 = scalar_lea.vmem %s65_s25, 32 }
  0x45   :  { %p8192_p13 = scmp.ne.s32.totalorder %s65_s25, %s8191_s19  ;;  %p8196_p0 = scmp.lt.s32.totalorder %s65_s25, %s65_s25 }
  0x46   :  { %p8197_p1 = scmp.lt.s32.totalorder %s8195_s1, %s8191_s19 }
  0x48   :  { %p8198_p2 = por %p8197_p1, %p8196_p0 }
  0x4a   :  { %p8199_p3 = pnand %p8198_p2, %p8192_p13 }
  0x4c   :  { %8202 = shalt.err (!%p8199_p3)
}
  0x4d   :  { %67 = dma.hbm_to_vmem [thread:$0]  %s9250_s5, 16, %s65_s25, [#allocation7]  }
  0x4e   :  { %s8261_s4 = smov [#allocation11]   ;;  %s8203_s27 = scalar_lea.hbm %s9259_s14, 512 }
  0x4f   :  { %s99_s12 = sshll.u32 %s8261_s4, 4  ;;  %p8204_p4 = scmp.ne.s32.totalorder %s9259_s14, %s8203_s27  ;;  %s100_s12 = int_to_ptr.vmem [resolvable:$true] %s99_s12 }
  0x50   :  { %p8207_p5 = scmp.lt.u32.totalorder %s8203_s27, %s9259_s14 }
  0x52   :  { %p8209_p6 = pnand %p8207_p5, %p8204_p4 }
  0x54   :  { %8212 = shalt.err (!%p8209_p6)
}
  0x55   :  { %s8213_s30 = scalar_lea.vmem %s100_s12, 512  ;;  %p8218_p8 = scmp.lt.s32.totalorder %s100_s12, %s100_s12 }
  0x56   :  { %p8214_p7 = scmp.ne.s32.totalorder %s100_s12, %s8213_s30  ;;  %p8219_p9 = scmp.lt.s32.totalorder %s8213_s30, %s8213_s30 }
  0x58   :  { %p8220_p10 = por %p8219_p9, %p8218_p8 }
  0x5a   :  { %p8221_p11 = pnand %p8220_p10, %p8214_p7 }
  0x5c   :  { %8224 = shalt.err (!%p8221_p11)
}
  0x5d   :  { %105 = dma.hbm_to_vmem [thread:$0]  %s9259_s14, 512, %s100_s12, [#allocation10], %s8257_s22, %s8257_s22, %s8258_s23  }
  0x5e   :  { %8247 = dma.done.wait [#allocation4], 256  }
  0x5f   :  { %8248 = vsyncadd [#allocation4], 4294967040 }
  0x60   :  { %8249 = dma.done.wait [#allocation7], 400  }
  0x61   :  { %8250 = vsyncadd [#allocation7], 4294966896 }
  0x62   :  { %8251 = dma.done.wait [#allocation10], 1024  }
  0x63   :  { %8252 = vsyncadd [#allocation10], 4294966272  ;;  %v8262_v1 = vmov 0   ;;  %s9268_s1 = sld [smem:[#allocation17_spill]]  ;;  %v156_v3 = vld [vmem:[%s9251_s6] sm:$0xff]  ;;  %v157_v4 = vld [vmem:[%s9251_s6 + $0x8] sm:$0xff]  ;;  %v125_v37 = vlaneseq }
  0x64   :  { %7988 = vset.pattern.permute.xlu0 %v8262_v1  ;;  %v7879_v6 = vpack.c.bf16 %v157_v4, %v156_v3  ;;  %v158_v7 = vld [vmem:[%s9251_s6 + $0x10] sm:$0xff]  ;;  %v159_v8 = vld [vmem:[%s9251_s6 + $0x18] sm:$0xff]  ;;  %s8263_s20 = smov 32   ;;  %v7063_v11 = vld [vmem:[#allocation8] ss:$0 sm:$0xff]  ;;  %vm160_vm0 = vcmask 261120  }
  0x65   :  { %v7883_v9 = vpack.c.bf16 %v159_v8, %v158_v7  ;;  %v7067_v10 = vld [vmem:[#allocation6 + $0x1] ss:$0 sm:$0xff]  ;;  %v152_v12 = vld [vmem:[#allocation3] sm:$0xff]  ;;  %v153_v16 = vld [vmem:[#allocation3 + $0x8] sm:$0xff]  ;;  %v8264_v20 = vmov 0.0   ;;  %vm8265_vm1 = vmmov 0  }
  0x66   :  { %7880 = vmatprep.subr.bf16.mxu0 %v7879_v6  ;;  %255 = vrot.lane.b32.xlu1 %v7067_v10, %s8263_s20  ;;  %v7066_v21 = vld [vmem:[#allocation6] ss:$0 sm:$0xff]  ;;  %s8266_s6 = smov 88   ;;  %s8267_s24 = smov 96   ;;  %v7068_v29 = vld [vmem:[#allocation6 + $0x2] ss:$0 sm:$0xff]  ;;  %vm7961_vm5 = vmpackc.low %vm160_vm0, %vm160_vm0 }
  0x67   :  { %7882 = vmatpush3.bf16.msra.mxu0 %v7879_v6  ;;  %7419 = vmatprep.subr.mxu1 %v8264_v20  ;;  %s8268_s26 = smov 80   ;;  %s8269_s28 = smov 120   ;;  %vm275_vm2 = vcmask 64512   ;;  %v8525_v38 = vshrl.u32 %v125_v37, 7  ;;  %v128_v39 = vand.u32 127, %v125_v37  ;;  %vm2355_vm4 = vcmask 523264  }
  0x68   :  { %7884 = vmatprep.subr.bf16.mxu0 %v7883_v9  ;;  %7421 = vmatprep.mubr.msk.f32.mxu1 %vm8265_vm1, %v8264_v20  ;;  %s8270_s30 = smov 72   ;;  %s8271_s5 = smov 112   ;;  %v8274_v42 = vmov -1e+09   ;;  %vm7044_vm6 = vcmask 122880  }
  0x69   :  { %v131_v2 = vld [vmem:[%s9268_s1] sm:$0xff]  ;;  %v132_v5 = vld [vmem:[%s9268_s1 + $0x8] sm:$0xff]  ;;  %s8272_s25 = smov 104   ;;  %s8273_s18 = smov 64   ;;  %vm129_vm3 = vcmp.ge.s32.totalorder %v8525_v38, %v128_v39 }
  0x6a   :  { %136 = vperm.xlu0 %7988, %v131_v2   ;;  %v8528_v43 = vsel %vm129_vm3, 0.0, %v8274_v42  ;;  %s8275_s19 = smov 56   ;;  %s8276_s1 = smov 48  }
  0x6b   :  { %7886 = vmatpush3.bf16.msra.mxu0 %v7883_v9  ;;  %s8277_s21 = smov 40  }
  0x6c   :  { %7429 = vmatprep.subr.mxu0 %v8264_v20 }
  0x6e   :  { %141 = vperm.xlu0 %7988, %v132_v5  }
  0xd8   :  { %v8485_v22 = vpop.permute.xlu1 %255 }
  0xe9   :  { %v137_v13 = vpop.permute.xlu0 %136 }
  0xea   :  { %v150_v14 = vmul.f32 %v7063_v11, %v137_v13 }
  0xec   :  { %v8471_v15 = vadd.f32 %v152_v12, %v150_v14 }
  0xed   :  { %v142_v17 = vpop.permute.xlu0 %141 }
  0xee   :  { %v151_v18 = vmul.f32 %v7063_v11, %v142_v17  ;;  %7416 = vmatprep.mubr.msk.f32.mxu0 %vm160_vm0, %v8471_v15 }
  0xf0   :  { %v8475_v19 = vadd.f32 %v153_v16, %v151_v18 }
  0xf2   :  { %7417 = vmatmul.mubr.msk.f32.vlgmr.msra.gmra.mrb[0].mxu0 %vm160_vm0, %v8475_v19 }
  0xf3   :  { %7431 = vmatprep.mubr.msk.f32.mxu0 %vm8265_vm1, %v8264_v20 }
 0x1c5   :  { %v8487_v23 = vpop.f32.mrb[0].mxu0 }
 0x1c6   :  { %v8490_v24 = vadd.f32 %v8487_v23, %v7066_v21  ;;  %v8492_v25 = vpop.f32.mrb[1].mxu0  ;;  %v259_v16 = vadd.f32 %v8487_v23, %v8485_v22 }
 0x1c7   :  { %v247_v26 = vadd.f32 %v7066_v21, %v8492_v25  ;;  %v258_v27 = vadd.f32 %v8485_v22, %v8492_v25 }
 0x1c9   :  { %353 = vrot.lane.b32.xlu0 %v258_v27, %s8266_s6  ;;  %273 = vrot.lane.b32.xlu1 %v258_v27, %s8267_s24  ;;  %v271_v28 = vmul.f32 0.35355338, %v247_v26 }
 0x1cd   :  { %431 = vrot.lane.b32.xlu0 %v258_v27, %s8268_s26  ;;  %351 = vrot.lane.b32.xlu1 %v271_v28, %s8269_s28 }
 0x1d1   :  { %509 = vrot.lane.b32.xlu0 %v258_v27, %s8270_s30  ;;  %429 = vrot.lane.b32.xlu1 %v271_v28, %s8271_s5  ;;  %v1236_v27 = vmul.f32 0.35355338, %v8490_v24 }
 0x1d5   :  { %507 = vrot.lane.b32.xlu1 %v271_v28, %s8272_s25 }
 0x1d9   :  { %266 = vrot.lane.b32.xlu1 %v7068_v29, %s8273_s18 }
 0x23b   :  { %v354_v30 = vpop.permute.xlu0 %353  ;;  %v274_v31 = vpop.permute.xlu1 %273 }
 0x23c   :  { %7420 = vmatpush3.xpose.msk.msra.mxu1 %vm275_vm2, %v274_v31 }
 0x23d   :  { %7424 = vmatprep.subr.mxu1 %v8264_v20 }
 0x23f   :  { %v432_v32 = vpop.permute.xlu0 %431  ;;  %v352_v33 = vpop.permute.xlu1 %351  ;;  %7422 = vmatmul.mubr.msk.f32.vlgmr.msra.gmra.mrb[0].mxu1 %vm275_vm2, %v271_v28 }
 0x240   :  { %7425 = vmatpush3.xpose.msk.msra.mxu1 %vm275_vm2, %v354_v30  ;;  %7430 = vmatpush3.xpose.msk.msra.mxu0 %vm275_vm2, %v432_v32  ;;  %v8568_v30 = vld [vmem:[%s9252_s7 + $0x8] sm:$0xff] }
 0x241   :  { %7426 = vmatprep.mubr.msk.f32.mxu1 %vm8265_vm1, %v8264_v20  ;;  %7434 = vmatprep.subr.mxu1 %v8264_v20 }
 0x242   :  { %7439 = vmatprep.subr.mxu0 %v8264_v20 }
 0x243   :  { %v510_v34 = vpop.permute.xlu0 %509  ;;  %v430_v35 = vpop.permute.xlu1 %429  ;;  %7427 = vmatmul.mubr.msk.f32.vlgmr.msra.gmra.mrb[2].mxu1 %vm275_vm2, %v352_v33 }
 0x244   :  { %7432 = vmatmul.mubr.msk.f32.vlgmr.msra.gmra.mrb[2].mxu0 %vm275_vm2, %v430_v35  ;;  %7435 = vmatpush3.xpose.msk.msra.mxu1 %vm275_vm2, %v510_v34 }
 0x245   :  { %7436 = vmatprep.mubr.msk.f32.mxu1 %vm8265_vm1, %v8264_v20  ;;  %7444 = vmatprep.subr.mxu1 %v8264_v20 }
 0x246   :  { %7441 = vmatprep.mubr.msk.f32.mxu0 %vm8265_vm1, %v8264_v20 }
 0x247   :  { %v508_v36 = vpop.permute.xlu1 %507 }
 0x248   :  { %7437 = vmatmul.mubr.msk.f32.vlgmr.msra.gmra.mrb[4].mxu1 %vm275_vm2, %v508_v36 }
 0x249   :  { %7446 = vmatprep.mubr.msk.f32.mxu1 %vm8265_vm1, %v8264_v20 }
 0x24b   :  { %v8532_v52 = vpop.permute.xlu1 %266 }
 0x24c   :  { %v269_v53 = vadd.f32 %v8532_v52, %v8492_v25 }
 0x312   :  { %v347_v40 = vpop.f32.mrb[0].mxu1 }
 0x313   :  { %v7423_v41 = vpop.f32.mrb[1].mxu1  ;;  %v585_v59 = vadd.f32 %v347_v40, %v8528_v43 }
 0x315   :  { %v589_v62 = vsel %vm275_vm2, %v585_v59, -inf }
 0x316   :  { %v425_v44 = vpop.f32.mrb[2].mxu1 }
 0x317   :  { %v586_v45 = vadd.f32 %v425_v44, %v8528_v43  ;;  %v7428_v46 = vpop.f32.mrb[3].mxu1  ;;  %v503_v47 = vpop.f32.mrb[2].mxu0 }
 0x318   :  { %v7433_v48 = vpop.f32.mrb[3].mxu0  ;;  %v587_v61 = vadd.f32 %v503_v47, %v8528_v43  ;;  %v8599_v47 = vld [vmem:[%s9252_s7] sm:$0xff] }
 0x319   :  { %v592_v49 = vsel %vm275_vm2, %v586_v45, -inf  ;;  %v8606_v48 = vld [vmem:[%s9252_s7 + $0x10] sm:$0xff] }
 0x31a   :  { %593 = vmax.xlane.f32.xlu0 %v592_v49  ;;  %v595_v0 = vsel %vm275_vm2, %v587_v61, -inf }
 0x31b   :  { %v581_v50 = vpop.f32.mrb[4].mxu1 }
 0x31c   :  { %v7438_v51 = vpop.f32.mrb[5].mxu1  ;;  %v588_v63 = vadd.f32 %v581_v50, %v8528_v43 }
 0x31e   :  { %v598_v1 = vsel %vm275_vm2, %v588_v63, -inf }
 0x330   :  { %711 = vrot.lane.b32.xlu0 %v269_v53, %s8275_s19 }
 0x3a7   :  { %v594_v54 = vpop.xlane.xlu0 %593 }
 0x3a8   :  { %v602_v55 = vsub.f32 %v586_v45, %v594_v54  ;;  %v8616_v54 = vld [vmem:[%s9252_s7 + $0x18] sm:$0xff] }
 0x3aa   :  { %v607_v56 = vmul.f32 1.442695, %v602_v55 }
 0x3ab   :  { %v712_v57 = vpop.permute.xlu0 %711 }
 0x3ac   :  { %7999 = vpow2.f32 %v607_v56  ;;  %7445 = vmatpush3.msra.mxu1 %v712_v57 }
 0x3ad   :  { %7454 = vmatprep.subr.mxu1 %v8264_v20 }
 0x3b6   :  { %v8000_v58 = vpop.eup %7999 }
 0x3b7   :  { %v616_v60 = vsel %vm275_vm2, %v8000_v58, 0.0 }
 0x3b8   :  { %617 = vadd.xlane.f32.xlu1 %v616_v60 }
 0x3bc   :  { %590 = vmax.xlane.f32.xlu1 %v589_v62 }
 0x3c0   :  { %596 = vmax.xlane.f32.xlu1 %v595_v0 }
 0x3c4   :  { %599 = vmax.xlane.f32.xlu1 %v598_v1 }
 0x445   :  { %v618_v2 = vpop.xlane.xlu1 %617 }
 0x446   :  { %8001 = vrcp.f32 %v618_v2 }
 0x449   :  { %v591_v3 = vpop.xlane.xlu1 %590 }
 0x44a   :  { %v601_v4 = vsub.f32 %v585_v59, %v591_v3 }
 0x44c   :  { %v605_v5 = vmul.f32 1.442695, %v601_v4 }
 0x44d   :  { %v597_v6 = vpop.xlane.xlu1 %596 }
 0x44e   :  { %8003 = vpow2.f32 %v605_v5  ;;  %v603_v7 = vsub.f32 %v587_v61, %v597_v6 }
 0x450   :  { %v8002_v8 = vpop.eup %8001  ;;  %v609_v9 = vmul.f32 1.442695, %v603_v7 }
 0x451   :  { %v630_v10 = vmul.f32 %v8002_v8, %v8000_v58  ;;  %v600_v17 = vpop.xlane.xlu1 %599 }
 0x452   :  { %8005 = vpow2.f32 %v609_v9  ;;  %v604_v18 = vsub.f32 %v588_v63, %v600_v17 }
 0x453   :  { %7447 = vmatmul.mubr.msk.f32.vlgmr.msra.gmra.mrb[6].mxu1 %vm275_vm2, %v630_v10 }
 0x454   :  { %7456 = vmatprep.mubr.msk.f32.mxu1 %vm8265_vm1, %v8264_v20  ;;  %v611_v21 = vmul.f32 1.442695, %v604_v18  ;;  %7455 = vmatpush3.msra.mxu1 %v8599_v47  ;;  %v270_v18 = vadd.f32 %v8487_v23, %v8532_v52 }
 0x455   :  { %7464 = vmatprep.subr.mxu1 %v8264_v20 }
 0x456   :  { %8007 = vpow2.f32 %v611_v21 }
 0x458   :  { %v8004_v11 = vpop.eup %8003 }
 0x459   :  { %v613_v12 = vsel %vm275_vm2, %v8004_v11, 0.0 }
 0x45a   :  { %614 = vadd.xlane.f32.xlu1 %v613_v12 }
 0x45c   :  { %v8006_v13 = vpop.eup %8005 }
 0x45d   :  { %v619_v14 = vsel %vm275_vm2, %v8006_v13, 0.0 }
 0x45e   :  { %620 = vadd.xlane.f32.xlu0 %v619_v14 }
 0x460   :  { %v8008_v25 = vpop.eup %8007 }
 0x461   :  { %v622_v26 = vsel %vm275_vm2, %v8008_v25, 0.0 }
 0x46b   :  { %634 = vrot.lane.b32.xlu1 %v269_v53, %s8273_s18 }
 0x46f   :  { %934 = vrot.lane.b32.xlu1 %v269_v53, %s8276_s1 }
 0x474   :  { %1317 = vrot.lane.b32.xlu0 %v259_v16, %s8266_s6 }
 0x493   :  { %623 = vadd.xlane.f32.xlu1 %v622_v26 }
 0x4a4   :  { %1085 = vrot.lane.b32.xlu1 %v269_v53, %s8277_s21 }
 0x4a8   :  { %1315 = vrot.lane.b32.xlu1 %v1236_v27, %s8269_s28 }
 0x4ac   :  { %1238 = vrot.lane.b32.xlu1 %v259_v16, %s8267_s24 }
 0x4b0   :  { %1395 = vrot.lane.b32.xlu1 %v259_v16, %s8268_s26 }
 0x4b4   :  { %1393 = vrot.lane.b32.xlu1 %v1236_v27, %s8271_s5 }
 0x4b8   :  { %1473 = vrot.lane.b32.xlu1 %v259_v16, %s8270_s30 }
 0x4bc   :  { %1471 = vrot.lane.b32.xlu1 %v1236_v27, %s8272_s25 }
 0x4e7   :  { %v615_v22 = vpop.xlane.xlu1 %614 }
 0x4e8   :  { %8009 = vrcp.f32 %v615_v22 }
 0x4eb   :  { %v635_v28 = vpop.permute.xlu1 %634  ;;  %v621_v31 = vpop.xlane.xlu0 %620 }
 0x4ec   :  { %7440 = vmatpush3.msra.mxu0 %v635_v28  ;;  %8011 = vrcp.f32 %v621_v31 }
 0x4ed   :  { %7449 = vmatprep.subr.mxu0 %v8264_v20 }
 0x4ef   :  { %v935_v32 = vpop.permute.xlu1 %934  ;;  %v1318_v59 = vpop.permute.xlu0 %1317 }
 0x4f2   :  { %v8010_v29 = vpop.eup %8009 }
 0x4f3   :  { %v629_v24 = vmul.f32 %v8010_v29, %v8004_v11 }
 0x4f5   :  { %7442 = vmatmul.mubr.msk.f32.vlgmr.msra.gmra.mrb[4].mxu0 %vm275_vm2, %v629_v24 }
 0x4f6   :  { %7450 = vmatpush3.msra.mxu0 %v8568_v30  ;;  %7451 = vmatprep.mubr.msk.f32.mxu0 %vm8265_vm1, %v8264_v20  ;;  %v8012_v35 = vpop.eup %8011 }
 0x4f7   :  { %7459 = vmatprep.subr.mxu0 %v8264_v20  ;;  %v631_v40 = vmul.f32 %v8012_v35, %v8006_v13 }
 0x520   :  { %v624_v33 = vpop.xlane.xlu1 %623 }
 0x521   :  { %8013 = vrcp.f32 %v624_v33 }
 0x524   :  { %v1086_v34 = vpop.permute.xlu1 %1085 }
 0x526   :  { %v783_v36 = vpop.f32.mrb[6].mxu1 }
 0x527   :  { %v7448_v37 = vpop.f32.mrb[7].mxu1  ;;  %7452 = vmatmul.mubr.msk.f32.vlgmr.msra.gmra.mrb[6].mxu0 %vm275_vm2, %v783_v36 }
 0x528   :  { %7460 = vmatpush3.msra.mxu0 %v935_v32  ;;  %v1316_v39 = vpop.permute.xlu1 %1315  ;;  %7461 = vmatprep.mubr.msk.f32.mxu0 %vm8265_vm1, %v8264_v20 }
 0x529   :  { %7469 = vmatprep.subr.mxu0 %v8264_v20 }
 0x52b   :  { %v8014_v41 = vpop.eup %8013  ;;  %7462 = vmatmul.mubr.msk.f32.vlgmr.msra.gmra.mrb[8].mxu0 %vm275_vm2, %v631_v40 }
 0x52c   :  { %7470 = vmatpush3.msra.mxu0 %v1086_v34  ;;  %7471 = vmatprep.mubr.msk.f32.mxu0 %vm8265_vm1, %v8264_v20  ;;  %v632_v42 = vmul.f32 %v8014_v41, %v8008_v25  ;;  %v1239_v44 = vpop.permute.xlu1 %1238 }
 0x52d   :  { %7479 = vmatprep.subr.mxu0 %v8264_v20 }
 0x52f   :  { %7472 = vmatmul.mubr.msk.f32.vlgmr.msra.gmra.mrb[10].mxu0 %vm275_vm2, %v632_v42 }
 0x530   :  { %7481 = vmatprep.mubr.msk.f32.mxu0 %vm8265_vm1, %v8264_v20  ;;  %v1396_v45 = vpop.permute.xlu1 %1395 }
 0x533   :  { %7480 = vmatpush3.xpose.msk.msra.mxu0 %vm275_vm2, %v1239_v44 }
 0x534   :  { %7489 = vmatprep.subr.mxu0 %v8264_v20  ;;  %v1394_v46 = vpop.permute.xlu1 %1393 }
 0x536   :  { %7482 = vmatmul.mubr.msk.f32.vlgmr.msra.gmra.mrb[12].mxu0 %vm275_vm2, %v1236_v27 }
 0x537   :  { %7490 = vmatpush3.xpose.msk.msra.mxu0 %vm275_vm2, %v1396_v45  ;;  %7491 = vmatprep.mubr.msk.f32.mxu0 %vm8265_vm1, %v8264_v20 }
 0x538   :  { %7499 = vmatprep.subr.mxu0 %v8264_v20  ;;  %v1474_v60 = vpop.permute.xlu1 %1473 }
 0x53a   :  { %7492 = vmatmul.mubr.msk.f32.vlgmr.msra.gmra.mrb[14].mxu0 %vm275_vm2, %v1394_v46 }
 0x53b   :  { %7501 = vmatprep.mubr.msk.f32.mxu0 %vm8265_vm1, %v8264_v20 }
 0x53c   :  { %v1472_v63 = vpop.permute.xlu1 %1471 }
 0x5c8   :  { %v706_v49 = vpop.f32.mrb[4].mxu0 }
 0x5c9   :  { %v7443_v50 = vpop.f32.mrb[5].mxu0  ;;  %7457 = vmatmul.mubr.msk.f32.vlgmr.msra.gmra.mrb[8].mxu1 %vm275_vm2, %v706_v49 }
 0x5ca   :  { %7465 = vmatpush3.msra.mxu1 %v8606_v48  ;;  %7466 = vmatprep.mubr.msk.f32.mxu1 %vm8265_vm1, %v8264_v20 }
 0x5cb   :  { %7474 = vmatprep.subr.mxu1 %v8264_v20 }
 0x5fa   :  { %v857_v51 = vpop.f32.mrb[6].mxu0 }
 0x5fb   :  { %v7453_v53 = vpop.f32.mrb[7].mxu0 }
 0x5fe   :  { %v1006_v55 = vpop.f32.mrb[8].mxu0 }
 0x5ff   :  { %v7463_v56 = vpop.f32.mrb[9].mxu0  ;;  %7467 = vmatmul.mubr.msk.f32.vlgmr.msra.gmra.mrb[10].mxu1 %vm275_vm2, %v1006_v55 }
 0x600   :  { %7475 = vmatpush3.msra.mxu1 %v8616_v54  ;;  %7476 = vmatprep.mubr.msk.f32.mxu1 %vm8265_vm1, %v8264_v20 }
 0x601   :  { %7484 = vmatprep.subr.mxu1 %v8264_v20 }
 0x602   :  { %v1157_v57 = vpop.f32.mrb[10].mxu0 }
 0x603   :  { %v7473_v58 = vpop.f32.mrb[11].mxu0  ;;  %7477 = vmatmul.mubr.msk.f32.vlgmr.msra.gmra.mrb[12].mxu1 %vm275_vm2, %v1157_v57 }
 0x604   :  { %7486 = vmatprep.mubr.msk.f32.mxu1 %vm8265_vm1, %v8264_v20 }
 0x607   :  { %7485 = vmatpush3.xpose.msk.msra.mxu1 %vm275_vm2, %v1318_v59 }
 0x608   :  { %7494 = vmatprep.subr.mxu1 %v8264_v20 }
 0x609   :  { %v1311_v61 = vpop.f32.mrb[12].mxu0 }
 0x60a   :  { %v7483_v62 = vpop.f32.mrb[13].mxu0  ;;  %7487 = vmatmul.mubr.msk.f32.vlgmr.msra.gmra.mrb[14].mxu1 %vm275_vm2, %v1316_v39  ;;  %v1549_v28 = vadd.f32 %v1311_v61, %v8528_v43 }
 0x60b   :  { %7495 = vmatpush3.xpose.msk.msra.mxu1 %vm275_vm2, %v1474_v60  ;;  %7496 = vmatprep.mubr.msk.f32.mxu1 %vm8265_vm1, %v8264_v20 }
 0x60c   :  { %7504 = vmatprep.subr.mxu1 %v8264_v20  ;;  %v1553_v23 = vsel %vm275_vm2, %v1549_v28, -inf }
 0x60d   :  { %v1467_v0 = vpop.f32.mrb[14].mxu0 }
 0x60e   :  { %v7493_v1 = vpop.f32.mrb[15].mxu0  ;;  %7497 = vmatmul.mubr.msk.f32.vlgmr.msra.gmra.mrb[16].mxu1 %vm275_vm2, %v1472_v63  ;;  %v1551_v24 = vadd.f32 %v1467_v0, %v8528_v43 }
 0x60f   :  { %7506 = vmatprep.mubr.msk.f32.mxu1 %vm8265_vm1, %v8264_v20 }
 0x610   :  { %v1559_v31 = vsel %vm275_vm2, %v1551_v24, -inf }
 0x69c   :  { %v930_v2 = vpop.f32.mrb[8].mxu1 }
 0x69d   :  { %v931_v3 = vadd.f32 %v930_v2, %v857_v51  ;;  %v7458_v4 = vpop.f32.mrb[9].mxu1 }
 0x6d2   :  { %v1080_v5 = vpop.f32.mrb[10].mxu1 }
 0x6d3   :  { %v1084_v6 = vadd.f32 %v1080_v5, %v931_v3  ;;  %v7468_v7 = vpop.f32.mrb[11].mxu1 }
 0x6d6   :  { %v1231_v8 = vpop.f32.mrb[12].mxu1 }
 0x6d7   :  { %v1235_v9 = vadd.f32 %v1231_v8, %v1084_v6  ;;  %v7478_v10 = vpop.f32.mrb[13].mxu1 }
 0x6dd   :  { %v1389_v11 = vpop.f32.mrb[14].mxu1 }
 0x6de   :  { %v1550_v12 = vadd.f32 %v1389_v11, %v8528_v43  ;;  %v7488_v13 = vpop.f32.mrb[15].mxu1 }
 0x6e0   :  { %v1556_v14 = vsel %vm275_vm2, %v1550_v12, -inf }
 0x6e1   :  { %1557 = vmax.xlane.f32.xlu0 %v1556_v14  ;;  %v1545_v16 = vpop.f32.mrb[16].mxu1 }
 0x6e2   :  { %v7498_v17 = vpop.f32.mrb[17].mxu1  ;;  %v1552_v52 = vadd.f32 %v1545_v16, %v8528_v43  ;;  %v8654_v43 = vld [vmem:[#allocation6 + $0x3] ss:$0 sm:$0xff] }
 0x6e3   :  { %v2205_v45 = vadd.f32 %v8654_v43, %v1235_v9 }
 0x6e4   :  { %v1562_v32 = vsel %vm275_vm2, %v1552_v52, -inf }
 0x6e5   :  { %v2207_v51 = vadd.f32 %v2205_v45, %v8471_v15 }
 0x6f7   :  { %1675 = vrot.lane.b32.xlu0 %v270_v18, %s8275_s19 }
 0x76e   :  { %v1558_v21 = vpop.xlane.xlu0 %1557 }
 0x76f   :  { %v1566_v25 = vsub.f32 %v1550_v12, %v1558_v21 }
 0x771   :  { %v1571_v26 = vmul.f32 1.442695, %v1566_v25  ;;  %v8682_v25 = vld [vmem:[#allocation6 + $0x5] ss:$0 sm:$0xff] }
 0x772   :  { %v1676_v27 = vpop.permute.xlu0 %1675 }
 0x773   :  { %8015 = vpow2.f32 %v1571_v26  ;;  %7505 = vmatpush3.msra.mxu1 %v1676_v27 }
 0x774   :  { %7514 = vmatprep.subr.mxu1 %v8264_v20 }
 0x77d   :  { %v8016_v22 = vpop.eup %8015 }
 0x77e   :  { %v1580_v29 = vsel %vm275_vm2, %v8016_v22, 0.0 }
 0x77f   :  { %1581 = vadd.xlane.f32.xlu1 %v1580_v29 }
 0x783   :  { %1554 = vmax.xlane.f32.xlu1 %v1553_v23 }
 0x787   :  { %1560 = vmax.xlane.f32.xlu1 %v1559_v31 }
 0x78b   :  { %1563 = vmax.xlane.f32.xlu1 %v1562_v32 }
 0x80c   :  { %v1582_v33 = vpop.xlane.xlu1 %1581 }
 0x80d   :  { %8017 = vrcp.f32 %v1582_v33 }
 0x810   :  { %v1555_v34 = vpop.xlane.xlu1 %1554 }
 0x811   :  { %v1565_v35 = vsub.f32 %v1549_v28, %v1555_v34 }
 0x813   :  { %v1569_v36 = vmul.f32 1.442695, %v1565_v35 }
 0x814   :  { %v1561_v37 = vpop.xlane.xlu1 %1560 }
 0x815   :  { %8019 = vpow2.f32 %v1569_v36  ;;  %v1567_v39 = vsub.f32 %v1551_v24, %v1561_v37 }
 0x817   :  { %v8018_v40 = vpop.eup %8017  ;;  %v1573_v41 = vmul.f32 1.442695, %v1567_v39 }
 0x818   :  { %v1594_v42 = vmul.f32 %v8018_v40, %v8016_v22  ;;  %v1564_v53 = vpop.xlane.xlu1 %1563 }
 0x819   :  { %8021 = vpow2.f32 %v1573_v41  ;;  %v1568_v55 = vsub.f32 %v1552_v52, %v1564_v53 }
 0x81a   :  { %7507 = vmatmul.mubr.msk.f32.vlgmr.msra.gmra.mrb[18].mxu1 %vm275_vm2, %v1594_v42 }
 0x81b   :  { %7515 = vmatpush3.msra.mxu1 %v8599_v47  ;;  %7516 = vmatprep.mubr.msk.f32.mxu1 %vm8265_vm1, %v8264_v20  ;;  %v2209_v47 = vsel %vm160_vm0, %v2207_v51, 0.0  ;;  %v1575_v56 = vmul.f32 1.442695, %v1568_v55  ;;  %v2252_v55 = vld [vmem:[%s9253_s8 + $0x10] sm:$0xff] }
 0x81c   :  { %7524 = vmatprep.subr.mxu1 %v8264_v20 }
 0x81d   :  { %8023 = vpow2.f32 %v1575_v56  ;;  %v2253_v56 = vld [vmem:[%s9253_s8 + $0x18] sm:$0xff] }
 0x81f   :  { %v8020_v44 = vpop.eup %8019 }
 0x820   :  { %v1577_v46 = vsel %vm275_vm2, %v8020_v44, 0.0 }
 0x821   :  { %1578 = vadd.xlane.f32.xlu1 %v1577_v46 }
 0x823   :  { %v8022_v49 = vpop.eup %8021 }
 0x824   :  { %v1583_v50 = vsel %vm275_vm2, %v8022_v49, 0.0 }
 0x825   :  { %1584 = vadd.xlane.f32.xlu0 %v1583_v50 }
 0x827   :  { %v8024_v57 = vpop.eup %8023 }
 0x828   :  { %v1586_v58 = vsel %vm275_vm2, %v8024_v57, 0.0 }
 0x829   :  { %2210 = vadd.xlane.f32.xlu0 %v2209_v47  ;;  %v2250_v47 = vld [vmem:[%s9253_s8] sm:$0xff] }
 0x832   :  { %1598 = vrot.lane.b32.xlu1 %v270_v18, %s8273_s18 }
 0x836   :  { %1898 = vrot.lane.b32.xlu1 %v270_v18, %s8276_s1 }
 0x85a   :  { %1587 = vadd.xlane.f32.xlu1 %v1586_v58  ;;  %v2342_v58 = vld [vmem:[%s9254_s9] sm:$0xff] }
 0x86b   :  { %2049 = vrot.lane.b32.xlu1 %v270_v18, %s8277_s21  ;;  %v8680_v18 = vld [vmem:[#allocation6 + $0x4] ss:$0 sm:$0xff] }
 0x8ae   :  { %v1579_v59 = vpop.xlane.xlu1 %1578 }
 0x8af   :  { %8025 = vrcp.f32 %v1579_v59  ;;  %v2343_v59 = vld [vmem:[%s9254_s9 + $0x8] sm:$0xff] }
 0x8b2   :  { %v1585_v60 = vpop.xlane.xlu0 %1584  ;;  %v1599_v61 = vpop.permute.xlu1 %1598 }
 0x8b3   :  { %7500 = vmatpush3.msra.mxu0 %v1599_v61  ;;  %8027 = vrcp.f32 %v1585_v60  ;;  %v2344_v60 = vld [vmem:[%s9254_s9 + $0x10] sm:$0xff]  ;;  %v7895_v61 = vpack.c.bf16 %v2343_v59, %v2342_v58  ;;  %v7111_v59 = vld [vmem:[#allocation6 + $0x8] ss:$0 sm:$0xff] }
 0x8b4   :  { %7509 = vmatprep.subr.mxu0 %v8264_v20 }
 0x8b6   :  { %v2211_v62 = vpop.xlane.xlu0 %2210  ;;  %v1899_v5 = vpop.permute.xlu1 %1898 }
 0x8b7   :  { %v2216_v63 = vmul.f32 0.03125, %v2211_v62  ;;  %v2345_v62 = vld [vmem:[%s9254_s9 + $0x18] sm:$0xff] }
 0x8b9   :  { %v8026_v0 = vpop.eup %8025  ;;  %v2218_v1 = vsub.f32 %v2207_v51, %v2216_v63  ;;  %v7899_v63 = vpack.c.bf16 %v2345_v62, %v2344_v60 }
 0x8ba   :  { %v1593_v2 = vmul.f32 %v8026_v0, %v8020_v44  ;;  %v2346_v0 = vld [vmem:[%s9254_s9 + $0x20] sm:$0xff] }
 0x8bb   :  { %v2220_v3 = vmul.f32 %v2218_v1, %v2218_v1 }
 0x8bc   :  { %7502 = vmatmul.mubr.msk.f32.vlgmr.msra.gmra.mrb[16].mxu0 %vm275_vm2, %v1593_v2 }
 0x8bd   :  { %v2222_v4 = vsel %vm160_vm0, %v2220_v3, 0.0  ;;  %7510 = vmatpush3.msra.mxu0 %v8568_v30  ;;  %7511 = vmatprep.mubr.msk.f32.mxu0 %vm8265_vm1, %v8264_v20  ;;  %v8028_v7 = vpop.eup %8027 }
 0x8be   :  { %2223 = vadd.xlane.f32.xlu0 %v2222_v4  ;;  %7519 = vmatprep.subr.mxu0 %v8264_v20  ;;  %v1595_v30 = vmul.f32 %v8028_v7, %v8022_v49 }
 0x8e7   :  { %v1588_v6 = vpop.xlane.xlu1 %1587 }
 0x8e8   :  { %8029 = vrcp.f32 %v1588_v6 }
 0x8eb   :  { %v2050_v11 = vpop.permute.xlu1 %2049 }
 0x8ed   :  { %v1747_v8 = vpop.f32.mrb[18].mxu1 }
 0x8ee   :  { %v7508_v9 = vpop.f32.mrb[19].mxu1  ;;  %7512 = vmatmul.mubr.msk.f32.vlgmr.msra.gmra.mrb[18].mxu0 %vm275_vm2, %v1747_v8 }
 0x8ef   :  { %7520 = vmatpush3.msra.mxu0 %v1899_v5  ;;  %7521 = vmatprep.mubr.msk.f32.mxu0 %vm8265_vm1, %v8264_v20 }
 0x8f0   :  { %7529 = vmatprep.subr.mxu0 %v8264_v20 }
 0x8f2   :  { %v8030_v10 = vpop.eup %8029  ;;  %7522 = vmatmul.mubr.msk.f32.vlgmr.msra.gmra.mrb[20].mxu0 %vm275_vm2, %v1595_v30  ;;  %v2348_v30 = vld [vmem:[%s9254_s9 + $0x30] sm:$0xff] }
 0x8f3   :  { %v1596_v12 = vmul.f32 %v8030_v10, %v8024_v57  ;;  %7530 = vmatpush3.msra.mxu0 %v2050_v11  ;;  %7531 = vmatprep.mubr.msk.f32.mxu0 %vm8265_vm1, %v8264_v20  ;;  %v7891_v57 = vpack.c.bf16 %v2253_v56, %v2252_v55  ;;  %v2349_v10 = vld [vmem:[%s9254_s9 + $0x38] sm:$0xff] }
 0x8f4   :  { %v7907_v11 = vpack.c.bf16 %v2349_v10, %v2348_v30  ;;  %v7116_v30 = vld [vmem:[#allocation6 + $0xb] ss:$0 sm:$0xff] }
 0x8f6   :  { %7532 = vmatmul.mubr.msk.f32.vlgmr.msra.gmra.mrb[22].mxu0 %vm275_vm2, %v1596_v12  ;;  %v7104_v12 = vld [vmem:[%s9248_s3] ss:$0 sm:$0xff] }
 0x94b   :  { %v2224_v13 = vpop.xlane.xlu0 %2223 }
 0x94c   :  { %v2228_v14 = vmul.f32 0.03125, %v2224_v13 }
 0x94e   :  { %v2230_v16 = vadd.f32 1e-05, %v2228_v14 }
 0x950   :  { %8031 = vrsqrt.f32 %v2230_v16 }
 0x95a   :  { %v8032_v17 = vpop.eup %8031 }
 0x95b   :  { %v2234_v21 = vmul.f32 %v8032_v17, %v2218_v1  ;;  %v2347_v1 = vld [vmem:[%s9254_s9 + $0x28] sm:$0xff] }
 0x95c   :  { %v7903_v2 = vpack.c.bf16 %v2347_v1, %v2346_v0 }
 0x95d   :  { %v2241_v26 = vmul.f32 %v8680_v18, %v2234_v21 }
 0x95f   :  { %v8686_v27 = vadd.f32 %v8682_v25, %v2241_v26 }
 0x961   :  { %7547 = vmatprep.mubr.msk.f32.mxu0 %vm160_vm0, %v8686_v27 }
 0x98f   :  { %v1670_v22 = vpop.f32.mrb[16].mxu0 }
 0x990   :  { %v7503_v28 = vpop.f32.mrb[17].mxu0  ;;  %7517 = vmatmul.mubr.msk.f32.vlgmr.msra.gmra.mrb[20].mxu1 %vm275_vm2, %v1670_v22 }
 0x991   :  { %7525 = vmatpush3.msra.mxu1 %v8606_v48  ;;  %7526 = vmatprep.mubr.msk.f32.mxu1 %vm8265_vm1, %v8264_v20 }
 0x992   :  { %7534 = vmatprep.subr.mxu1 %v8264_v20 }
 0x9c1   :  { %v1821_v29 = vpop.f32.mrb[18].mxu0 }
 0x9c2   :  { %v7513_v24 = vpop.f32.mrb[19].mxu0 }
 0x9c5   :  { %v1970_v23 = vpop.f32.mrb[20].mxu0 }
 0x9c6   :  { %v7523_v52 = vpop.f32.mrb[21].mxu0  ;;  %7527 = vmatmul.mubr.msk.f32.vlgmr.msra.gmra.mrb[22].mxu1 %vm275_vm2, %v1970_v23 }
 0x9c7   :  { %7535 = vmatpush3.msra.mxu1 %v8616_v54  ;;  %7536 = vmatprep.mubr.msk.f32.mxu1 %vm8265_vm1, %v8264_v20 }
 0x9c8   :  { %7896 = vmatprep.subr.bf16.mxu1 %v7895_v61 }
 0x9c9   :  { %v2121_v31 = vpop.f32.mrb[22].mxu0 }
 0x9ca   :  { %v7533_v32 = vpop.f32.mrb[23].mxu0  ;;  %7537 = vmatmul.mubr.msk.f32.vlgmr.msra.gmra.mrb[24].mxu1 %vm275_vm2, %v2121_v31 }
 0x9cb   :  { %7898 = vmatpush3.bf16.msra.mxu1 %v7895_v61 }
 0x9cc   :  { %7900 = vmatprep.subr.bf16.mxu1 %v7899_v63 }
 0x9cf   :  { %7902 = vmatpush3.bf16.msra.mxu1 %v7899_v63 }
 0x9d0   :  { %7904 = vmatprep.subr.bf16.mxu1 %v7903_v2 }
 0x9d3   :  { %7906 = vmatpush3.bf16.msra.mxu1 %v7903_v2  ;;  %v7114_v2 = vld [vmem:[#allocation6 + $0x9] ss:$0 sm:$0xff] }
 0x9d4   :  { %7908 = vmatprep.subr.bf16.mxu1 %v7907_v11 }
 0x9d7   :  { %7910 = vmatpush3.bf16.msra.mxu1 %v7907_v11 }
 0x9d8   :  { %7585 = vmatprep.subr.mxu1 %v8264_v20 }
 0xa63   :  { %v1894_v48 = vpop.f32.mrb[20].mxu1 }
 0xa64   :  { %v1895_v33 = vadd.f32 %v1894_v48, %v1821_v29  ;;  %v7518_v34 = vpop.f32.mrb[21].mxu1 }
 0xa99   :  { %v2044_v35 = vpop.f32.mrb[22].mxu1 }
 0xa9a   :  { %v2048_v36 = vadd.f32 %v2044_v35, %v1895_v33  ;;  %v7528_v37 = vpop.f32.mrb[23].mxu1 }
 0xa9d   :  { %v2195_v39 = vpop.f32.mrb[24].mxu1 }
 0xa9e   :  { %v2199_v40 = vadd.f32 %v2195_v39, %v2048_v36  ;;  %v7538_v41 = vpop.f32.mrb[25].mxu1 }
 0xa9f   :  { %v2479_v41 = vld [vmem:[%s9255_s10] sm:$0xff] }
 0xaa0   :  { %v2206_v42 = vadd.f32 %v8654_v43, %v2199_v40  ;;  %v2251_v43 = vld [vmem:[%s9253_s8 + $0x8] sm:$0xff]  ;;  %s8279_s8 = smov [#allocation12]  }
 0xaa1   :  { %v7887_v53 = vpack.c.bf16 %v2251_v43, %v2250_v47 }
 0xaa2   :  { %v2208_v54 = vadd.f32 %v2206_v42, %v8475_v19  ;;  %v2480_v42 = vld [vmem:[%s9255_s10 + $0x8] sm:$0xff] }
 0xaa3   :  { %7888 = vmatprep.subr.bf16.mxu0 %v7887_v53 }
 0xaa4   :  { %v2212_v44 = vsel %vm160_vm0, %v2208_v54, 0.0  ;;  %7890 = vmatpush3.bf16.msra.mxu0 %v7887_v53 }
 0xaa5   :  { %2213 = vadd.xlane.f32.xlu1 %v2212_v44  ;;  %7892 = vmatprep.subr.bf16.mxu0 %v7891_v57  ;;  %v2481_v44 = vld [vmem:[%s9255_s10 + $0x10] sm:$0xff] }
 0xaa8   :  { %7894 = vmatpush3.bf16.msra.mxu0 %v7891_v57  ;;  %v7110_v57 = vld [vmem:[#allocation6 + $0x7] ss:$0 sm:$0xff] }
 0xb32   :  { %v2214_v45 = vpop.xlane.xlu1 %2213 }
 0xb33   :  { %v2217_v46 = vmul.f32 0.03125, %v2214_v45  ;;  %v2482_v45 = vld [vmem:[%s9255_s10 + $0x18] sm:$0xff] }
 0xb35   :  { %v2219_v49 = vsub.f32 %v2208_v54, %v2217_v46  ;;  %v7911_v54 = vpack.c.bf16 %v2480_v42, %v2479_v41  ;;  %v7915_v46 = vpack.c.bf16 %v2482_v45, %v2481_v44 }
 0xb37   :  { %v2221_v50 = vmul.f32 %v2219_v49, %v2219_v49  ;;  %7912 = vmatprep.subr.bf16.mxu0 %v7911_v54 }
 0xb39   :  { %v2225_v51 = vsel %vm160_vm0, %v2221_v50, 0.0 }
 0xb3a   :  { %2226 = vadd.xlane.f32.xlu0 %v2225_v51 }
 0xbc7   :  { %v2227_v3 = vpop.xlane.xlu0 %2226 }
 0xbc8   :  { %v2229_v4 = vmul.f32 0.03125, %v2227_v3 }
 0xbca   :  { %v2231_v5 = vadd.f32 1e-05, %v2229_v4 }
 0xbcc   :  { %8033 = vrsqrt.f32 %v2231_v5 }
 0xbd6   :  { %v8034_v6 = vpop.eup %8033 }
 0xbd7   :  { %v2235_v7 = vmul.f32 %v8034_v6, %v2219_v49  ;;  %v7115_v49 = vld [vmem:[#allocation6 + $0xa] ss:$0 sm:$0xff] }
 0xbd9   :  { %v2242_v8 = vmul.f32 %v8680_v18, %v2235_v7 }
 0xbdb   :  { %v2249_v9 = vadd.f32 %v8682_v25, %v2242_v8  ;;  %v7107_v25 = vld [vmem:[#allocation6 + $0x6] ss:$0 sm:$0xff] }
 0xbdd   :  { %7548 = vmatmul.mubr.msk.f32.vlgmr.msra.gmra.mrb[24].mxu0 %vm160_vm0, %v2249_v9 }
 0xbde   :  { %7914 = vmatpush3.bf16.msra.mxu0 %v7911_v54 }
 0xbdf   :  { %7916 = vmatprep.subr.bf16.mxu0 %v7915_v46 }
 0xbe2   :  { %7918 = vmatpush3.bf16.msra.mxu0 %v7915_v46 }
 0xbe3   :  { %7580 = vmatprep.subr.mxu0 %v8264_v20 }
 0xcb0   :  { %v7549_v13 = vpop.f32.mrb[24].mxu0 }
 0xcb1   :  { %v2337_v14 = vadd.f32 %v7549_v13, %v7104_v12  ;;  %v2331_v16 = vpop.f32.mrb[25].mxu0 }
 0xcb2   :  { %v2332_v17 = vadd.f32 %v7104_v12, %v2331_v16 }
 0xcb3   :  { %v2341_v21 = vmax.f32 %v2337_v14, 0.0 }
 0xcb4   :  { %v2340_v18 = vmax.f32 %v2332_v17, 0.0 }
 0xcb6   :  { %7566 = vmatprep.mubr.msk.f32.mxu1 %vm2355_vm4, %v2340_v18 }
 0xcb7   :  { %7567 = vmatmul.mubr.msk.f32.vlgmr.msra.gmra.mrb[26].mxu1 %vm2355_vm4, %v2341_v21 }
 0xcb8   :  { %7587 = vmatprep.mubr.msk.f32.mxu1 %vm8265_vm1, %v8264_v20 }
 0xd8a   :  { %v7568_v26 = vpop.f32.mrb[26].mxu1 }
 0xd8b   :  { %v2428_v22 = vpop.f32.mrb[27].mxu1  ;;  %v2434_v28 = vadd.f32 %v7568_v26, %v7107_v25 }
 0xd8c   :  { %v2429_v29 = vadd.f32 %v7107_v25, %v2428_v22 }
 0xd8d   :  { %v2438_v52 = vadd.f32 %v2434_v28, %v2249_v9 }
 0xd8e   :  { %v2437_v24 = vadd.f32 %v2429_v29, %v8686_v27 }
 0xd8f   :  { %v2442_v31 = vsel %vm160_vm0, %v2438_v52, 0.0 }
 0xd90   :  { %v2439_v23 = vsel %vm160_vm0, %v2437_v24, 0.0 }
 0xd91   :  { %2440 = vadd.xlane.f32.xlu0 %v2439_v23 }
 0xd95   :  { %2443 = vadd.xlane.f32.xlu0 %v2442_v31 }
 0xe1e   :  { %v2441_v32 = vpop.xlane.xlu0 %2440 }
 0xe1f   :  { %v2445_v48 = vmul.f32 0.03125, %v2441_v32 }
 0xe21   :  { %v2447_v33 = vsub.f32 %v2437_v24, %v2445_v48 }
 0xe22   :  { %v2444_v34 = vpop.xlane.xlu0 %2443 }
 0xe23   :  { %v2446_v35 = vmul.f32 0.03125, %v2444_v34  ;;  %v2449_v36 = vmul.f32 %v2447_v33, %v2447_v33 }
 0xe25   :  { %v2448_v37 = vsub.f32 %v2438_v52, %v2446_v35  ;;  %v2451_v39 = vsel %vm160_vm0, %v2449_v36, 0.0 }
 0xe26   :  { %2452 = vadd.xlane.f32.xlu0 %v2451_v39 }
 0xe27   :  { %v2450_v40 = vmul.f32 %v2448_v37, %v2448_v37 }
 0xe29   :  { %v2454_v27 = vsel %vm160_vm0, %v2450_v40, 0.0 }
 0xe2a   :  { %2455 = vadd.xlane.f32.xlu0 %v2454_v27 }
 0xe40   :  { %2577 = vrot.lane.b32.xlu0 %v7115_v49, %s8263_s20 }
 0xeb3   :  { %v2453_v50 = vpop.xlane.xlu0 %2452 }
 0xeb4   :  { %v2457_v51 = vmul.f32 0.03125, %v2453_v50 }
 0xeb6   :  { %v2459_v47 = vadd.f32 1e-05, %v2457_v51 }
 0xeb7   :  { %v2456_v43 = vpop.xlane.xlu0 %2455 }
 0xeb8   :  { %8035 = vrsqrt.f32 %v2459_v47  ;;  %v2458_v53 = vmul.f32 0.03125, %v2456_v43 }
 0xeba   :  { %v2460_v55 = vadd.f32 1e-05, %v2458_v53 }
 0xebb   :  { %v8780_v3 = vpop.permute.xlu0 %2577 }
 0xebc   :  { %8037 = vrsqrt.f32 %v2460_v55 }
 0xec2   :  { %v8036_v56 = vpop.eup %8035 }
 0xec3   :  { %v2463_v58 = vmul.f32 %v8036_v56, %v2447_v33 }
 0xec5   :  { %v2470_v60 = vmul.f32 %v7110_v57, %v2463_v58 }
 0xec6   :  { %v8038_v61 = vpop.eup %8037 }
 0xec7   :  { %v2464_v62 = vmul.f32 %v8038_v61, %v2448_v37  ;;  %v8770_v63 = vadd.f32 %v7111_v59, %v2470_v60 }
 0xec9   :  { %v2471_v0 = vmul.f32 %v7110_v57, %v2464_v62  ;;  %7577 = vmatprep.mubr.msk.f32.mxu0 %vm160_vm0, %v8770_v63 }
 0xecb   :  { %v8774_v1 = vadd.f32 %v7111_v59, %v2471_v0 }
 0xecd   :  { %7578 = vmatmul.mubr.msk.f32.vlgmr.msra.gmra.mrb[26].mxu0 %vm160_vm0, %v8774_v1 }
 0xece   :  { %7582 = vmatprep.mubr.msk.f32.mxu0 %vm8265_vm1, %v8264_v20 }
 0xfa0   :  { %v8782_v4 = vpop.f32.mrb[26].mxu0 }
 0xfa1   :  { %v8785_v5 = vadd.f32 %v8782_v4, %v7114_v2  ;;  %v2555_v6 = vpop.f32.mrb[27].mxu0  ;;  %v2581_v62 = vadd.f32 %v8782_v4, %v8780_v3 }
 0xfa2   :  { %v2569_v7 = vadd.f32 %v7114_v2, %v2555_v6  ;;  %v2580_v8 = vadd.f32 %v8780_v3, %v2555_v6  ;;  %v8849_v3 = vld [vmem:[%s9256_s11 + $0x8] sm:$0xff] }
 0xfa3   :  { %v3553_v61 = vmul.f32 0.35355338, %v8785_v5 }
 0xfa4   :  { %v2593_v9 = vmul.f32 0.35355338, %v2569_v7  ;;  %2674 = vrot.lane.b32.xlu1 %v2580_v8, %s8266_s6 }
 0xfa6   :  { %2672 = vrot.lane.b32.xlu0 %v2593_v9, %s8269_s28 }
 0xfa8   :  { %2595 = vrot.lane.b32.xlu1 %v2580_v8, %s8267_s24 }
 0xfaa   :  { %2752 = vrot.lane.b32.xlu0 %v2580_v8, %s8268_s26 }
 0xfac   :  { %2750 = vrot.lane.b32.xlu1 %v2593_v9, %s8271_s5 }
 0xfae   :  { %2830 = vrot.lane.b32.xlu0 %v2580_v8, %s8270_s30 }
 0xfb0   :  { %2828 = vrot.lane.b32.xlu1 %v2593_v9, %s8272_s25 }
 0xfb4   :  { %2588 = vrot.lane.b32.xlu1 %v7116_v30, %s8273_s18 }
0x1016   :  { %v2675_v10 = vpop.permute.xlu1 %2674 }
0x1017   :  { %7586 = vmatpush3.xpose.msk.msra.mxu1 %vm275_vm2, %v2675_v10 }
0x1018   :  { %v2673_v11 = vpop.permute.xlu0 %2672  ;;  %7595 = vmatprep.subr.mxu1 %v8264_v20 }
0x101a   :  { %v2596_v12 = vpop.permute.xlu1 %2595  ;;  %7588 = vmatmul.mubr.msk.f32.vlgmr.msra.gmra.mrb[28].mxu1 %vm275_vm2, %v2673_v11 }
0x101b   :  { %7581 = vmatpush3.xpose.msk.msra.mxu0 %vm275_vm2, %v2596_v12  ;;  %7597 = vmatprep.mubr.msk.f32.mxu1 %vm8265_vm1, %v8264_v20 }
0x101c   :  { %v2753_v13 = vpop.permute.xlu0 %2752  ;;  %7590 = vmatprep.subr.mxu0 %v8264_v20 }
0x101e   :  { %7583 = vmatmul.mubr.msk.f32.vlgmr.msra.gmra.mrb[28].mxu0 %vm275_vm2, %v2593_v9  ;;  %v2751_v14 = vpop.permute.xlu1 %2750 }
0x101f   :  { %7591 = vmatpush3.xpose.msk.msra.mxu0 %vm275_vm2, %v2753_v13  ;;  %7592 = vmatprep.mubr.msk.f32.mxu0 %vm8265_vm1, %v8264_v20 }
0x1020   :  { %v2831_v16 = vpop.permute.xlu0 %2830  ;;  %7600 = vmatprep.subr.mxu0 %v8264_v20 }
0x1021   :  { %7596 = vmatpush3.xpose.msk.msra.mxu1 %vm275_vm2, %v2831_v16 }
0x1022   :  { %v2829_v17 = vpop.permute.xlu1 %2828  ;;  %7593 = vmatmul.mubr.msk.f32.vlgmr.msra.gmra.mrb[30].mxu0 %vm275_vm2, %v2751_v14  ;;  %7605 = vmatprep.subr.mxu1 %v8264_v20 }
0x1023   :  { %7602 = vmatprep.mubr.msk.f32.mxu0 %vm8265_vm1, %v8264_v20 }
0x1024   :  { %7598 = vmatmul.mubr.msk.f32.vlgmr.msra.gmra.mrb[30].mxu1 %vm275_vm2, %v2829_v17 }
0x1025   :  { %7607 = vmatprep.mubr.msk.f32.mxu1 %vm8265_vm1, %v8264_v20 }
0x1026   :  { %v8817_v52 = vpop.permute.xlu1 %2588 }
0x1027   :  { %v2591_v31 = vadd.f32 %v8817_v52, %v2555_v6 }
0x10ed   :  { %v2746_v18 = vpop.f32.mrb[28].mxu1 }
0x10ee   :  { %v7589_v21 = vpop.f32.mrb[29].mxu1  ;;  %v2909_v25 = vsel %vm275_vm2, %v2746_v18, -inf }
0x10ef   :  { %2910 = vmax.xlane.f32.xlu0 %v2909_v25 }
0x10f1   :  { %v2668_v26 = vpop.f32.mrb[28].mxu0 }
0x10f2   :  { %v7584_v22 = vpop.f32.mrb[29].mxu0  ;;  %v2906_v37 = vsel %vm275_vm2, %v2668_v26, -inf }
0x10f3   :  { %v8887_v22 = vld [vmem:[%s9256_s11 + $0x10] sm:$0xff] }
0x10f5   :  { %v2824_v28 = vpop.f32.mrb[30].mxu0 }
0x10f6   :  { %v7594_v29 = vpop.f32.mrb[31].mxu0  ;;  %v2912_v39 = vsel %vm275_vm2, %v2824_v28, -inf }
0x10f7   :  { %v2902_v24 = vpop.f32.mrb[30].mxu1 }
0x10f8   :  { %v7599_v23 = vpop.f32.mrb[31].mxu1  ;;  %v2915_v40 = vsel %vm275_vm2, %v2902_v24, -inf }
0x1105   :  { %3028 = vrot.lane.b32.xlu0 %v2591_v31, %s8275_s19 }
0x117c   :  { %v2911_v32 = vpop.xlane.xlu0 %2910 }
0x117d   :  { %v2919_v48 = vsub.f32 %v2746_v18, %v2911_v32 }
0x117f   :  { %v2924_v33 = vmul.f32 1.442695, %v2919_v48 }
0x1180   :  { %v3029_v34 = vpop.permute.xlu0 %3028 }
0x1181   :  { %8039 = vpow2.f32 %v2924_v33  ;;  %7606 = vmatpush3.msra.mxu1 %v3029_v34 }
0x1182   :  { %7615 = vmatprep.subr.mxu1 %v8264_v20 }
0x118b   :  { %v8040_v35 = vpop.eup %8039 }
0x118c   :  { %v2933_v36 = vsel %vm275_vm2, %v8040_v35, 0.0 }
0x118d   :  { %2934 = vadd.xlane.f32.xlu1 %v2933_v36 }
0x1191   :  { %2907 = vmax.xlane.f32.xlu1 %v2906_v37 }
0x1195   :  { %2913 = vmax.xlane.f32.xlu1 %v2912_v39 }
0x1199   :  { %2916 = vmax.xlane.f32.xlu1 %v2915_v40 }
0x11aa   :  { %2951 = vrot.lane.b32.xlu1 %v2591_v31, %s8273_s18 }
0x121a   :  { %v2935_v27 = vpop.xlane.xlu1 %2934 }
0x121b   :  { %8041 = vrcp.f32 %v2935_v27 }
0x121e   :  { %v2908_v41 = vpop.xlane.xlu1 %2907 }
0x121f   :  { %v2918_v42 = vsub.f32 %v2668_v26, %v2908_v41  ;;  %v8880_v26 = vld [vmem:[%s9256_s11] sm:$0xff] }
0x1221   :  { %v2922_v54 = vmul.f32 1.442695, %v2918_v42 }
0x1222   :  { %v2914_v44 = vpop.xlane.xlu1 %2913 }
0x1223   :  { %8043 = vpow2.f32 %v2922_v54  ;;  %v2920_v45 = vsub.f32 %v2824_v28, %v2914_v44 }
0x1225   :  { %v8042_v46 = vpop.eup %8041  ;;  %v2926_v49 = vmul.f32 1.442695, %v2920_v45 }
0x1226   :  { %v2947_v50 = vmul.f32 %v8042_v46, %v8040_v35  ;;  %v2917_v51 = vpop.xlane.xlu1 %2916 }
0x1227   :  { %8045 = vpow2.f32 %v2926_v49  ;;  %v2921_v47 = vsub.f32 %v2902_v24, %v2917_v51 }
0x1228   :  { %7608 = vmatmul.mubr.msk.f32.vlgmr.msra.gmra.mrb[32].mxu1 %vm275_vm2, %v2947_v50 }
0x1229   :  { %v2928_v43 = vmul.f32 1.442695, %v2921_v47  ;;  %7617 = vmatprep.mubr.msk.f32.mxu1 %vm8265_vm1, %v8264_v20  ;;  %7616 = vmatpush3.msra.mxu1 %v8880_v26 }
0x122a   :  { %v2952_v53 = vpop.permute.xlu1 %2951  ;;  %7625 = vmatprep.subr.mxu1 %v8264_v20 }
0x122b   :  { %8047 = vpow2.f32 %v2928_v43  ;;  %7601 = vmatpush3.msra.mxu0 %v2952_v53 }
0x122c   :  { %7610 = vmatprep.subr.mxu0 %v8264_v20 }
0x122d   :  { %v8044_v55 = vpop.eup %8043 }
0x122e   :  { %v2930_v56 = vsel %vm275_vm2, %v8044_v55, 0.0 }
0x122f   :  { %2931 = vadd.xlane.f32.xlu0 %v2930_v56 }
0x1231   :  { %v8046_v57 = vpop.eup %8045 }
0x1232   :  { %v2936_v58 = vsel %vm275_vm2, %v8046_v57, 0.0 }
0x1233   :  { %2937 = vadd.xlane.f32.xlu1 %v2936_v58 }
0x1235   :  { %v8048_v59 = vpop.eup %8047 }
0x1236   :  { %v2939_v60 = vsel %vm275_vm2, %v8048_v59, 0.0 }
0x1237   :  { %2940 = vadd.xlane.f32.xlu1 %v2939_v60 }
0x1245   :  { %3402 = vrot.lane.b32.xlu0 %v2591_v31, %s8277_s21 }
0x1248   :  { %3251 = vrot.lane.b32.xlu1 %v2591_v31, %s8276_s1  ;;  %v8897_v31 = vld [vmem:[%s9256_s11 + $0x18] sm:$0xff]  ;;  %s7052_s11 = sshll.u32 %s8279_s8, 4  ;;  %s7053_s11 = int_to_ptr.vmem [resolvable:$true] %s7052_s11 }
0x1249   :  { %3788 = vrot.lane.b32.xlu0 %v3553_v61, %s8272_s25  ;;  %p8230_p13 = scmp.lt.s32.totalorder %s7053_s11, %s7053_s11 }
0x124c   :  { %3634 = vrot.lane.b32.xlu1 %v2581_v62, %s8266_s6 }
0x1250   :  { %3632 = vrot.lane.b32.xlu1 %v3553_v61, %s8269_s28 }
0x1254   :  { %3555 = vrot.lane.b32.xlu1 %v2581_v62, %s8267_s24 }
0x1258   :  { %3712 = vrot.lane.b32.xlu1 %v2581_v62, %s8268_s26 }
0x125c   :  { %3710 = vrot.lane.b32.xlu1 %v3553_v61, %s8271_s5 }
0x1260   :  { %3790 = vrot.lane.b32.xlu1 %v2581_v62, %s8270_s30 }
0x12bc   :  { %v2932_v0 = vpop.xlane.xlu0 %2931 }
0x12bd   :  { %8049 = vrcp.f32 %v2932_v0 }
0x12c0   :  { %v2938_v6 = vpop.xlane.xlu1 %2937  ;;  %v3403_v16 = vpop.permute.xlu0 %3402 }
0x12c1   :  { %8051 = vrcp.f32 %v2938_v6 }
0x12c4   :  { %v2941_v7 = vpop.xlane.xlu1 %2940  ;;  %v3789_v39 = vpop.permute.xlu0 %3788 }
0x12c5   :  { %8053 = vrcp.f32 %v2941_v7 }
0x12c7   :  { %v8050_v2 = vpop.eup %8049 }
0x12c8   :  { %v2946_v5 = vmul.f32 %v8050_v2, %v8044_v55  ;;  %v3252_v8 = vpop.permute.xlu1 %3251 }
0x12ca   :  { %7603 = vmatmul.mubr.msk.f32.vlgmr.msra.gmra.mrb[32].mxu0 %vm275_vm2, %v2946_v5 }
0x12cb   :  { %7611 = vmatpush3.msra.mxu0 %v8849_v3  ;;  %7612 = vmatprep.mubr.msk.f32.mxu0 %vm8265_vm1, %v8264_v20  ;;  %v8052_v30 = vpop.eup %8051 }
0x12cc   :  { %7620 = vmatprep.subr.mxu0 %v8264_v20  ;;  %v3635_v9 = vpop.permute.xlu1 %3634  ;;  %v2948_v13 = vmul.f32 %v8052_v30, %v8046_v57 }
0x12cf   :  { %v8054_v14 = vpop.eup %8053 }
0x12d0   :  { %v3633_v11 = vpop.permute.xlu1 %3632  ;;  %v2949_v17 = vmul.f32 %v8054_v14, %v8048_v59  ;;  %v2592_v14 = vadd.f32 %v8782_v4, %v8817_v52 }
0x12d4   :  { %v3556_v18 = vpop.permute.xlu1 %3555 }
0x12d8   :  { %v3713_v21 = vpop.permute.xlu1 %3712 }
0x12dc   :  { %v3711_v25 = vpop.permute.xlu1 %3710 }
0x12e0   :  { %v3791_v36 = vpop.permute.xlu1 %3790 }
0x12fb   :  { %v3100_v10 = vpop.f32.mrb[32].mxu1 }
0x12fc   :  { %v7609_v12 = vpop.f32.mrb[33].mxu1  ;;  %7613 = vmatmul.mubr.msk.f32.vlgmr.msra.gmra.mrb[34].mxu0 %vm275_vm2, %v3100_v10 }
0x12fd   :  { %7621 = vmatpush3.msra.mxu0 %v3252_v8  ;;  %7622 = vmatprep.mubr.msk.f32.mxu0 %vm8265_vm1, %v8264_v20 }
0x12fe   :  { %7630 = vmatprep.subr.mxu0 %v8264_v20 }
0x1300   :  { %7623 = vmatmul.mubr.msk.f32.vlgmr.msra.gmra.mrb[36].mxu0 %vm275_vm2, %v2948_v13 }
0x1301   :  { %7631 = vmatpush3.msra.mxu0 %v3403_v16  ;;  %7632 = vmatprep.mubr.msk.f32.mxu0 %vm8265_vm1, %v8264_v20 }
0x1302   :  { %7640 = vmatprep.subr.mxu0 %v8264_v20 }
0x1304   :  { %7633 = vmatmul.mubr.msk.f32.vlgmr.msra.gmra.mrb[38].mxu0 %vm275_vm2, %v2949_v17 }
0x1305   :  { %7642 = vmatprep.mubr.msk.f32.mxu0 %vm8265_vm1, %v8264_v20 }
0x1308   :  { %7641 = vmatpush3.xpose.msk.msra.mxu0 %vm275_vm2, %v3556_v18 }
0x1309   :  { %7650 = vmatprep.subr.mxu0 %v8264_v20 }
0x130b   :  { %7643 = vmatmul.mubr.msk.f32.vlgmr.msra.gmra.mrb[40].mxu0 %vm275_vm2, %v3553_v61 }
0x130c   :  { %7651 = vmatpush3.xpose.msk.msra.mxu0 %vm275_vm2, %v3713_v21  ;;  %7652 = vmatprep.mubr.msk.f32.mxu0 %vm8265_vm1, %v8264_v20 }
0x130d   :  { %7660 = vmatprep.subr.mxu0 %v8264_v20 }
0x130f   :  { %7653 = vmatmul.mubr.msk.f32.vlgmr.msra.gmra.mrb[42].mxu0 %vm275_vm2, %v3711_v25 }
0x1310   :  { %7662 = vmatprep.mubr.msk.f32.mxu0 %vm8265_vm1, %v8264_v20 }
0x139d   :  { %v3023_v28 = vpop.f32.mrb[32].mxu0 }
0x139e   :  { %v7604_v29 = vpop.f32.mrb[33].mxu0  ;;  %7618 = vmatmul.mubr.msk.f32.vlgmr.msra.gmra.mrb[34].mxu1 %vm275_vm2, %v3023_v28  ;;  %v8931_v28 = vld [vmem:[#allocation6 + $0xc] ss:$0 sm:$0xff] }
0x139f   :  { %7626 = vmatpush3.msra.mxu1 %v8887_v22  ;;  %7627 = vmatprep.mubr.msk.f32.mxu1 %vm8265_vm1, %v8264_v20 }
0x13a0   :  { %7635 = vmatprep.subr.mxu1 %v8264_v20 }
0x13cf   :  { %v3174_v24 = vpop.f32.mrb[34].mxu0 }
0x13d0   :  { %v7614_v23 = vpop.f32.mrb[35].mxu0 }
0x13d3   :  { %v3323_v32 = vpop.f32.mrb[36].mxu0 }
0x13d4   :  { %v7624_v48 = vpop.f32.mrb[37].mxu0  ;;  %7628 = vmatmul.mubr.msk.f32.vlgmr.msra.gmra.mrb[36].mxu1 %vm275_vm2, %v3323_v32 }
0x13d5   :  { %7636 = vmatpush3.msra.mxu1 %v8897_v31  ;;  %7637 = vmatprep.mubr.msk.f32.mxu1 %vm8265_vm1, %v8264_v20 }
0x13d6   :  { %7645 = vmatprep.subr.mxu1 %v8264_v20 }
0x13d7   :  { %v3474_v33 = vpop.f32.mrb[38].mxu0 }
0x13d8   :  { %v7634_v34 = vpop.f32.mrb[39].mxu0  ;;  %7638 = vmatmul.mubr.msk.f32.vlgmr.msra.gmra.mrb[38].mxu1 %vm275_vm2, %v3474_v33 }
0x13d9   :  { %7647 = vmatprep.mubr.msk.f32.mxu1 %vm8265_vm1, %v8264_v20 }
0x13dc   :  { %7646 = vmatpush3.xpose.msk.msra.mxu1 %vm275_vm2, %v3635_v9 }
0x13dd   :  { %7655 = vmatprep.subr.mxu1 %v8264_v20 }
0x13de   :  { %v3628_v35 = vpop.f32.mrb[40].mxu0 }
0x13df   :  { %v7644_v37 = vpop.f32.mrb[41].mxu0  ;;  %7648 = vmatmul.mubr.msk.f32.vlgmr.msra.gmra.mrb[40].mxu1 %vm275_vm2, %v3633_v11  ;;  %v3866_v57 = vsel %vm275_vm2, %v3628_v35, -inf }
0x13e0   :  { %7656 = vmatpush3.xpose.msk.msra.mxu1 %vm275_vm2, %v3791_v36  ;;  %7657 = vmatprep.mubr.msk.f32.mxu1 %vm8265_vm1, %v8264_v20 }
0x13e1   :  { %7665 = vmatprep.subr.mxu1 %v8264_v20 }
0x13e2   :  { %v3784_v40 = vpop.f32.mrb[42].mxu0 }
0x13e3   :  { %v7654_v27 = vpop.f32.mrb[43].mxu0  ;;  %7658 = vmatmul.mubr.msk.f32.vlgmr.msra.gmra.mrb[42].mxu1 %vm275_vm2, %v3789_v39  ;;  %v3872_v58 = vsel %vm275_vm2, %v3784_v40, -inf }
0x13e4   :  { %7667 = vmatprep.mubr.msk.f32.mxu1 %vm8265_vm1, %v8264_v20 }
0x1471   :  { %v3247_v41 = vpop.f32.mrb[34].mxu1 }
0x1472   :  { %v3248_v42 = vadd.f32 %v3247_v41, %v3174_v24  ;;  %v7619_v54 = vpop.f32.mrb[35].mxu1 }
0x14a7   :  { %v3397_v44 = vpop.f32.mrb[36].mxu1 }
0x14a8   :  { %v3401_v45 = vadd.f32 %v3397_v44, %v3248_v42  ;;  %v7629_v46 = vpop.f32.mrb[37].mxu1 }
0x14ab   :  { %v3548_v49 = vpop.f32.mrb[38].mxu1 }
0x14ac   :  { %v3552_v50 = vadd.f32 %v3548_v49, %v3401_v45  ;;  %v7639_v51 = vpop.f32.mrb[39].mxu1 }
0x14ae   :  { %v4518_v4 = vadd.f32 %v8931_v28, %v3552_v50 }
0x14b0   :  { %v8935_v52 = vadd.f32 %v4518_v4, %v8770_v63 }
0x14b2   :  { %v3706_v47 = vpop.f32.mrb[40].mxu1  ;;  %v4522_v29 = vsel %vm160_vm0, %v8935_v52, 0.0 }
0x14b3   :  { %v7649_v43 = vpop.f32.mrb[41].mxu1  ;;  %v3869_v53 = vsel %vm275_vm2, %v3706_v47, -inf }
0x14b4   :  { %3870 = vmax.xlane.f32.xlu1 %v3869_v53 }
0x14b6   :  { %v3862_v55 = vpop.f32.mrb[42].mxu1 }
0x14b7   :  { %v7659_v56 = vpop.f32.mrb[43].mxu1  ;;  %v3875_v59 = vsel %vm275_vm2, %v3862_v55, -inf }
0x14b8   :  { %3867 = vmax.xlane.f32.xlu1 %v3866_v57 }
0x14bc   :  { %3873 = vmax.xlane.f32.xlu1 %v3872_v58 }
0x14c0   :  { %3876 = vmax.xlane.f32.xlu1 %v3875_v59 }
0x1541   :  { %v3871_v60 = vpop.xlane.xlu1 %3870 }
0x1542   :  { %v3879_v61 = vsub.f32 %v3706_v47, %v3871_v60 }
0x1544   :  { %v3884_v62 = vmul.f32 1.442695, %v3879_v61 }
0x1545   :  { %v3868_v0 = vpop.xlane.xlu1 %3867 }
0x1546   :  { %8055 = vpow2.f32 %v3884_v62  ;;  %v3878_v2 = vsub.f32 %v3628_v35, %v3868_v0 }
0x1548   :  { %v3882_v5 = vmul.f32 1.442695, %v3878_v2 }
0x1549   :  { %v3874_v6 = vpop.xlane.xlu1 %3873 }
0x154a   :  { %8057 = vpow2.f32 %v3882_v5  ;;  %v3880_v7 = vsub.f32 %v3784_v40, %v3874_v6 }
0x154c   :  { %v3886_v8 = vmul.f32 1.442695, %v3880_v7 }
0x154d   :  { %v3877_v16 = vpop.xlane.xlu1 %3876 }
0x154e   :  { %8059 = vpow2.f32 %v3886_v8  ;;  %v3881_v17 = vsub.f32 %v3862_v55, %v3877_v16  ;;  %v4564_v8 = vld [vmem:[#allocation9 + $0x10] sm:$0xff] }
0x1550   :  { %v8056_v9 = vpop.eup %8055  ;;  %v3888_v18 = vmul.f32 1.442695, %v3881_v17 }
0x1551   :  { %v3893_v30 = vsel %vm275_vm2, %v8056_v9, 0.0 }
0x1552   :  { %3894 = vadd.xlane.f32.xlu0 %v3893_v30  ;;  %8061 = vpow2.f32 %v3888_v18 }
0x1554   :  { %v8058_v10 = vpop.eup %8057 }
0x1555   :  { %v3890_v11 = vsel %vm275_vm2, %v8058_v10, 0.0 }
0x1556   :  { %3891 = vadd.xlane.f32.xlu1 %v3890_v11 }
0x1558   :  { %v8060_v12 = vpop.eup %8059 }
0x1559   :  { %v3896_v13 = vsel %vm275_vm2, %v8060_v12, 0.0 }
0x155a   :  { %3897 = vadd.xlane.f32.xlu1 %v3896_v13 }
0x155c   :  { %v8062_v21 = vpop.eup %8061 }
0x155d   :  { %v3899_v25 = vsel %vm275_vm2, %v8062_v21, 0.0 }
0x1568   :  { %3988 = vrot.lane.b32.xlu0 %v2592_v14, %s8275_s19 }
0x156b   :  { %3911 = vrot.lane.b32.xlu1 %v2592_v14, %s8273_s18 }
0x156f   :  { %4211 = vrot.lane.b32.xlu1 %v2592_v14, %s8276_s1 }
0x1573   :  { %4362 = vrot.lane.b32.xlu1 %v2592_v14, %s8277_s21 }
0x1587   :  { %3900 = vadd.xlane.f32.xlu0 %v3899_v25 }
0x1597   :  { %4523 = vadd.xlane.f32.xlu1 %v4522_v29  ;;  %v4563_v29 = vld [vmem:[#allocation9 + $0x8] sm:$0xff] }
0x15df   :  { %v3895_v24 = vpop.xlane.xlu0 %3894 }
0x15e0   :  { %8063 = vrcp.f32 %v3895_v24 }
0x15e3   :  { %v3892_v23 = vpop.xlane.xlu1 %3891  ;;  %v3989_v32 = vpop.permute.xlu0 %3988 }
0x15e4   :  { %8065 = vrcp.f32 %v3892_v23  ;;  %7666 = vmatpush3.msra.mxu1 %v3989_v32 }
0x15e5   :  { %7675 = vmatprep.subr.mxu1 %v8264_v20 }
0x15e7   :  { %v3898_v48 = vpop.xlane.xlu1 %3897 }
0x15e8   :  { %8067 = vrcp.f32 %v3898_v48 }
0x15ea   :  { %v8064_v33 = vpop.eup %8063 }
0x15eb   :  { %v3907_v34 = vmul.f32 %v8064_v33, %v8056_v9  ;;  %v3912_v35 = vpop.permute.xlu1 %3911  ;;  %v4565_v9 = vld [vmem:[#allocation9 + $0x18] sm:$0xff] }
0x15ec   :  { %7661 = vmatpush3.msra.mxu0 %v3912_v35  ;;  %v7994_v30 = vpack.i.bf16 %v4565_v9, %v4564_v8  ;;  %v7923_v48 = vpack.c.bf16 %v4565_v9, %v4564_v8 }
0x15ed   :  { %7668 = vmatmul.mubr.msk.f32.vlgmr.msra.gmra.mrb[44].mxu1 %vm275_vm2, %v3907_v34  ;;  %7670 = vmatprep.subr.mxu0 %v8264_v20 }
0x15ee   :  { %v8066_v63 = vpop.eup %8065  ;;  %7676 = vmatpush3.msra.mxu1 %v8880_v26  ;;  %7677 = vmatprep.mubr.msk.f32.mxu1 %vm8265_vm1, %v8264_v20 }
0x15ef   :  { %v3906_v36 = vmul.f32 %v8066_v63, %v8058_v10  ;;  %7685 = vmatprep.subr.mxu1 %v8264_v20  ;;  %v4212_v39 = vpop.permute.xlu1 %4211  ;;  %7995 = vrot.lane.b32.xlu1 %v7994_v30, %s8267_s24 }
0x15f1   :  { %7663 = vmatmul.mubr.msk.f32.vlgmr.msra.gmra.mrb[44].mxu0 %vm275_vm2, %v3906_v36 }
0x15f2   :  { %7671 = vmatpush3.msra.mxu0 %v8849_v3  ;;  %7672 = vmatprep.mubr.msk.f32.mxu0 %vm8265_vm1, %v8264_v20  ;;  %v8068_v26 = vpop.eup %8067 }
0x15f3   :  { %7680 = vmatprep.subr.mxu0 %v8264_v20  ;;  %v3908_v41 = vmul.f32 %v8068_v26, %v8060_v12  ;;  %v4363_v54 = vpop.permute.xlu1 %4362 }
0x1614   :  { %v3901_v37 = vpop.xlane.xlu0 %3900 }
0x1615   :  { %8069 = vrcp.f32 %v3901_v37 }
0x161f   :  { %v8070_v3 = vpop.eup %8069 }
0x1620   :  { %v3909_v45 = vmul.f32 %v8070_v3, %v8062_v21  ;;  %v7150_v21 = vld [vmem:[#allocation6 + $0xd] ss:$0 sm:$0xff] }
0x1624   :  { %v4524_v56 = vpop.xlane.xlu1 %4523 }
0x1625   :  { %v4528_v60 = vmul.f32 0.03125, %v4524_v56  ;;  %v7158_v56 = vld [vmem:[#allocation6 + $0x11] ss:$0 sm:$0xff] }
0x1661   :  { %v7996_v34 = vpop.permute.xlu1 %7995 }
0x1662   :  { %v7998_v36 = vunpack.i.h.bf16 %v7996_v34  ;;  %v7997_v37 = vunpack.i.l.bf16 %v7996_v34 }
0x16c0   :  { %v4060_v40 = vpop.f32.mrb[44].mxu1 }
0x16c1   :  { %v7669_v27 = vpop.f32.mrb[45].mxu1  ;;  %7673 = vmatmul.mubr.msk.f32.vlgmr.msra.gmra.mrb[46].mxu0 %vm275_vm2, %v4060_v40 }
0x16c2   :  { %7681 = vmatpush3.msra.mxu0 %v4212_v39  ;;  %7682 = vmatprep.mubr.msk.f32.mxu0 %vm8265_vm1, %v8264_v20 }
0x16c3   :  { %7690 = vmatprep.subr.mxu0 %v8264_v20 }
0x16c4   :  { %v3983_v42 = vpop.f32.mrb[44].mxu0 }
0x16c5   :  { %v7664_v44 = vpop.f32.mrb[45].mxu0  ;;  %7678 = vmatmul.mubr.msk.f32.vlgmr.msra.gmra.mrb[46].mxu1 %vm275_vm2, %v3983_v42  ;;  %7683 = vmatmul.mubr.msk.f32.vlgmr.msra.gmra.mrb[48].mxu0 %vm275_vm2, %v3908_v41  ;;  %v7931_v41 = vpack.c.bf16 %v7998_v36, %v7997_v37 }
0x16c6   :  { %7691 = vmatpush3.msra.mxu0 %v4363_v54  ;;  %7692 = vmatprep.mubr.msk.f32.mxu0 %vm8265_vm1, %v8264_v20 }
0x16c7   :  { %7686 = vmatpush3.msra.mxu1 %v8887_v22  ;;  %7687 = vmatprep.mubr.msk.f32.mxu1 %vm8265_vm1, %v8264_v20 }
0x16c8   :  { %7695 = vmatprep.subr.mxu1 %v8264_v20 }
0x16c9   :  { %7693 = vmatmul.mubr.msk.f32.vlgmr.msra.gmra.mrb[50].mxu0 %vm275_vm2, %v3909_v45  ;;  %v7157_v45 = vld [vmem:[#allocation6 + $0x10] ss:$0 sm:$0xff] }
0x1794   :  { %v4134_v46 = vpop.f32.mrb[46].mxu0 }
0x1795   :  { %v7674_v49 = vpop.f32.mrb[47].mxu0 }
0x1798   :  { %v4207_v50 = vpop.f32.mrb[46].mxu1  ;;  %v4283_v51 = vpop.f32.mrb[48].mxu0 }
0x1799   :  { %v4208_v47 = vadd.f32 %v4207_v50, %v4134_v46  ;;  %v7679_v43 = vpop.f32.mrb[47].mxu1  ;;  %v7684_v53 = vpop.f32.mrb[49].mxu0  ;;  %7688 = vmatmul.mubr.msk.f32.vlgmr.msra.gmra.mrb[48].mxu1 %vm275_vm2, %v4283_v51  ;;  %v7152_v51 = vld [vmem:[#allocation6 + $0xf] ss:$0 sm:$0xff] }
0x179a   :  { %7696 = vmatpush3.msra.mxu1 %v8897_v31  ;;  %7697 = vmatprep.mubr.msk.f32.mxu1 %vm8265_vm1, %v8264_v20  ;;  %v4530_v31 = vsub.f32 %v8935_v52, %v4528_v60  ;;  %v4562_v52 = vld [vmem:[#allocation9] sm:$0xff] }
0x179b   :  { %v7989_v23 = vpack.i.bf16 %v4563_v29, %v4562_v52  ;;  %v7919_v32 = vpack.c.bf16 %v4563_v29, %v4562_v52 }
0x179c   :  { %v4434_v22 = vpop.f32.mrb[50].mxu0  ;;  %v4532_v7 = vmul.f32 %v4530_v31, %v4530_v31 }
0x179d   :  { %v7694_v55 = vpop.f32.mrb[51].mxu0  ;;  %7698 = vmatmul.mubr.msk.f32.vlgmr.msra.gmra.mrb[50].mxu1 %vm275_vm2, %v4434_v22  ;;  %7920 = vmatprep.subr.bf16.mxu0 %v7919_v32 }
0x179e   :  { %7719 = vmatprep.mubr.msk.f32.mxu1 %vm160_vm0, %v8471_v15  ;;  %v4534_v15 = vsel %vm160_vm0, %v4532_v7, 0.0  ;;  %7922 = vmatpush3.bf16.msra.mxu0 %v7919_v32 }
0x179f   :  { %7924 = vmatprep.subr.bf16.mxu0 %v7923_v48 }
0x17a2   :  { %7926 = vmatpush3.bf16.msra.mxu0 %v7923_v48 }
0x17a3   :  { %7722 = vmatprep.subr.mxu0 %v8264_v20 }
0x186c   :  { %v4357_v57 = vpop.f32.mrb[48].mxu1 }
0x186d   :  { %v4361_v58 = vadd.f32 %v4357_v57, %v4208_v47  ;;  %v7689_v59 = vpop.f32.mrb[49].mxu1 }
0x1870   :  { %v4508_v61 = vpop.f32.mrb[50].mxu1 }
0x1871   :  { %v4512_v62 = vadd.f32 %v4508_v61, %v4361_v58  ;;  %v7699_v0 = vpop.f32.mrb[51].mxu1 }
0x1873   :  { %v4519_v2 = vadd.f32 %v8931_v28, %v4512_v62  ;;  %v7151_v28 = vld [vmem:[#allocation6 + $0xe] ss:$0 sm:$0xff] }
0x1875   :  { %v4521_v5 = vadd.f32 %v4519_v2, %v8774_v1 }
0x1877   :  { %v4525_v6 = vsel %vm160_vm0, %v4521_v5, 0.0 }
0x1878   :  { %4526 = vadd.xlane.f32.xlu0 %v4525_v6 }
0x187c   :  { %4535 = vadd.xlane.f32.xlu0 %v4534_v15 }
0x1905   :  { %v4527_v10 = vpop.xlane.xlu0 %4526 }
0x1906   :  { %v4529_v11 = vmul.f32 0.03125, %v4527_v10 }
0x1908   :  { %v4531_v12 = vsub.f32 %v4521_v5, %v4529_v11 }
0x1909   :  { %v4536_v13 = vpop.xlane.xlu0 %4535 }
0x190a   :  { %v4540_v14 = vmul.f32 0.03125, %v4536_v13  ;;  %v4533_v16 = vmul.f32 %v4531_v12, %v4531_v12 }
0x190c   :  { %v4542_v17 = vadd.f32 1e-05, %v4540_v14  ;;  %v4537_v1 = vsel %vm160_vm0, %v4533_v16, 0.0 }
0x190d   :  { %4538 = vadd.xlane.f32.xlu0 %v4537_v1 }
0x190e   :  { %8071 = vrsqrt.f32 %v4542_v17 }
0x1918   :  { %v8072_v18 = vpop.eup %8071 }
0x1919   :  { %v4546_v25 = vmul.f32 %v8072_v18, %v4530_v31 }
0x191b   :  { %v4553_v4 = vmul.f32 %v7150_v21, %v4546_v25 }
0x191d   :  { %v8978_v24 = vadd.f32 %v7151_v28, %v4553_v4 }
0x191f   :  { %7708 = vmatprep.mubr.msk.f32.mxu0 %vm160_vm0, %v8978_v24 }
0x1923   :  { %7990 = vrot.lane.b32.xlu0 %v7989_v23, %s8267_s24 }
0x199a   :  { %v4539_v33 = vpop.xlane.xlu0 %4538 }
0x199b   :  { %v4541_v35 = vmul.f32 0.03125, %v4539_v33 }
0x199d   :  { %v4543_v63 = vadd.f32 1e-05, %v4541_v35 }
0x199e   :  { %v7991_v39 = vpop.permute.xlu0 %7990 }
0x199f   :  { %8073 = vrsqrt.f32 %v4543_v63  ;;  %v7993_v26 = vunpack.i.h.bf16 %v7991_v39  ;;  %v7992_v40 = vunpack.i.l.bf16 %v7991_v39 }
0x19a1   :  { %v7927_v27 = vpack.c.bf16 %v7993_v26, %v7992_v40 }
0x19a3   :  { %7928 = vmatprep.subr.bf16.mxu1 %v7927_v27 }
0x19a4   :  { %7930 = vmatpush3.bf16.msra.mxu1 %v7927_v27 }
0x19a5   :  { %7932 = vmatprep.subr.bf16.mxu1 %v7931_v41 }
0x19a8   :  { %7934 = vmatpush3.bf16.msra.mxu1 %v7931_v41 }
0x19a9   :  { %v8074_v3 = vpop.eup %8073  ;;  %7727 = vmatprep.subr.mxu1 %v8264_v20 }
0x19aa   :  { %v4547_v42 = vmul.f32 %v8074_v3, %v4531_v12 }
0x19ab   :  { %7720 = vmatmul.mubr.msk.f32.vlgmr.msra.gmra.mrb[52].mxu1 %vm160_vm0, %v8475_v19 }
0x19ac   :  { %v4554_v54 = vmul.f32 %v7150_v21, %v4547_v42  ;;  %7729 = vmatprep.mubr.msk.f32.mxu1 %vm8265_vm1, %v8264_v20 }
0x19ae   :  { %v8989_v44 = vadd.f32 %v7151_v28, %v4554_v54 }
0x19b0   :  { %7709 = vmatmul.mubr.msk.f32.vlgmr.msra.gmra.mrb[52].mxu0 %vm160_vm0, %v8989_v44 }
0x19b1   :  { %7724 = vmatprep.mubr.msk.f32.mxu0 %vm8265_vm1, %v8264_v20 }
0x1a7e   :  { %v8995_v46 = vpop.f32.mrb[52].mxu1 }
0x1a7f   :  { %v8998_v49 = vadd.f32 %v8995_v46, %v7157_v45  ;;  %v4734_v50 = vpop.f32.mrb[53].mxu1 }
0x1a80   :  { %v4748_v19 = vadd.f32 %v7157_v45, %v4734_v50 }
0x1a82   :  { %4996 = vrot.lane.b32.xlu1 %v4748_v19, %s8272_s25  ;;  %4840 = vrot.lane.b32.xlu0 %v4748_v19, %s8269_s28 }
0x1a83   :  { %7723 = vmatpush3.xpose.msk.msra.mxu0 %vm275_vm2, %v4748_v19  ;;  %v7710_v47 = vpop.f32.mrb[52].mxu0 }
0x1a84   :  { %v9003_v43 = vadd.f32 %v7710_v47, %v7152_v51  ;;  %v4643_v53 = vpop.f32.mrb[53].mxu0  ;;  %7732 = vmatprep.subr.mxu0 %v8264_v20 }
0x1a85   :  { %v4644_v22 = vadd.f32 %v7152_v51, %v4643_v53 }
0x1a86   :  { %v5719_v41 = vmul.f32 0.35355338, %v9003_v43 }
0x1a87   :  { %v4761_v55 = vmul.f32 0.35355338, %v4644_v22 }
0x1a89   :  { %4838 = vrot.lane.b32.xlu0 %v4761_v55, %s8269_s28  ;;  %7725 = vmatmul.mubr.msk.f32.vlgmr.msra.gmra.mrb[54].mxu0 %vm275_vm2, %v4761_v55 }
0x1a8a   :  { %7734 = vmatprep.mubr.msk.f32.mxu0 %vm8265_vm1, %v8264_v20 }
0x1a8d   :  { %4918 = vrot.lane.b32.xlu0 %v4748_v19, %s8271_s5  ;;  %v9062_v19 = vld [vmem:[%s9258_s13 + $0x8] sm:$0xff] }
0x1a91   :  { %4916 = vrot.lane.b32.xlu0 %v4761_v55, %s8271_s5 }
0x1a95   :  { %4994 = vrot.lane.b32.xlu0 %v4761_v55, %s8272_s25 }
0x1a99   :  { %4756 = vrot.lane.b32.xlu0 %v7158_v56, %s8263_s20  ;;  %s8225_s20 = scalar_lea.vmem %s7053_s11, 16 }
0x1a9a   :  { %p8226_p12 = scmp.ne.s32.totalorder %s7053_s11, %s8225_s20 }
0x1af4   :  { %v4841_v57 = vpop.permute.xlu0 %4840  ;;  %v4997_v59 = vpop.permute.xlu1 %4996 }
0x1af5   :  { %7728 = vmatpush3.xpose.msk.msra.mxu1 %vm275_vm2, %v4841_v57 }
0x1af6   :  { %7737 = vmatprep.subr.mxu1 %v8264_v20 }
0x1afb   :  { %v4839_v58 = vpop.permute.xlu0 %4838 }
0x1afc   :  { %7730 = vmatmul.mubr.msk.f32.vlgmr.msra.gmra.mrb[54].mxu1 %vm275_vm2, %v4839_v58 }
0x1afd   :  { %7738 = vmatpush3.xpose.msk.msra.mxu1 %vm275_vm2, %v4997_v59  ;;  %7739 = vmatprep.mubr.msk.f32.mxu1 %vm8265_vm1, %v8264_v20 }
0x1afe   :  { %7747 = vmatprep.subr.mxu1 %v8264_v20 }
0x1aff   :  { %v4919_v60 = vpop.permute.xlu0 %4918 }
0x1b00   :  { %7733 = vmatpush3.xpose.msk.msra.mxu0 %vm275_vm2, %v4919_v60 }
0x1b01   :  { %7742 = vmatprep.subr.mxu0 %v8264_v20 }
0x1b03   :  { %v4917_v61 = vpop.permute.xlu0 %4916 }
0x1b04   :  { %7735 = vmatmul.mubr.msk.f32.vlgmr.msra.gmra.mrb[56].mxu0 %vm275_vm2, %v4917_v61 }
0x1b05   :  { %7744 = vmatprep.mubr.msk.f32.mxu0 %vm8265_vm1, %v8264_v20 }
0x1b07   :  { %v4995_v62 = vpop.permute.xlu0 %4994 }
0x1b08   :  { %7740 = vmatmul.mubr.msk.f32.vlgmr.msra.gmra.mrb[56].mxu1 %vm275_vm2, %v4995_v62  ;;  %v9101_v62 = vld [vmem:[%s9258_s13 + $0x10] sm:$0xff] }
0x1b09   :  { %7749 = vmatprep.mubr.msk.f32.mxu1 %vm8265_vm1, %v8264_v20 }
0x1b0b   :  { %v9030_v30 = vpop.permute.xlu0 %4756 }
0x1b0c   :  { %v4759_v10 = vadd.f32 %v9030_v30, %v4734_v50 }
0x1b5c   :  { %v4834_v0 = vpop.f32.mrb[54].mxu0 }
0x1b5d   :  { %v7726_v31 = vpop.f32.mrb[55].mxu0  ;;  %v5072_v1 = vsel %vm275_vm2, %v4834_v0, -inf }
0x1bcf   :  { %v4912_v2 = vpop.f32.mrb[54].mxu1 }
0x1bd0   :  { %v7731_v5 = vpop.f32.mrb[55].mxu1  ;;  %v5075_v6 = vsel %vm275_vm2, %v4912_v2, -inf }
0x1bd1   :  { %5076 = vmax.xlane.f32.xlu1 %v5075_v6  ;;  %v9111_v6 = vld [vmem:[%s9258_s13 + $0x18] sm:$0xff] }
0x1bd7   :  { %v4990_v7 = vpop.f32.mrb[56].mxu0 }
0x1bd8   :  { %v7736_v15 = vpop.f32.mrb[57].mxu0  ;;  %v5078_v18 = vsel %vm275_vm2, %v4990_v7, -inf }
0x1bdb   :  { %v5068_v8 = vpop.f32.mrb[56].mxu1 }
0x1bdc   :  { %v7741_v9 = vpop.f32.mrb[57].mxu1  ;;  %v5081_v21 = vsel %vm275_vm2, %v5068_v8, -inf }
0x1be2   :  { %5194 = vrot.lane.b32.xlu1 %v4759_v10, %s8266_s6 }
0x1c5e   :  { %v5077_v11 = vpop.xlane.xlu1 %5076 }
0x1c5f   :  { %v5085_v12 = vsub.f32 %v4912_v2, %v5077_v11 }
0x1c61   :  { %v5090_v13 = vmul.f32 1.442695, %v5085_v12 }
0x1c62   :  { %v5195_v14 = vpop.permute.xlu1 %5194 }
0x1c63   :  { %8075 = vpow2.f32 %v5090_v13  ;;  %7748 = vmatpush3.msra.mxu1 %v5195_v14 }
0x1c64   :  { %7757 = vmatprep.subr.mxu1 %v8264_v20 }
0x1c6d   :  { %v8076_v16 = vpop.eup %8075 }
0x1c6e   :  { %v5099_v17 = vsel %vm275_vm2, %v8076_v16, 0.0 }
0x1c6f   :  { %5100 = vadd.xlane.f32.xlu0 %v5099_v17 }
0x1c73   :  { %5073 = vmax.xlane.f32.xlu0 %v5072_v1 }
0x1c77   :  { %5079 = vmax.xlane.f32.xlu0 %v5078_v18 }
0x1c7b   :  { %5082 = vmax.xlane.f32.xlu0 %v5081_v21 }
0x1cfc   :  { %v5101_v25 = vpop.xlane.xlu0 %5100 }
0x1cfd   :  { %8077 = vrcp.f32 %v5101_v25 }
0x1d00   :  { %v5074_v28 = vpop.xlane.xlu0 %5073 }
0x1d01   :  { %v5084_v4 = vsub.f32 %v4834_v0, %v5074_v28 }
0x1d03   :  { %v5088_v52 = vmul.f32 1.442695, %v5084_v4 }
0x1d04   :  { %v5080_v29 = vpop.xlane.xlu0 %5079 }
0x1d05   :  { %8079 = vpow2.f32 %v5088_v52  ;;  %v5086_v23 = vsub.f32 %v4990_v7, %v5080_v29 }
0x1d07   :  { %v8078_v32 = vpop.eup %8077  ;;  %v5092_v48 = vmul.f32 1.442695, %v5086_v23 }
0x1d08   :  { %v5113_v33 = vmul.f32 %v8078_v32, %v8076_v16  ;;  %v5083_v34 = vpop.xlane.xlu0 %5082 }
0x1d09   :  { %8081 = vpow2.f32 %v5092_v48  ;;  %v5087_v35 = vsub.f32 %v5068_v8, %v5083_v34 }
0x1d0a   :  { %7750 = vmatmul.mubr.msk.f32.vlgmr.msra.gmra.mrb[58].mxu1 %vm275_vm2, %v5113_v33 }
0x1d0b   :  { %v5094_v63 = vmul.f32 1.442695, %v5087_v35  ;;  %7759 = vmatprep.mubr.msk.f32.mxu1 %vm8265_vm1, %v8264_v20 }
0x1d0d   :  { %8083 = vpow2.f32 %v5094_v63 }
0x1d0f   :  { %v8080_v36 = vpop.eup %8079 }
0x1d10   :  { %v5096_v37 = vsel %vm275_vm2, %v8080_v36, 0.0 }
0x1d11   :  { %5097 = vadd.xlane.f32.xlu0 %v5096_v37 }
0x1d13   :  { %v8082_v39 = vpop.eup %8081 }
0x1d14   :  { %v5102_v26 = vsel %vm275_vm2, %v8082_v39, 0.0 }
0x1d15   :  { %5103 = vadd.xlane.f32.xlu0 %v5102_v26 }
0x1d17   :  { %v8084_v40 = vpop.eup %8083 }
0x1d18   :  { %v5105_v27 = vsel %vm275_vm2, %v8084_v40, 0.0 }
0x1d19   :  { %5106 = vadd.xlane.f32.xlu1 %v5105_v27 }
0x1d2a   :  { %5796 = vrot.lane.b32.xlu1 %v5719_v41, %s8269_s28 }
0x1d2b   :  { %5117 = vrot.lane.b32.xlu0 %v4759_v10, %s8267_s24 }
0x1d2f   :  { %5417 = vrot.lane.b32.xlu0 %v4759_v10, %s8268_s26 }
0x1d33   :  { %5568 = vrot.lane.b32.xlu0 %v4759_v10, %s8270_s30 }
0x1d37   :  { %5798 = vrot.lane.b32.xlu0 %v8998_v49, %s8269_s28  ;;  %s8229_s28 = scalar_lea.vmem %s7053_s11, 32 }
0x1d38   :  { %p8231_p0 = scmp.lt.s32.totalorder %s8229_s28, %s8225_s20 }
0x1d3a   :  { %p8232_p1 = por %p8231_p0, %p8230_p13 }
0x1d3b   :  { %5876 = vrot.lane.b32.xlu0 %v8998_v49, %s8271_s5 }
0x1d3c   :  { %p8233_p2 = pnand %p8232_p1, %p8226_p12 }
0x1d3f   :  { %5874 = vrot.lane.b32.xlu0 %v5719_v41, %s8271_s5 }
0x1d43   :  { %5954 = vrot.lane.b32.xlu0 %v8998_v49, %s8272_s25 }
0x1d47   :  { %5952 = vrot.lane.b32.xlu0 %v5719_v41, %s8272_s25 }
0x1d9e   :  { %v5098_v3 = vpop.xlane.xlu0 %5097 }
0x1d9f   :  { %8085 = vrcp.f32 %v5098_v3 }
0x1da2   :  { %v5104_v42 = vpop.xlane.xlu0 %5103 }
0x1da3   :  { %8087 = vrcp.f32 %v5104_v42 }
0x1da6   :  { %v5118_v54 = vpop.permute.xlu0 %5117  ;;  %v5107_v51 = vpop.xlane.xlu1 %5106 }
0x1da7   :  { %7743 = vmatpush3.msra.mxu0 %v5118_v54  ;;  %8089 = vrcp.f32 %v5107_v51 }
0x1da8   :  { %7752 = vmatprep.subr.mxu0 %v8264_v20 }
0x1da9   :  { %v8086_v45 = vpop.eup %8085 }
0x1daa   :  { %v5112_v50 = vmul.f32 %v8086_v45, %v8080_v36  ;;  %v5418_v47 = vpop.permute.xlu0 %5417  ;;  %v5797_v11 = vpop.permute.xlu1 %5796 }
0x1dac   :  { %7745 = vmatmul.mubr.msk.f32.vlgmr.msra.gmra.mrb[58].mxu0 %vm275_vm2, %v5112_v50 }
0x1dad   :  { %7753 = vmatpush3.msra.mxu0 %v9062_v19  ;;  %7754 = vmatprep.mubr.msk.f32.mxu0 %vm8265_vm1, %v8264_v20  ;;  %v8088_v43 = vpop.eup %8087 }
0x1dae   :  { %7762 = vmatprep.subr.mxu0 %v8264_v20  ;;  %v5569_v22 = vpop.permute.xlu0 %5568  ;;  %v5114_v56 = vmul.f32 %v8088_v43, %v8082_v39 }
0x1db1   :  { %v8090_v57 = vpop.eup %8089 }
0x1db2   :  { %v5115_v58 = vmul.f32 %v8090_v57, %v8084_v40  ;;  %v5799_v59 = vpop.permute.xlu0 %5798 }
0x1db6   :  { %v5877_v60 = vpop.permute.xlu0 %5876 }
0x1dba   :  { %v5875_v61 = vpop.permute.xlu0 %5874 }
0x1dbe   :  { %v5955_v10 = vpop.permute.xlu0 %5954 }
0x1dc2   :  { %v5953_v14 = vpop.permute.xlu0 %5952 }
0x1ddd   :  { %v5266_v53 = vpop.f32.mrb[58].mxu1 }
0x1dde   :  { %v7751_v55 = vpop.f32.mrb[59].mxu1  ;;  %7755 = vmatmul.mubr.msk.f32.vlgmr.msra.gmra.mrb[60].mxu0 %vm275_vm2, %v5266_v53 }
0x1ddf   :  { %7763 = vmatpush3.msra.mxu0 %v5418_v47  ;;  %7764 = vmatprep.mubr.msk.f32.mxu0 %vm8265_vm1, %v8264_v20  ;;  %v4760_v55 = vadd.f32 %v8995_v46, %v9030_v30 }
0x1de0   :  { %7772 = vmatprep.subr.mxu0 %v8264_v20 }
0x1de2   :  { %7765 = vmatmul.mubr.msk.f32.vlgmr.msra.gmra.mrb[62].mxu0 %vm275_vm2, %v5114_v56 }
0x1de3   :  { %7773 = vmatpush3.msra.mxu0 %v5569_v22  ;;  %7774 = vmatprep.mubr.msk.f32.mxu0 %vm8265_vm1, %v8264_v20 }
0x1de4   :  { %7782 = vmatprep.subr.mxu0 %v8264_v20 }
0x1de6   :  { %7775 = vmatmul.mubr.msk.f32.vlgmr.msra.gmra.mrb[64].mxu0 %vm275_vm2, %v5115_v58 }
0x1de7   :  { %7784 = vmatprep.mubr.msk.f32.mxu0 %vm8265_vm1, %v8264_v20 }
0x1dea   :  { %7783 = vmatpush3.xpose.msk.msra.mxu0 %vm275_vm2, %v8998_v49  ;;  %v9094_v49 = vld [vmem:[%s9258_s13] sm:$0xff] }
0x1deb   :  { %7792 = vmatprep.subr.mxu0 %v8264_v20  ;;  %7758 = vmatpush3.msra.mxu1 %v9094_v49 }
0x1dec   :  { %7767 = vmatprep.subr.mxu1 %v8264_v20 }
0x1ded   :  { %7785 = vmatmul.mubr.msk.f32.vlgmr.msra.gmra.mrb[66].mxu0 %vm275_vm2, %v5719_v41 }
0x1dee   :  { %7793 = vmatpush3.xpose.msk.msra.mxu0 %vm275_vm2, %v5877_v60  ;;  %7794 = vmatprep.mubr.msk.f32.mxu0 %vm8265_vm1, %v8264_v20 }
0x1def   :  { %7802 = vmatprep.subr.mxu0 %v8264_v20 }
0x1df1   :  { %7795 = vmatmul.mubr.msk.f32.vlgmr.msra.gmra.mrb[68].mxu0 %vm275_vm2, %v5875_v61  ;;  %v9145_v61 = vld [vmem:[#allocation6 + $0x12] ss:$0 sm:$0xff] }
0x1df2   :  { %7804 = vmatprep.mubr.msk.f32.mxu0 %vm8265_vm1, %v8264_v20 }
0x1e7f   :  { %v5189_v0 = vpop.f32.mrb[58].mxu0 }
0x1e80   :  { %v7746_v31 = vpop.f32.mrb[59].mxu0  ;;  %7760 = vmatmul.mubr.msk.f32.vlgmr.msra.gmra.mrb[60].mxu1 %vm275_vm2, %v5189_v0 }
0x1e81   :  { %7768 = vmatpush3.msra.mxu1 %v9101_v62  ;;  %7769 = vmatprep.mubr.msk.f32.mxu1 %vm8265_vm1, %v8264_v20 }
0x1e82   :  { %7777 = vmatprep.subr.mxu1 %v8264_v20 }
0x1eb1   :  { %v5340_v2 = vpop.f32.mrb[60].mxu0 }
0x1eb2   :  { %v7756_v5 = vpop.f32.mrb[61].mxu0 }
0x1eb5   :  { %v5489_v7 = vpop.f32.mrb[62].mxu0 }
0x1eb6   :  { %v7766_v15 = vpop.f32.mrb[63].mxu0  ;;  %7770 = vmatmul.mubr.msk.f32.vlgmr.msra.gmra.mrb[62].mxu1 %vm275_vm2, %v5489_v7 }
0x1eb7   :  { %7778 = vmatpush3.msra.mxu1 %v9111_v6  ;;  %7779 = vmatprep.mubr.msk.f32.mxu1 %vm8265_vm1, %v8264_v20 }
0x1eb8   :  { %7787 = vmatprep.subr.mxu1 %v8264_v20 }
0x1eb9   :  { %v5640_v8 = vpop.f32.mrb[64].mxu0 }
0x1eba   :  { %v7776_v9 = vpop.f32.mrb[65].mxu0  ;;  %7780 = vmatmul.mubr.msk.f32.vlgmr.msra.gmra.mrb[64].mxu1 %vm275_vm2, %v5640_v8 }
0x1ebb   :  { %7789 = vmatprep.mubr.msk.f32.mxu1 %vm8265_vm1, %v8264_v20 }
0x1ebe   :  { %7788 = vmatpush3.xpose.msk.msra.mxu1 %vm275_vm2, %v5799_v59 }
0x1ebf   :  { %7797 = vmatprep.subr.mxu1 %v8264_v20 }
0x1ec0   :  { %v5792_v12 = vpop.f32.mrb[66].mxu0 }
0x1ec1   :  { %v7786_v13 = vpop.f32.mrb[67].mxu0  ;;  %7790 = vmatmul.mubr.msk.f32.vlgmr.msra.gmra.mrb[66].mxu1 %vm275_vm2, %v5797_v11  ;;  %v6030_v63 = vsel %vm275_vm2, %v5792_v12, -inf }
0x1ec2   :  { %7798 = vmatpush3.xpose.msk.msra.mxu1 %vm275_vm2, %v5955_v10  ;;  %7799 = vmatprep.mubr.msk.f32.mxu1 %vm8265_vm1, %v8264_v20 }
0x1ec3   :  { %7807 = vmatprep.subr.mxu1 %v8264_v20 }
0x1ec4   :  { %v5948_v16 = vpop.f32.mrb[68].mxu0 }
0x1ec5   :  { %v7796_v17 = vpop.f32.mrb[69].mxu0  ;;  %7800 = vmatmul.mubr.msk.f32.vlgmr.msra.gmra.mrb[68].mxu1 %vm275_vm2, %v5953_v14  ;;  %v6036_v36 = vsel %vm275_vm2, %v5948_v16, -inf }
0x1ec6   :  { %7809 = vmatprep.mubr.msk.f32.mxu1 %vm8265_vm1, %v8264_v20 }
0x1f53   :  { %v5413_v1 = vpop.f32.mrb[60].mxu1 }
0x1f54   :  { %v5414_v18 = vadd.f32 %v5413_v1, %v5340_v2  ;;  %v7761_v21 = vpop.f32.mrb[61].mxu1 }
0x1f89   :  { %v5563_v25 = vpop.f32.mrb[62].mxu1 }
0x1f8a   :  { %v5567_v28 = vadd.f32 %v5563_v25, %v5414_v18  ;;  %v7771_v4 = vpop.f32.mrb[63].mxu1 }
0x1f8d   :  { %v5714_v52 = vpop.f32.mrb[64].mxu1 }
0x1f8e   :  { %v5718_v29 = vadd.f32 %v5714_v52, %v5567_v28  ;;  %v7781_v23 = vpop.f32.mrb[65].mxu1 }
0x1f90   :  { %v6682_v46 = vadd.f32 %v9145_v61, %v5718_v29 }
0x1f92   :  { %v9149_v30 = vadd.f32 %v6682_v46, %v8978_v24 }
0x1f94   :  { %v5870_v32 = vpop.f32.mrb[66].mxu1  ;;  %v6686_v0 = vsel %vm160_vm0, %v9149_v30, 0.0 }
0x1f95   :  { %v7791_v48 = vpop.f32.mrb[67].mxu1  ;;  %v6033_v33 = vsel %vm275_vm2, %v5870_v32, -inf }
0x1f96   :  { %6034 = vmax.xlane.f32.xlu1 %v6033_v33 }
0x1f98   :  { %v6026_v34 = vpop.f32.mrb[68].mxu1 }
0x1f99   :  { %v7801_v35 = vpop.f32.mrb[69].mxu1  ;;  %v6039_v37 = vsel %vm275_vm2, %v6026_v34, -inf }
0x1f9a   :  { %6031 = vmax.xlane.f32.xlu1 %v6030_v63 }
0x1f9e   :  { %6037 = vmax.xlane.f32.xlu1 %v6036_v36 }
0x1fa2   :  { %6040 = vmax.xlane.f32.xlu1 %v6039_v37 }
0x2023   :  { %v6035_v39 = vpop.xlane.xlu1 %6034 }
0x2024   :  { %v6043_v26 = vsub.f32 %v5870_v32, %v6035_v39 }
0x2026   :  { %v6048_v40 = vmul.f32 1.442695, %v6043_v26 }
0x2027   :  { %v6032_v27 = vpop.xlane.xlu1 %6031 }
0x2028   :  { %8091 = vpow2.f32 %v6048_v40  ;;  %v6042_v41 = vsub.f32 %v5792_v12, %v6032_v27 }
0x202a   :  { %v6046_v3 = vmul.f32 1.442695, %v6042_v41 }
0x202b   :  { %v6038_v42 = vpop.xlane.xlu1 %6037 }
0x202c   :  { %8093 = vpow2.f32 %v6046_v3  ;;  %v6044_v54 = vsub.f32 %v5948_v16, %v6038_v42 }
0x202e   :  { %v6050_v45 = vmul.f32 1.442695, %v6044_v54 }
0x202f   :  { %v6041_v56 = vpop.xlane.xlu1 %6040 }
0x2030   :  { %8095 = vpow2.f32 %v6050_v45  ;;  %v6045_v57 = vsub.f32 %v6026_v34, %v6041_v56 }
0x2032   :  { %v8092_v50 = vpop.eup %8091  ;;  %v6052_v58 = vmul.f32 1.442695, %v6045_v57  ;;  %v7193_v57 = vld [vmem:[#allocation6 + $0x14] ss:$0 sm:$0xff] }
0x2033   :  { %v6057_v51 = vsel %vm275_vm2, %v8092_v50, 0.0 }
0x2034   :  { %6058 = vadd.xlane.f32.xlu0 %v6057_v51  ;;  %8097 = vpow2.f32 %v6052_v58 }
0x2036   :  { %v8094_v47 = vpop.eup %8093 }
0x2037   :  { %v6054_v43 = vsel %vm275_vm2, %v8094_v47, 0.0 }
0x2038   :  { %6055 = vadd.xlane.f32.xlu1 %v6054_v43 }
0x203a   :  { %v8096_v53 = vpop.eup %8095 }
0x203b   :  { %v6060_v22 = vsel %vm275_vm2, %v8096_v53, 0.0 }
0x203c   :  { %6061 = vadd.xlane.f32.xlu1 %v6060_v22 }
0x203e   :  { %v8098_v59 = vpop.eup %8097 }
0x203f   :  { %v6063_v60 = vsel %vm275_vm2, %v8098_v59, 0.0 }
0x204a   :  { %6152 = vrot.lane.b32.xlu0 %v4760_v55, %s8266_s6 }
0x204d   :  { %6075 = vrot.lane.b32.xlu1 %v4760_v55, %s8267_s24 }
0x2051   :  { %6375 = vrot.lane.b32.xlu1 %v4760_v55, %s8268_s26 }
0x2055   :  { %6526 = vrot.lane.b32.xlu1 %v4760_v55, %s8270_s30 }
0x2069   :  { %6064 = vadd.xlane.f32.xlu0 %v6063_v60  ;;  %v6726_v60 = vld [vmem:[#allocation11] sm:$0xff] }
0x2079   :  { %6687 = vadd.xlane.f32.xlu1 %v6686_v0  ;;  %v6729_v0 = vld [vmem:[#allocation11 + $0x18] sm:$0xff] }
0x20c1   :  { %v6059_v31 = vpop.xlane.xlu0 %6058 }
0x20c2   :  { %8099 = vrcp.f32 %v6059_v31 }
0x20c5   :  { %v6153_v2 = vpop.permute.xlu0 %6152  ;;  %v6056_v5 = vpop.xlane.xlu1 %6055 }
0x20c6   :  { %8101 = vrcp.f32 %v6056_v5  ;;  %7808 = vmatpush3.msra.mxu1 %v6153_v2  ;;  %v6818_v2 = vld [vmem:[%s9260_s15] sm:$0xff]  ;;  %v6819_v5 = vld [vmem:[%s9260_s15 + $0x8] sm:$0xff] }
0x20c7   :  { %7817 = vmatprep.subr.mxu1 %v8264_v20 }
0x20c9   :  { %v6062_v7 = vpop.xlane.xlu1 %6061 }
0x20ca   :  { %8103 = vrcp.f32 %v6062_v7  ;;  %v6820_v7 = vld [vmem:[%s9260_s15 + $0x10] sm:$0xff] }
0x20cc   :  { %v8100_v15 = vpop.eup %8099 }
0x20cd   :  { %v6071_v8 = vmul.f32 %v8100_v15, %v8092_v50  ;;  %v6076_v9 = vpop.permute.xlu1 %6075  ;;  %v7943_v15 = vpack.c.bf16 %v6819_v5, %v6818_v2  ;;  %v6954_v5 = vld [vmem:[%s9261_s16] sm:$0x1] }
0x20ce   :  { %7803 = vmatpush3.msra.mxu0 %v6076_v9 }
0x20cf   :  { %7810 = vmatmul.mubr.msk.f32.vlgmr.msra.gmra.mrb[70].mxu1 %vm275_vm2, %v6071_v8  ;;  %7812 = vmatprep.subr.mxu0 %v8264_v20  ;;  %v6821_v8 = vld [vmem:[%s9260_s15 + $0x18] sm:$0xff] }
0x20d0   :  { %v8102_v24 = vpop.eup %8101  ;;  %7818 = vmatpush3.msra.mxu1 %v9094_v49  ;;  %7819 = vmatprep.mubr.msk.f32.mxu1 %vm8265_vm1, %v8264_v20  ;;  %v7947_v9 = vpack.c.bf16 %v6821_v8, %v6820_v7  ;;  %v6963_v7 = vsub.s32 0, %v8525_v38 }
0x20d1   :  { %v6070_v10 = vmul.f32 %v8102_v24, %v8094_v47  ;;  %7827 = vmatprep.subr.mxu1 %v8264_v20  ;;  %v6376_v12 = vpop.permute.xlu1 %6375  ;;  %v6822_v24 = vld [vmem:[%s9260_s15 + $0x20] sm:$0xff] }
0x20d3   :  { %7805 = vmatmul.mubr.msk.f32.vlgmr.msra.gmra.mrb[70].mxu0 %vm275_vm2, %v6070_v10  ;;  %v6823_v10 = vld [vmem:[%s9260_s15 + $0x28] sm:$0xff] }
0x20d4   :  { %7813 = vmatpush3.msra.mxu0 %v9062_v19  ;;  %7814 = vmatprep.mubr.msk.f32.mxu0 %vm8265_vm1, %v8264_v20  ;;  %v8104_v49 = vpop.eup %8103 }
0x20d5   :  { %7822 = vmatprep.subr.mxu0 %v8264_v20  ;;  %v6072_v16 = vmul.f32 %v8104_v49, %v8096_v53  ;;  %v6527_v1 = vpop.permute.xlu1 %6526 }
0x20f6   :  { %v6065_v11 = vpop.xlane.xlu0 %6064 }
0x20f7   :  { %8105 = vrcp.f32 %v6065_v11  ;;  %v7951_v11 = vpack.c.bf16 %v6823_v10, %v6822_v24 }
0x2101   :  { %v8106_v19 = vpop.eup %8105 }
0x2102   :  { %v6073_v21 = vmul.f32 %v8106_v19, %v8098_v59 }
0x2106   :  { %v6688_v33 = vpop.xlane.xlu1 %6687 }
0x2107   :  { %v6692_v36 = vmul.f32 0.03125, %v6688_v33 }
0x2109   :  { %v6694_v40 = vsub.f32 %v9149_v30, %v6692_v36  ;;  %v6728_v30 = vld [vmem:[#allocation11 + $0x10] sm:$0xff] }
0x210a   :  { %v7939_v31 = vpack.c.bf16 %v6729_v0, %v6728_v30 }
0x210b   :  { %v6696_v3 = vmul.f32 %v6694_v40, %v6694_v40 }
0x210d   :  { %v6698_v42 = vsel %vm160_vm0, %v6696_v3, 0.0 }
0x21a2   :  { %v6224_v13 = vpop.f32.mrb[70].mxu1 }
0x21a3   :  { %v7811_v14 = vpop.f32.mrb[71].mxu1  ;;  %7815 = vmatmul.mubr.msk.f32.vlgmr.msra.gmra.mrb[72].mxu0 %vm275_vm2, %v6224_v13 }
0x21a4   :  { %7823 = vmatpush3.msra.mxu0 %v6376_v12  ;;  %7824 = vmatprep.mubr.msk.f32.mxu0 %vm8265_vm1, %v8264_v20 }
0x21a5   :  { %7832 = vmatprep.subr.mxu0 %v8264_v20 }
0x21a6   :  { %v6147_v17 = vpop.f32.mrb[70].mxu0 }
0x21a7   :  { %v7806_v18 = vpop.f32.mrb[71].mxu0  ;;  %7820 = vmatmul.mubr.msk.f32.vlgmr.msra.gmra.mrb[72].mxu1 %vm275_vm2, %v6147_v17  ;;  %7825 = vmatmul.mubr.msk.f32.vlgmr.msra.gmra.mrb[74].mxu0 %vm275_vm2, %v6072_v16 }
0x21a8   :  { %7833 = vmatpush3.msra.mxu0 %v6527_v1  ;;  %7834 = vmatprep.mubr.msk.f32.mxu0 %vm8265_vm1, %v8264_v20  ;;  %v6824_v1 = vld [vmem:[%s9260_s15 + $0x30] sm:$0xff]  ;;  %v6825_v18 = vld [vmem:[%s9260_s15 + $0x38] sm:$0xff] }
0x21a9   :  { %7828 = vmatpush3.msra.mxu1 %v9101_v62  ;;  %7829 = vmatprep.mubr.msk.f32.mxu1 %vm8265_vm1, %v8264_v20 }
0x21aa   :  { %7837 = vmatprep.subr.mxu1 %v8264_v20 }
0x21ab   :  { %7835 = vmatmul.mubr.msk.f32.vlgmr.msra.gmra.mrb[76].mxu0 %vm275_vm2, %v6073_v21  ;;  %v7955_v21 = vpack.c.bf16 %v6825_v18, %v6824_v1 }
0x2276   :  { %v6298_v25 = vpop.f32.mrb[72].mxu0 }
0x2277   :  { %v7816_v28 = vpop.f32.mrb[73].mxu0 }
0x227a   :  { %v6371_v4 = vpop.f32.mrb[72].mxu1  ;;  %v6447_v52 = vpop.f32.mrb[74].mxu0 }
0x227b   :  { %v6372_v29 = vadd.f32 %v6371_v4, %v6298_v25  ;;  %v7821_v23 = vpop.f32.mrb[73].mxu1  ;;  %v7826_v32 = vpop.f32.mrb[75].mxu0  ;;  %7830 = vmatmul.mubr.msk.f32.vlgmr.msra.gmra.mrb[74].mxu1 %vm275_vm2, %v6447_v52  ;;  %v7194_v25 = vld [vmem:[%s9248_s3 + $0x1] ss:$0 sm:$0xff] }
0x227c   :  { %7838 = vmatpush3.msra.mxu1 %v9111_v6  ;;  %7839 = vmatprep.mubr.msk.f32.mxu1 %vm8265_vm1, %v8264_v20  ;;  %v7197_v32 = vld [vmem:[#allocation6 + $0x15] ss:$0 sm:$0xff] }
0x227d   :  { %7944 = vmatprep.subr.bf16.mxu1 %v7943_v15 }
0x227e   :  { %v6598_v62 = vpop.f32.mrb[76].mxu0 }
0x227f   :  { %v7836_v48 = vpop.f32.mrb[77].mxu0  ;;  %7840 = vmatmul.mubr.msk.f32.vlgmr.msra.gmra.mrb[76].mxu1 %vm275_vm2, %v6598_v62 }
0x2280   :  { %7946 = vmatpush3.bf16.msra.mxu1 %v7943_v15 }
0x2281   :  { %7948 = vmatprep.subr.bf16.mxu1 %v7947_v9 }
0x2284   :  { %7950 = vmatpush3.bf16.msra.mxu1 %v7947_v9 }
0x2285   :  { %7952 = vmatprep.subr.bf16.mxu1 %v7951_v11 }
0x2288   :  { %7954 = vmatpush3.bf16.msra.mxu1 %v7951_v11 }
0x2289   :  { %7956 = vmatprep.subr.bf16.mxu1 %v7955_v21 }
0x228c   :  { %7958 = vmatpush3.bf16.msra.mxu1 %v7955_v21 }
0x234e   :  { %v6521_v34 = vpop.f32.mrb[74].mxu1 }
0x234f   :  { %v6525_v35 = vadd.f32 %v6521_v34, %v6372_v29  ;;  %v7831_v63 = vpop.f32.mrb[75].mxu1 }
0x2352   :  { %v6672_v37 = vpop.f32.mrb[76].mxu1 }
0x2353   :  { %v6676_v39 = vadd.f32 %v6672_v37, %v6525_v35  ;;  %v7841_v26 = vpop.f32.mrb[77].mxu1 }
0x2355   :  { %v6683_v27 = vadd.f32 %v9145_v61, %v6676_v39  ;;  %v6727_v61 = vld [vmem:[#allocation11 + $0x8] sm:$0xff] }
0x2356   :  { %v7935_v46 = vpack.c.bf16 %v6727_v61, %v6726_v60 }
0x2357   :  { %v6685_v6 = vadd.f32 %v6683_v27, %v8989_v44  ;;  %v7192_v44 = vld [vmem:[#allocation6 + $0x13] ss:$0 sm:$0xff] }
0x2358   :  { %7936 = vmatprep.subr.bf16.mxu0 %v7935_v46 }
0x2359   :  { %v6689_v41 = vsel %vm160_vm0, %v6685_v6, 0.0  ;;  %7938 = vmatpush3.bf16.msra.mxu0 %v7935_v46  ;;  %v7201_v46 = vld [vmem:[#allocation6 + $0x17] ss:$0 sm:$0xff] }
0x235a   :  { %6690 = vadd.xlane.f32.xlu0 %v6689_v41  ;;  %7940 = vmatprep.subr.bf16.mxu0 %v7939_v31 }
0x235d   :  { %7942 = vmatpush3.bf16.msra.mxu0 %v7939_v31 }
0x235e   :  { %6699 = vadd.xlane.f32.xlu0 %v6698_v42 }
0x23e7   :  { %v6691_v54 = vpop.xlane.xlu0 %6690 }
0x23e8   :  { %v6693_v45 = vmul.f32 0.03125, %v6691_v54 }
0x23ea   :  { %v6695_v50 = vsub.f32 %v6685_v6, %v6693_v45 }
0x23eb   :  { %v6700_v51 = vpop.xlane.xlu0 %6699 }
0x23ec   :  { %v6704_v47 = vmul.f32 0.03125, %v6700_v51  ;;  %v6697_v43 = vmul.f32 %v6695_v50, %v6695_v50  ;;  %v8278_v51 = vmov 0.0|0.0  }
0x23ed   :  { %7959 = vmatprep.subr.bf16.mxu0 %v8278_v51 }
0x23ee   :  { %v6706_v53 = vadd.f32 1e-05, %v6704_v47  ;;  %v6701_v22 = vsel %vm160_vm0, %v6697_v43, 0.0 }
0x23ef   :  { %6702 = vadd.xlane.f32.xlu0 %v6701_v22 }
0x23f0   :  { %8107 = vrsqrt.f32 %v6706_v53 }
0x23fa   :  { %v8108_v55 = vpop.eup %8107 }
0x23fb   :  { %v6710_v56 = vmul.f32 %v8108_v55, %v6694_v40 }
0x23fd   :  { %v6717_v58 = vmul.f32 %v7192_v44, %v6710_v56 }
0x23ff   :  { %v6724_v59 = vadd.f32 %v7193_v57, %v6717_v58  ;;  %v7200_v58 = vld [vmem:[#allocation6 + $0x16] ss:$0 sm:$0xff] }
0x2401   :  { %7850 = vmatprep.mubr.msk.f32.mxu0 %vm160_vm0, %v6724_v59 }
0x247c   :  { %v6703_v12 = vpop.xlane.xlu0 %6702 }
0x247d   :  { %v6705_v49 = vmul.f32 0.03125, %v6703_v12 }
0x247f   :  { %v6707_v13 = vadd.f32 1e-05, %v6705_v49 }
0x2481   :  { %8109 = vrsqrt.f32 %v6707_v13 }
0x248b   :  { %v8110_v14 = vpop.eup %8109 }
0x248c   :  { %v6711_v16 = vmul.f32 %v8110_v14, %v6695_v50  ;;  %v6955_v50 = vld [vmem:[#allocation2] sm:$0x1] }
0x248e   :  { %v6718_v19 = vmul.f32 %v7192_v44, %v6711_v16 }
0x2490   :  { %v6725_v17 = vadd.f32 %v7193_v57, %v6718_v19 }
0x2492   :  { %7851 = vmatmul.mubr.msk.f32.vlgmr.msra.gmra.mrb[78].mxu0 %vm160_vm0, %v6725_v17 }
0x2493   :  { %7876 = vmatprep.mubr.msk.f32.mxu0 %vm8265_vm1, %v8264_v20 }
0x2565   :  { %v7852_v28 = vpop.f32.mrb[78].mxu0 }
0x2566   :  { %v6813_v4 = vadd.f32 %v7852_v28, %v7194_v25  ;;  %v6807_v52 = vpop.f32.mrb[79].mxu0 }
0x2567   :  { %v6808_v29 = vadd.f32 %v7194_v25, %v6807_v52 }
0x2568   :  { %v6817_v23 = vmax.f32 %v6813_v4, 0.0 }
0x2569   :  { %v6816_v20 = vmax.f32 %v6808_v29, 0.0 }
0x256b   :  { %7869 = vmatprep.mubr.msk.f32.mxu1 %vm2355_vm4, %v6816_v20 }
0x256c   :  { %7870 = vmatmul.mubr.msk.f32.vlgmr.msra.gmra.mrb[78].mxu1 %vm2355_vm4, %v6817_v23 }
0x263f   :  { %v7871_v62 = vpop.f32.mrb[78].mxu1 }
0x2640   :  { %v6903_v48 = vpop.f32.mrb[79].mxu1  ;;  %v6909_v33 = vadd.f32 %v7871_v62, %v7197_v32 }
0x2641   :  { %v6904_v34 = vadd.f32 %v7197_v32, %v6903_v48 }
0x2642   :  { %v6913_v63 = vadd.f32 %v6909_v33, %v6725_v17 }
0x2643   :  { %v6912_v35 = vadd.f32 %v6904_v34, %v6724_v59 }
0x2644   :  { %v6917_v37 = vsel %vm160_vm0, %v6913_v63, 0.0 }
0x2645   :  { %v6914_v36 = vsel %vm160_vm0, %v6912_v35, 0.0 }
0x2646   :  { %6915 = vadd.xlane.f32.xlu0 %v6914_v36 }
0x264a   :  { %6918 = vadd.xlane.f32.xlu0 %v6917_v37 }
0x26d3   :  { %v6916_v39 = vpop.xlane.xlu0 %6915 }
0x26d4   :  { %v6920_v26 = vmul.f32 0.03125, %v6916_v39 }
0x26d6   :  { %v6922_v40 = vsub.f32 %v6912_v35, %v6920_v26 }
0x26d7   :  { %v6919_v27 = vpop.xlane.xlu0 %6918 }
0x26d8   :  { %v6921_v6 = vmul.f32 0.03125, %v6919_v27  ;;  %v6924_v41 = vmul.f32 %v6922_v40, %v6922_v40 }
0x26da   :  { %v6923_v3 = vsub.f32 %v6913_v63, %v6921_v6  ;;  %v6926_v42 = vsel %vm160_vm0, %v6924_v41, 0.0 }
0x26db   :  { %6927 = vadd.xlane.f32.xlu0 %v6926_v42 }
0x26dc   :  { %v6925_v54 = vmul.f32 %v6923_v3, %v6923_v3 }
0x26de   :  { %v6929_v45 = vsel %vm160_vm0, %v6925_v54, 0.0 }
0x26df   :  { %6930 = vadd.xlane.f32.xlu0 %v6929_v45 }
0x26f5   :  { %6958 = vperm.xlu0 %7988, %v6955_v50  }
0x2768   :  { %v6928_v47 = vpop.xlane.xlu0 %6927 }
0x2769   :  { %v6932_v43 = vmul.f32 0.03125, %v6928_v47 }
0x276b   :  { %v6934_v53 = vadd.f32 1e-05, %v6932_v43 }
0x276c   :  { %v6931_v22 = vpop.xlane.xlu0 %6930 }
0x276d   :  { %8111 = vrsqrt.f32 %v6934_v53  ;;  %v6933_v55 = vmul.f32 0.03125, %v6931_v22 }
0x276f   :  { %v6935_v44 = vadd.f32 1e-05, %v6933_v55 }
0x2771   :  { %8113 = vrsqrt.f32 %v6935_v44 }
0x2774   :  { %v6959_v15 = vpop.permute.xlu0 %6958 }
0x2775   :  { %v6964_v8 = vrot.slane %v6959_v15, %v6963_v7 }
0x2777   :  { %v8112_v56 = vpop.eup %8111 }
0x2778   :  { %v6938_v57 = vmul.f32 %v8112_v56, %v6922_v40 }
0x277a   :  { %v6945_v60 = vmul.f32 %v7200_v58, %v6938_v57 }
0x277b   :  { %v8114_v59 = vpop.eup %8113 }
0x277c   :  { %v6939_v61 = vmul.f32 %v8114_v59, %v6923_v3  ;;  %v6952_v0 = vadd.f32 %v7201_v46, %v6945_v60 }
0x277e   :  { %v6946_v30 = vmul.f32 %v7200_v58, %v6939_v61 }
0x2780   :  { %v6953_v31 = vadd.f32 %v7201_v46, %v6946_v30 }
0x2782   :  { %v7960_v2 = vpack.c.bf16 %v6953_v31, %v6952_v0 }
0x2784   :  { %7962 = vmatpush3.bf16.xpose.msk.msra.mxu0 %vm7961_vm5, %v7960_v2 }
0x278b   :  { %7877 = vmatmul.mubr.msk.f32.vlgmr.msra.gmra.mrb[80].mxu0 %vm160_vm0, %v6954_v5 }
0x285e   :  { %v7040_v9 = vpop.f32.mrb[80].mxu0 }
0x285f   :  { %v7041_v24 = vadd.f32 %v7040_v9, %v6964_v8  ;;  %v7878_v10 = vpop.f32.mrb[81].mxu0 }
0x2861   :  { %7045 = vst.msk [vmem:[#allocation12] sm:$0x1] %vm7044_vm6, %v7041_v24 }
0x2862   :  { %8236 = shalt.err (!%p8233_p2)
}
0x2863   :  { %s8237_s25 = scalar_lea.hbm %s9262_s17, 16 }
0x2864   :  { %p8238_p3 = scmp.ne.s32.totalorder %s9262_s17, %s8237_s25  ;;  %p8241_p4 = scmp.lt.u32.totalorder %s8237_s25, %s9262_s17 }
0x2866   :  { %p8243_p5 = pnand %p8241_p4, %p8238_p3 }
0x2868   :  { %8246 = shalt.err (!%p8243_p5)
}
0x2869   :  { %7055 = dma.vmem_to_hbm [thread:$0]  %s7053_s11, 16, %s9262_s17, [#allocation5]  }
0x286a   :  { %8253 = dma.done.wait [#allocation5], 16  }
0x286b   :  { %8254 = vsyncadd [#allocation5], 4294967280 }
0x286c   :  { %7059 = vsyncpa [#allocation4], 1 }
0x286d   :  { %7060 = vsyncpa [#allocation7], 1 }
0x286e   :  { %7061 = vsyncpa [#allocation10], 1 }
0x286f   :  { %7062 = vsyncpa [#allocation5], 1 }

</bundles_post_ra>
